<compile_context>
chip_gen: v7x
topology: tpu7x:2x2x1
jax: 0.10.0
libtpu: 0.0.40
codegen_flags: <defaults>
</compile_context>

<pallas_src>
import functools

import jax
import jax.numpy as jnp
from jax import lax
from jax.experimental import pallas as pl
from jax.experimental.pallas import tpu as pltpu


def _round_up(x, m):
    return ((x + m - 1) // m) * m


def _vmem_capacity_bytes():
    """Physical VMEM of the current TPU generation (conservative fallback)."""
    try:
        info = pltpu.get_tpu_info()
        for attr in ("vmem_capacity_bytes", "vmem_size_bytes", "vmem_bytes"):
            v = getattr(info, attr, None)
            if v:
                return int(v)
    except Exception:
        pass
    return 64 * 1024 * 1024   # v7x per-core VMEM (smallest of the fleet)


def _vmem_usage_bytes(T, bb, in_pad, nhid, nlayers, ncls_pad, w_bytes):
    """Rough resident-VMEM estimate for a given batch tile size."""
    H4 = 4 * nhid
    w = in_pad * H4 * w_bytes                       # W_ih layer 0
    w += (nlayers - 1) * nhid * H4 * w_bytes        # W_ih layers >= 1
    w += nlayers * nhid * H4 * w_bytes              # W_hh all layers
    w += nlayers * 8 * H4 * 4                       # biases (sublane padded, f32)
    w += nhid * ncls_pad * w_bytes + 8 * ncls_pad * 4
    x = 2 * T * bb * in_pad * 4                     # double-buffered x tile
    xp = T * bb * H4 * 4                            # hoisted layer-0 projection
    o = 2 * bb * ncls_pad * 4                       # double-buffered output
    state = 8 * nlayers * bb * nhid * 4             # h/c state + gate temporaries
    return w + x + xp + o + state


def _pick_block_b(B, T, in_pad, nhid, nlayers, ncls_pad, w_bytes, budget):
    # Bigger tiles feed the 128/256-row MXU and cut per-grid-step overhead.
    for bb in (128, 64, 32, 16, 8):
        if bb > max(B, 8):
            continue
        if _vmem_usage_bytes(T, bb, in_pad, nhid, nlayers,
                             ncls_pad, w_bytes) <= budget:
            return bb
    return 8


def make_lstm_classify_kernel(nlayers, nhid, block_b, unroll):
    """Builds the Pallas kernel body (closed over static config)."""
    H4 = 4 * nhid
    bb = block_b

    def kernel(*refs):
        # refs: x_tile, [w_ih, w_hh, bias] * nlayers, wfc, bfc, out, xproj
        x_ref = refs[0]
        w_ih = [refs[1 + 3 * l] for l in range(nlayers)]
        w_hh = [refs[2 + 3 * l] for l in range(nlayers)]
        b = [refs[3 + 3 * l] for l in range(nlayers)]
        wfc_ref, bfc_ref, out_ref, xproj_ref = refs[3 * nlayers + 1:]

        T = x_ref.shape[0] // bb
        f32 = jnp.float32
        mm_dtype = w_hh[0].dtype

        # ---- Hoisted layer-0 input projection: one big MXU matmul ----------
        # (T*bb, in_pad) @ (in_pad, 4H) + b0, written to a VMEM scratch slab
        # and consumed per timestep inside the recurrence. Bias folded here.
        xproj_ref[...] = (jnp.dot(x_ref[...].astype(mm_dtype), w_ih[0][...],
                                  preferred_element_type=f32) + b[0][...])

        # Hoist the (1,4H)->(bb,4H) bias broadcasts for layers >= 1 out of the
        # time loop (JAX does not CSE broadcast_in_dim).
        biases = [jnp.broadcast_to(b[l][...], (bb, H4))
                  for l in range(1, nlayers)]

        def gates_to_state(pre, c_prev):
            # One full-width sigmoid pass; g columns were pre-scaled by 2 in
            # the wrapper so tanh(pre_g) == 2*sigmoid(2*pre_g) - 1.
            s = jax.nn.sigmoid(pre)
            i_g = s[:, 0 * nhid:1 * nhid]
            f_g = s[:, 1 * nhid:2 * nhid]
            g_g = 2.0 * s[:, 2 * nhid:3 * nhid] - 1.0
            o_g = s[:, 3 * nhid:4 * nhid]
            c_n = f_g * c_prev + i_g * g_g
            h_n = o_g * jnp.tanh(c_n)
            return h_n, c_n

        def step(t, carry):
            hs, cs = carry
            new_h, new_c = [], []
            # Layer 0: input half of the projection precomputed; only the
            # recurrent dot sits on the serial path.
            row = pl.multiple_of(t * bb, bb)
            pre0 = (xproj_ref[pl.ds(row, bb), :]
                    + jnp.dot(hs[0].astype(mm_dtype), w_hh[0][...],
                              preferred_element_type=f32))
            h_n, c_n = gates_to_state(pre0, cs[0])
            new_h.append(h_n)
            new_c.append(c_n)
            inp = h_n
            for l in range(1, nlayers):
                pre = ((jnp.dot(inp.astype(mm_dtype), w_ih[l][...],
                                preferred_element_type=f32) + biases[l - 1])
                       + jnp.dot(hs[l].astype(mm_dtype), w_hh[l][...],
                                 preferred_element_type=f32))
                h_n, c_n = gates_to_state(pre, cs[l])
                new_h.append(h_n)
                new_c.append(c_n)
                inp = h_n
            return tuple(new_h), tuple(new_c)

        init = (tuple(jnp.zeros((bb, nhid), f32) for _ in range(nlayers)),
                tuple(jnp.zeros((bb, nhid), f32) for _ in range(nlayers)))
        hs, _ = lax.fori_loop(0, T, step, init, unroll=unroll)

        # fc on the top layer's hidden state at the last timestep only
        # (lane-dense padded output; sliced back in the wrapper).
        wfc = wfc_ref[...]
        out_ref[...] = (jnp.dot(hs[-1].astype(wfc.dtype), wfc,
                                preferred_element_type=f32) + bfc_ref[...])

    return kernel


def rnn_classify_simple_forward(x, params, *, ntoken, nhid, nlayers, nclasses,
                                block_b=None, matmul_dtype=jnp.bfloat16,
                                unroll=None, vmem_limit_bytes=None):
    """x: (B, T, ntoken) float32 -> (B, nclasses) float32.

    Note: nhid should be a multiple of 128 for lane-aligned gate slices
    (other values are correct but generate cross-lane-tile relayouts).
    """
    B, T, _ = x.shape
    f32 = jnp.float32
    H4 = 4 * nhid

    in_pad = _round_up(ntoken, 128)
    ncls_pad = _round_up(nclasses, 128)
    w_bytes = jnp.dtype(matmul_dtype).itemsize

    cap = _vmem_capacity_bytes()
    if vmem_limit_bytes is None:
        vmem_limit_bytes = int(cap * 0.75)
    budget = min(int(cap * 0.55), vmem_limit_bytes)

    if block_b is None:
        block_b = _pick_block_b(B, T, in_pad, nhid, nlayers, ncls_pad,
                                w_bytes, budget)
    assert block_b % 8 == 0, block_b
    # TODO(synk): for very long T the whole-sequence x/xproj slab does not fit
    # VMEM even at block_b=8 (notably v7x's 64 MiB); time-chunk x with
    # pltpu.emit_pipeline in that regime instead of only shrinking block_b.

    B_pad = _round_up(B, block_b)
    n_btiles = B_pad // block_b

    if unroll is None:
        # Full unroll only for short sequences / small tiles; otherwise partial
        # unroll keeps LLO visibility without spill / code-size blowup.
        unroll = T if (T <= 16 and block_b <= 32) else 2

    # Pad features to a lane multiple and batch to a tile multiple. Zero
    # padding is harmless: the matching W_ih rows are zero and padded batch
    # rows are sliced away at the end.
    x = jnp.asarray(x, f32)
    x = jnp.pad(x, ((0, B_pad - B), (0, 0), (0, in_pad - ntoken)))
    x_tbd = jnp.transpose(x, (1, 0, 2))                   # (T, B_pad, in_pad)
    # Tile-major layout so each grid step sees a 2-D (T*block_b, in_pad) slab
    # (no in-kernel reshape needed): row t*block_b + bi == batch j*block_b+bi @ t.
    x_tiles = x_tbd.reshape(T, n_btiles, block_b, in_pad)
    x_tiles = jnp.transpose(x_tiles, (1, 0, 2, 3)).reshape(
        n_btiles, T * block_b, in_pad)

    inputs = [x_tiles]
    in_specs = [pl.BlockSpec((None, T * block_b, in_pad), lambda j: (j, 0, 0))]

    # Pre-scale the g-gate columns by 2 (tanh-via-sigmoid fold).
    col_scale = jnp.ones((1, H4), f32).at[:, 2 * nhid:3 * nhid].set(2.0)

    for l in range(nlayers):
        w_ih, w_hh, b_ih, b_hh = params["lstm"][l]
        w_ih_T = jnp.asarray(w_ih, f32).T                  # (in_l, 4H)
        w_hh_T = jnp.asarray(w_hh, f32).T                  # (nhid, 4H)
        if l == 0 and in_pad != ntoken:
            w_ih_T = jnp.pad(w_ih_T, ((0, in_pad - ntoken), (0, 0)))
        bias = (jnp.asarray(b_ih, f32) + jnp.asarray(b_hh, f32))[None, :]
        w_ih_T = (w_ih_T * col_scale).astype(matmul_dtype)
        w_hh_T = (w_hh_T * col_scale).astype(matmul_dtype)
        bias = bias * col_scale                            # stays f32
        inputs += [w_ih_T, w_hh_T, bias]
        # Whole-array VMEM residency: loaded once, single-buffered.
        in_specs += [pl.BlockSpec(memory_space=pltpu.MemorySpace.VMEM),
                     pl.BlockSpec(memory_space=pltpu.MemorySpace.VMEM),
                     pl.BlockSpec(memory_space=pltpu.MemorySpace.VMEM)]

    wfc, bfc = params["fc"]
    wfc_T = jnp.asarray(wfc, f32).T                        # (nhid, nclasses)
    wfc_T = jnp.pad(wfc_T, ((0, 0), (0, ncls_pad - nclasses))).astype(matmul_dtype)
    bfc_p = jnp.pad(jnp.asarray(bfc, f32), (0, ncls_pad - nclasses))[None, :]
    inputs += [wfc_T, bfc_p]
    in_specs += [pl.BlockSpec(memory_space=pltpu.MemorySpace.VMEM),
                 pl.BlockSpec(memory_space=pltpu.MemorySpace.VMEM)]

    kernel = make_lstm_classify_kernel(nlayers, nhid, block_b, unroll)

    out = pl.pallas_call(
        kernel,
        out_shape=jax.ShapeDtypeStruct((B_pad, ncls_pad), f32),
        grid=(n_btiles,),
        in_specs=in_specs,
        out_specs=pl.BlockSpec((block_b, ncls_pad), lambda j: (j, 0)),
        scratch_shapes=[pltpu.VMEM((T * block_b, H4), f32)],
        compiler_params=pltpu.CompilerParams(
            dimension_semantics=("parallel",),
            vmem_limit_bytes=vmem_limit_bytes,
        ),
    )(*inputs)
    return out[:B, :nclasses]


def reference_forward(x, params, *, nhid, nlayers):
    """Pure-JAX reference of the PyTorch forward (for verification)."""
    B, T, _ = x.shape
    h = [jnp.zeros((B, nhid), jnp.float32) for _ in range(nlayers)]
    c = [jnp.zeros((B, nhid), jnp.float32) for _ in range(nlayers)]
    last = None
    for t in range(T):
        inp = x[:, t, :]
        for l in range(nlayers):
            w_ih, w_hh, b_ih, b_hh = params["lstm"][l]
            gates = inp @ w_ih.T + h[l] @ w_hh.T + b_ih + b_hh
            i_g = jax.nn.sigmoid(gates[:, 0 * nhid:1 * nhid])
            f_g = jax.nn.sigmoid(gates[:, 1 * nhid:2 * nhid])
            g_g = jnp.tanh(gates[:, 2 * nhid:3 * nhid])
            o_g = jax.nn.sigmoid(gates[:, 3 * nhid:4 * nhid])
            c[l] = f_g * c[l] + i_g * g_g
            h[l] = o_g * jnp.tanh(c[l])
            inp = h[l]
        last = inp
    wfc, bfc = params["fc"]
    return last @ wfc.T + bfc


def init_params(key, *, ntoken, nhid, nlayers, nclasses):
    params = {"lstm": [], "fc": None}
    scale = 1.0 / jnp.sqrt(jnp.float32(nhid))
    for l in range(nlayers):
        in_size = ntoken if l == 0 else nhid
        key, k1, k2, k3, k4 = jax.random.split(key, 5)
        w_ih = jax.random.uniform(k1, (4 * nhid, in_size), jnp.float32, -scale, scale)
        w_hh = jax.random.uniform(k2, (4 * nhid, nhid), jnp.float32, -scale, scale)
        b_ih = jax.random.uniform(k3, (4 * nhid,), jnp.float32, -scale, scale)
        b_hh = jax.random.uniform(k4, (4 * nhid,), jnp.float32, -scale, scale)
        params["lstm"].append((w_ih, w_hh, b_ih, b_hh))
    key, k1, k2 = jax.random.split(key, 3)
    wfc = jax.random.uniform(k1, (nclasses, nhid), jnp.float32, -scale, scale)
    bfc = jax.random.uniform(k2, (nclasses,), jnp.float32, -scale, scale)
    params["fc"] = (wfc, bfc)
    return params


if __name__ == "__main__":
    # nhid is a multiple of 128 so gate slices are lane-tile aligned.
    NTOKEN, NHID, NLAYERS, NCLASSES = 16, 128, 2, 4
    B, T = 16, 8

    key = jax.random.PRNGKey(0)
    key, kx = jax.random.split(key)
    x = jax.random.normal(kx, (B, T, NTOKEN), jnp.float32)
    params = init_params(key, ntoken=NTOKEN, nhid=NHID, nlayers=NLAYERS,
                         nclasses=NCLASSES)

    ref = jax.block_until_ready(
        reference_forward(x, params, nhid=NHID, nlayers=NLAYERS))

    # f32 matmul path: tight check (only the tanh-via-sigmoid fold drifts).
    fwd_f32 = jax.jit(functools.partial(
        rnn_classify_simple_forward, ntoken=NTOKEN, nhid=NHID, nlayers=NLAYERS,
        nclasses=NCLASSES, matmul_dtype=jnp.float32))
    out_f32 = jax.block_until_ready(fwd_f32(x, params))
    assert out_f32.shape == (B, NCLASSES), out_f32.shape
    assert jnp.allclose(out_f32, ref, atol=5e-4, rtol=5e-4), (
        f"f32 path: max abs err = {jnp.max(jnp.abs(out_f32 - ref))}")

    # Default bf16-operand path (f32 state/accumulation): loose check.
    fwd_bf16 = jax.jit(functools.partial(
        rnn_classify_simple_forward, ntoken=NTOKEN, nhid=NHID, nlayers=NLAYERS,
        nclasses=NCLASSES))
    out_bf16 = jax.block_until_ready(fwd_bf16(x, params))
    assert out_bf16.shape == (B, NCLASSES), out_bf16.shape
    assert jnp.all(jnp.isfinite(out_bf16))
    assert jnp.allclose(out_bf16, ref, atol=2.5e-1, rtol=1e-1), (
        f"bf16 path: max abs err = {jnp.max(jnp.abs(out_bf16 - ref))}")

    print("KERNEL_OK")
</pallas_src>

<mosaic_0001>
module attributes {stable_mosaic.version = 11 : i64} {
  func.func @kernel(%arg0: i32, %arg1: memref<1x128x128xf32, #tpu.memory_space<vmem>>, %arg2: memref<128x512xf32, #tpu.memory_space<vmem>>, %arg3: memref<128x512xf32, #tpu.memory_space<vmem>>, %arg4: memref<1x512xf32, #tpu.memory_space<vmem>>, %arg5: memref<128x512xf32, #tpu.memory_space<vmem>>, %arg6: memref<128x512xf32, #tpu.memory_space<vmem>>, %arg7: memref<1x512xf32, #tpu.memory_space<vmem>>, %arg8: memref<128x128xf32, #tpu.memory_space<vmem>>, %arg9: memref<1x128xf32, #tpu.memory_space<vmem>>, %arg10: memref<16x128xf32, #tpu.memory_space<vmem>>, %arg11: memref<128x512xf32, #tpu.memory_space<vmem>>) attributes {dimension_semantics = [#tpu.dimension_semantics<parallel>], iteration_bounds = array<i64: 1>, scalar_prefetch = 0 : i64, scratch_operands = 1 : i64, tpu.core_type = #tpu.core_type<tc>, window_params = [{transform_indices = @transform_0, window_bounds = array<i64: 1, 128, 128>}, {pipeline_mode = #tpu.pipeline_mode<synchronous>, transform_indices = @transform_1, window_bounds = array<i64: 128, 512>}, {pipeline_mode = #tpu.pipeline_mode<synchronous>, transform_indices = @transform_2, window_bounds = array<i64: 128, 512>}, {pipeline_mode = #tpu.pipeline_mode<synchronous>, transform_indices = @transform_3, window_bounds = array<i64: 1, 512>}, {pipeline_mode = #tpu.pipeline_mode<synchronous>, transform_indices = @transform_4, window_bounds = array<i64: 128, 512>}, {pipeline_mode = #tpu.pipeline_mode<synchronous>, transform_indices = @transform_5, window_bounds = array<i64: 128, 512>}, {pipeline_mode = #tpu.pipeline_mode<synchronous>, transform_indices = @transform_6, window_bounds = array<i64: 1, 512>}, {pipeline_mode = #tpu.pipeline_mode<synchronous>, transform_indices = @transform_7, window_bounds = array<i64: 128, 128>}, {pipeline_mode = #tpu.pipeline_mode<synchronous>, transform_indices = @transform_8, window_bounds = array<i64: 1, 128>}, {transform_indices = @transform_9, window_bounds = array<i64: 16, 128>}]} {
    %c0 = arith.constant 0 : index
    %c0_0 = arith.constant 0 : index
    %c0_1 = arith.constant 0 : index
    %0 = vector.load %arg1[%c0, %c0_0, %c0_1] : memref<1x128x128xf32, #tpu.memory_space<vmem>>, vector<1x128x128xf32>
    %1 = vector.shape_cast %0 : vector<1x128x128xf32> to vector<128x128xf32>
    %c0_2 = arith.constant 0 : index
    %c0_3 = arith.constant 0 : index
    %2 = vector.load %arg2[%c0_2, %c0_3] : memref<128x512xf32, #tpu.memory_space<vmem>>, vector<128x512xf32>
    %cst = arith.constant dense<0.000000e+00> : vector<128x512xf32>
    %3 = tpu.matmul %1, %2, %cst {dimension_numbers = #tpu.dot_dimension_numbers<[1], [0], [0], [1], [0, 0, 1, 1], [], []>} : vector<128x128xf32>, vector<128x512xf32>, vector<128x512xf32> -> vector<128x512xf32>
    %c0_4 = arith.constant 0 : index
    %c0_5 = arith.constant 0 : index
    %4 = vector.load %arg4[%c0_4, %c0_5] : memref<1x512xf32, #tpu.memory_space<vmem>>, vector<1x512xf32>
    %5 = vector.broadcast %4 : vector<1x512xf32> to vector<128x512xf32>
    %6 = arith.addf %3, %5 : vector<128x512xf32>
    %c0_6 = arith.constant 0 : index
    %c0_7 = arith.constant 0 : index
    %7 = vector.load %arg11[%c0_6, %c0_7] : memref<128x512xf32, #tpu.memory_space<vmem>>, vector<128x512xf32>
    tpu.vector_store %arg11[%c0_6, %c0_7], %6 {strides = array<i32>} : memref<128x512xf32, #tpu.memory_space<vmem>>, vector<128x512xf32>,
    %c0_8 = arith.constant 0 : index
    %c0_9 = arith.constant 0 : index
    %8 = vector.load %arg7[%c0_8, %c0_9] : memref<1x512xf32, #tpu.memory_space<vmem>>, vector<1x512xf32>
    %9 = vector.shape_cast %8 : vector<1x512xf32> to vector<1x512xf32>
    %10 = vector.broadcast %9 : vector<1x512xf32> to vector<16x512xf32>
    %cst_10 = arith.constant 0.000000e+00 : f32
    %11 = vector.broadcast %cst_10 : f32 to vector<16x128xf32>
    %cst_11 = arith.constant 0.000000e+00 : f32
    %12 = vector.broadcast %cst_11 : f32 to vector<16x128xf32>
    %cst_12 = arith.constant 0.000000e+00 : f32
    %13 = vector.broadcast %cst_12 : f32 to vector<16x128xf32>
    %cst_13 = arith.constant 0.000000e+00 : f32
    %14 = vector.broadcast %cst_13 : f32 to vector<16x128xf32>
    %c0_i32 = arith.constant 0 : i32
    %c16_i32 = arith.constant 16 : i32
    %15 = arith.muli %c0_i32, %c16_i32 : i32
    %16 = tpu.assume_multiple %15, 16 : i32
    %17 = arith.index_cast %16 : i32 to index
    %c0_14 = arith.constant 0 : index
    %18 = vector.load %arg11[%17, %c0_14] : memref<128x512xf32, #tpu.memory_space<vmem>>, vector<16x512xf32>
    %c0_15 = arith.constant 0 : index
    %c0_16 = arith.constant 0 : index
    %19 = vector.load %arg3[%c0_15, %c0_16] : memref<128x512xf32, #tpu.memory_space<vmem>>, vector<128x512xf32>
    %cst_17 = arith.constant dense<0.000000e+00> : vector<16x512xf32>
    %20 = tpu.matmul %11, %19, %cst_17 {dimension_numbers = #tpu.dot_dimension_numbers<[1], [0], [0], [1], [0, 0, 1, 1], [], []>} : vector<16x128xf32>, vector<128x512xf32>, vector<16x512xf32> -> vector<16x512xf32>
    %21 = arith.addf %18, %20 : vector<16x512xf32>
    %22 = arith.negf %21 : vector<16x512xf32>
    %23 = math.exp %22 : vector<16x512xf32>
    %cst_18 = arith.constant 1.000000e+00 : f32
    %24 = vector.broadcast %cst_18 : f32 to vector<16x512xf32>
    %25 = arith.addf %24, %23 : vector<16x512xf32>
    %26 = arith.divf %24, %25 : vector<16x512xf32>
    %27 = vector.extract_strided_slice %26 {offsets = [0, 0], sizes = [16, 128], strides = [1, 1]} : vector<16x512xf32> to vector<16x128xf32>
    %28 = vector.extract_strided_slice %26 {offsets = [0, 128], sizes = [16, 128], strides = [1, 1]} : vector<16x512xf32> to vector<16x128xf32>
    %29 = vector.extract_strided_slice %26 {offsets = [0, 256], sizes = [16, 128], strides = [1, 1]} : vector<16x512xf32> to vector<16x128xf32>
    %cst_19 = arith.constant 2.000000e+00 : f32
    %30 = vector.broadcast %cst_19 : f32 to vector<16x128xf32>
    %31 = arith.mulf %30, %29 : vector<16x128xf32>
    %cst_20 = arith.constant 1.000000e+00 : f32
    %32 = vector.broadcast %cst_20 : f32 to vector<16x128xf32>
    %33 = arith.subf %31, %32 : vector<16x128xf32>
    %34 = vector.extract_strided_slice %26 {offsets = [0, 384], sizes = [16, 128], strides = [1, 1]} : vector<16x512xf32> to vector<16x128xf32>
    %35 = arith.mulf %28, %13 : vector<16x128xf32>
    %36 = arith.mulf %27, %33 : vector<16x128xf32>
    %37 = arith.addf %35, %36 : vector<16x128xf32>
    %38 = math.tanh %37 : vector<16x128xf32>
    %39 = arith.mulf %34, %38 : vector<16x128xf32>
    %c0_21 = arith.constant 0 : index
    %c0_22 = arith.constant 0 : index
    %40 = vector.load %arg5[%c0_21, %c0_22] : memref<128x512xf32, #tpu.memory_space<vmem>>, vector<128x512xf32>
    %cst_23 = arith.constant dense<0.000000e+00> : vector<16x512xf32>
    %41 = tpu.matmul %39, %40, %cst_23 {dimension_numbers = #tpu.dot_dimension_numbers<[1], [0], [0], [1], [0, 0, 1, 1], [], []>} : vector<16x128xf32>, vector<128x512xf32>, vector<16x512xf32> -> vector<16x512xf32>
    %42 = arith.addf %41, %10 : vector<16x512xf32>
    %c0_24 = arith.constant 0 : index
    %c0_25 = arith.constant 0 : index
    %43 = vector.load %arg6[%c0_24, %c0_25] : memref<128x512xf32, #tpu.memory_space<vmem>>, vector<128x512xf32>
    %cst_26 = arith.constant dense<0.000000e+00> : vector<16x512xf32>
    %44 = tpu.matmul %12, %43, %cst_26 {dimension_numbers = #tpu.dot_dimension_numbers<[1], [0], [0], [1], [0, 0, 1, 1], [], []>} : vector<16x128xf32>, vector<128x512xf32>, vector<16x512xf32> -> vector<16x512xf32>
    %45 = arith.addf %42, %44 : vector<16x512xf32>
    %46 = arith.negf %45 : vector<16x512xf32>
    %47 = math.exp %46 : vector<16x512xf32>
    %cst_27 = arith.constant 1.000000e+00 : f32
    %48 = vector.broadcast %cst_27 : f32 to vector<16x512xf32>
    %49 = arith.addf %48, %47 : vector<16x512xf32>
    %50 = arith.divf %48, %49 : vector<16x512xf32>
    %51 = vector.extract_strided_slice %50 {offsets = [0, 0], sizes = [16, 128], strides = [1, 1]} : vector<16x512xf32> to vector<16x128xf32>
    %52 = vector.extract_strided_slice %50 {offsets = [0, 128], sizes = [16, 128], strides = [1, 1]} : vector<16x512xf32> to vector<16x128xf32>
    %53 = vector.extract_strided_slice %50 {offsets = [0, 256], sizes = [16, 128], strides = [1, 1]} : vector<16x512xf32> to vector<16x128xf32>
    %cst_28 = arith.constant 2.000000e+00 : f32
    %54 = vector.broadcast %cst_28 : f32 to vector<16x128xf32>
    %55 = arith.mulf %54, %53 : vector<16x128xf32>
    %cst_29 = arith.constant 1.000000e+00 : f32
    %56 = vector.broadcast %cst_29 : f32 to vector<16x128xf32>
    %57 = arith.subf %55, %56 : vector<16x128xf32>
    %58 = vector.extract_strided_slice %50 {offsets = [0, 384], sizes = [16, 128], strides = [1, 1]} : vector<16x512xf32> to vector<16x128xf32>
    %59 = arith.mulf %52, %14 : vector<16x128xf32>
    %60 = arith.mulf %51, %57 : vector<16x128xf32>
    %61 = arith.addf %59, %60 : vector<16x128xf32>
    %62 = math.tanh %61 : vector<16x128xf32>
    %63 = arith.mulf %58, %62 : vector<16x128xf32>
    %c1_i32 = arith.constant 1 : i32
    %c16_i32_30 = arith.constant 16 : i32
    %64 = arith.muli %c1_i32, %c16_i32_30 : i32
    %65 = tpu.assume_multiple %64, 16 : i32
    %66 = arith.index_cast %65 : i32 to index
    %c0_31 = arith.constant 0 : index
    %67 = vector.load %arg11[%66, %c0_31] : memref<128x512xf32, #tpu.memory_space<vmem>>, vector<16x512xf32>
    %c0_32 = arith.constant 0 : index
    %c0_33 = arith.constant 0 : index
    %68 = vector.load %arg3[%c0_32, %c0_33] : memref<128x512xf32, #tpu.memory_space<vmem>>, vector<128x512xf32>
    %cst_34 = arith.constant dense<0.000000e+00> : vector<16x512xf32>
    %69 = tpu.matmul %39, %68, %cst_34 {dimension_numbers = #tpu.dot_dimension_numbers<[1], [0], [0], [1], [0, 0, 1, 1], [], []>} : vector<16x128xf32>, vector<128x512xf32>, vector<16x512xf32> -> vector<16x512xf32>
    %70 = arith.addf %67, %69 : vector<16x512xf32>
    %71 = arith.negf %70 : vector<16x512xf32>
    %72 = math.exp %71 : vector<16x512xf32>
    %cst_35 = arith.constant 1.000000e+00 : f32
    %73 = vector.broadcast %cst_35 : f32 to vector<16x512xf32>
    %74 = arith.addf %73, %72 : vector<16x512xf32>
    %75 = arith.divf %73, %74 : vector<16x512xf32>
    %76 = vector.extract_strided_slice %75 {offsets = [0, 0], sizes = [16, 128], strides = [1, 1]} : vector<16x512xf32> to vector<16x128xf32>
    %77 = vector.extract_strided_slice %75 {offsets = [0, 128], sizes = [16, 128], strides = [1, 1]} : vector<16x512xf32> to vector<16x128xf32>
    %78 = vector.extract_strided_slice %75 {offsets = [0, 256], sizes = [16, 128], strides = [1, 1]} : vector<16x512xf32> to vector<16x128xf32>
    %cst_36 = arith.constant 2.000000e+00 : f32
    %79 = vector.broadcast %cst_36 : f32 to vector<16x128xf32>
    %80 = arith.mulf %79, %78 : vector<16x128xf32>
    %cst_37 = arith.constant 1.000000e+00 : f32
    %81 = vector.broadcast %cst_37 : f32 to vector<16x128xf32>
    %82 = arith.subf %80, %81 : vector<16x128xf32>
    %83 = vector.extract_strided_slice %75 {offsets = [0, 384], sizes = [16, 128], strides = [1, 1]} : vector<16x512xf32> to vector<16x128xf32>
    %84 = arith.mulf %77, %37 : vector<16x128xf32>
    %85 = arith.mulf %76, %82 : vector<16x128xf32>
    %86 = arith.addf %84, %85 : vector<16x128xf32>
    %87 = math.tanh %86 : vector<16x128xf32>
    %88 = arith.mulf %83, %87 : vector<16x128xf32>
    %c0_38 = arith.constant 0 : index
    %c0_39 = arith.constant 0 : index
    %89 = vector.load %arg5[%c0_38, %c0_39] : memref<128x512xf32, #tpu.memory_space<vmem>>, vector<128x512xf32>
    %cst_40 = arith.constant dense<0.000000e+00> : vector<16x512xf32>
    %90 = tpu.matmul %88, %89, %cst_40 {dimension_numbers = #tpu.dot_dimension_numbers<[1], [0], [0], [1], [0, 0, 1, 1], [], []>} : vector<16x128xf32>, vector<128x512xf32>, vector<16x512xf32> -> vector<16x512xf32>
    %91 = arith.addf %90, %10 : vector<16x512xf32>
    %c0_41 = arith.constant 0 : index
    %c0_42 = arith.constant 0 : index
    %92 = vector.load %arg6[%c0_41, %c0_42] : memref<128x512xf32, #tpu.memory_space<vmem>>, vector<128x512xf32>
    %cst_43 = arith.constant dense<0.000000e+00> : vector<16x512xf32>
    %93 = tpu.matmul %63, %92, %cst_43 {dimension_numbers = #tpu.dot_dimension_numbers<[1], [0], [0], [1], [0, 0, 1, 1], [], []>} : vector<16x128xf32>, vector<128x512xf32>, vector<16x512xf32> -> vector<16x512xf32>
    %94 = arith.addf %91, %93 : vector<16x512xf32>
    %95 = arith.negf %94 : vector<16x512xf32>
    %96 = math.exp %95 : vector<16x512xf32>
    %cst_44 = arith.constant 1.000000e+00 : f32
    %97 = vector.broadcast %cst_44 : f32 to vector<16x512xf32>
    %98 = arith.addf %97, %96 : vector<16x512xf32>
    %99 = arith.divf %97, %98 : vector<16x512xf32>
    %100 = vector.extract_strided_slice %99 {offsets = [0, 0], sizes = [16, 128], strides = [1, 1]} : vector<16x512xf32> to vector<16x128xf32>
    %101 = vector.extract_strided_slice %99 {offsets = [0, 128], sizes = [16, 128], strides = [1, 1]} : vector<16x512xf32> to vector<16x128xf32>
    %102 = vector.extract_strided_slice %99 {offsets = [0, 256], sizes = [16, 128], strides = [1, 1]} : vector<16x512xf32> to vector<16x128xf32>
    %cst_45 = arith.constant 2.000000e+00 : f32
    %103 = vector.broadcast %cst_45 : f32 to vector<16x128xf32>
    %104 = arith.mulf %103, %102 : vector<16x128xf32>
    %cst_46 = arith.constant 1.000000e+00 : f32
    %105 = vector.broadcast %cst_46 : f32 to vector<16x128xf32>
    %106 = arith.subf %104, %105 : vector<16x128xf32>
    %107 = vector.extract_strided_slice %99 {offsets = [0, 384], sizes = [16, 128], strides = [1, 1]} : vector<16x512xf32> to vector<16x128xf32>
    %108 = arith.mulf %101, %61 : vector<16x128xf32>
    %109 = arith.mulf %100, %106 : vector<16x128xf32>
    %110 = arith.addf %108, %109 : vector<16x128xf32>
    %111 = math.tanh %110 : vector<16x128xf32>
    %112 = arith.mulf %107, %111 : vector<16x128xf32>
    %c2_i32 = arith.constant 2 : i32
    %c16_i32_47 = arith.constant 16 : i32
    %113 = arith.muli %c2_i32, %c16_i32_47 : i32
    %114 = tpu.assume_multiple %113, 16 : i32
    %115 = arith.index_cast %114 : i32 to index
    %c0_48 = arith.constant 0 : index
    %116 = vector.load %arg11[%115, %c0_48] : memref<128x512xf32, #tpu.memory_space<vmem>>, vector<16x512xf32>
    %c0_49 = arith.constant 0 : index
    %c0_50 = arith.constant 0 : index
    %117 = vector.load %arg3[%c0_49, %c0_50] : memref<128x512xf32, #tpu.memory_space<vmem>>, vector<128x512xf32>
    %cst_51 = arith.constant dense<0.000000e+00> : vector<16x512xf32>
    %118 = tpu.matmul %88, %117, %cst_51 {dimension_numbers = #tpu.dot_dimension_numbers<[1], [0], [0], [1], [0, 0, 1, 1], [], []>} : vector<16x128xf32>, vector<128x512xf32>, vector<16x512xf32> -> vector<16x512xf32>
    %119 = arith.addf %116, %118 : vector<16x512xf32>
    %120 = arith.negf %119 : vector<16x512xf32>
    %121 = math.exp %120 : vector<16x512xf32>
    %cst_52 = arith.constant 1.000000e+00 : f32
    %122 = vector.broadcast %cst_52 : f32 to vector<16x512xf32>
    %123 = arith.addf %122, %121 : vector<16x512xf32>
    %124 = arith.divf %122, %123 : vector<16x512xf32>
    %125 = vector.extract_strided_slice %124 {offsets = [0, 0], sizes = [16, 128], strides = [1, 1]} : vector<16x512xf32> to vector<16x128xf32>
    %126 = vector.extract_strided_slice %124 {offsets = [0, 128], sizes = [16, 128], strides = [1, 1]} : vector<16x512xf32> to vector<16x128xf32>
    %127 = vector.extract_strided_slice %124 {offsets = [0, 256], sizes = [16, 128], strides = [1, 1]} : vector<16x512xf32> to vector<16x128xf32>
    %cst_53 = arith.constant 2.000000e+00 : f32
    %128 = vector.broadcast %cst_53 : f32 to vector<16x128xf32>
    %129 = arith.mulf %128, %127 : vector<16x128xf32>
    %cst_54 = arith.constant 1.000000e+00 : f32
    %130 = vector.broadcast %cst_54 : f32 to vector<16x128xf32>
    %131 = arith.subf %129, %130 : vector<16x128xf32>
    %132 = vector.extract_strided_slice %124 {offsets = [0, 384], sizes = [16, 128], strides = [1, 1]} : vector<16x512xf32> to vector<16x128xf32>
    %133 = arith.mulf %126, %86 : vector<16x128xf32>
    %134 = arith.mulf %125, %131 : vector<16x128xf32>
    %135 = arith.addf %133, %134 : vector<16x128xf32>
    %136 = math.tanh %135 : vector<16x128xf32>
    %137 = arith.mulf %132, %136 : vector<16x128xf32>
    %c0_55 = arith.constant 0 : index
    %c0_56 = arith.constant 0 : index
    %138 = vector.load %arg5[%c0_55, %c0_56] : memref<128x512xf32, #tpu.memory_space<vmem>>, vector<128x512xf32>
    %cst_57 = arith.constant dense<0.000000e+00> : vector<16x512xf32>
    %139 = tpu.matmul %137, %138, %cst_57 {dimension_numbers = #tpu.dot_dimension_numbers<[1], [0], [0], [1], [0, 0, 1, 1], [], []>} : vector<16x128xf32>, vector<128x512xf32>, vector<16x512xf32> -> vector<16x512xf32>
    %140 = arith.addf %139, %10 : vector<16x512xf32>
    %c0_58 = arith.constant 0 : index
    %c0_59 = arith.constant 0 : index
    %141 = vector.load %arg6[%c0_58, %c0_59] : memref<128x512xf32, #tpu.memory_space<vmem>>, vector<128x512xf32>
    %cst_60 = arith.constant dense<0.000000e+00> : vector<16x512xf32>
    %142 = tpu.matmul %112, %141, %cst_60 {dimension_numbers = #tpu.dot_dimension_numbers<[1], [0], [0], [1], [0, 0, 1, 1], [], []>} : vector<16x128xf32>, vector<128x512xf32>, vector<16x512xf32> -> vector<16x512xf32>
    %143 = arith.addf %140, %142 : vector<16x512xf32>
    %144 = arith.negf %143 : vector<16x512xf32>
    %145 = math.exp %144 : vector<16x512xf32>
    %cst_61 = arith.constant 1.000000e+00 : f32
    %146 = vector.broadcast %cst_61 : f32 to vector<16x512xf32>
    %147 = arith.addf %146, %145 : vector<16x512xf32>
    %148 = arith.divf %146, %147 : vector<16x512xf32>
    %149 = vector.extract_strided_slice %148 {offsets = [0, 0], sizes = [16, 128], strides = [1, 1]} : vector<16x512xf32> to vector<16x128xf32>
    %150 = vector.extract_strided_slice %148 {offsets = [0, 128], sizes = [16, 128], strides = [1, 1]} : vector<16x512xf32> to vector<16x128xf32>
    %151 = vector.extract_strided_slice %148 {offsets = [0, 256], sizes = [16, 128], strides = [1, 1]} : vector<16x512xf32> to vector<16x128xf32>
    %cst_62 = arith.constant 2.000000e+00 : f32
    %152 = vector.broadcast %cst_62 : f32 to vector<16x128xf32>
    %153 = arith.mulf %152, %151 : vector<16x128xf32>
    %cst_63 = arith.constant 1.000000e+00 : f32
    %154 = vector.broadcast %cst_63 : f32 to vector<16x128xf32>
    %155 = arith.subf %153, %154 : vector<16x128xf32>
    %156 = vector.extract_strided_slice %148 {offsets = [0, 384], sizes = [16, 128], strides = [1, 1]} : vector<16x512xf32> to vector<16x128xf32>
    %157 = arith.mulf %150, %110 : vector<16x128xf32>
    %158 = arith.mulf %149, %155 : vector<16x128xf32>
    %159 = arith.addf %157, %158 : vector<16x128xf32>
    %160 = math.tanh %159 : vector<16x128xf32>
    %161 = arith.mulf %156, %160 : vector<16x128xf32>
    %c3_i32 = arith.constant 3 : i32
    %c16_i32_64 = arith.constant 16 : i32
    %162 = arith.muli %c3_i32, %c16_i32_64 : i32
    %163 = tpu.assume_multiple %162, 16 : i32
    %164 = arith.index_cast %163 : i32 to index
    %c0_65 = arith.constant 0 : index
    %165 = vector.load %arg11[%164, %c0_65] : memref<128x512xf32, #tpu.memory_space<vmem>>, vector<16x512xf32>
    %c0_66 = arith.constant 0 : index
    %c0_67 = arith.constant 0 : index
    %166 = vector.load %arg3[%c0_66, %c0_67] : memref<128x512xf32, #tpu.memory_space<vmem>>, vector<128x512xf32>
    %cst_68 = arith.constant dense<0.000000e+00> : vector<16x512xf32>
    %167 = tpu.matmul %137, %166, %cst_68 {dimension_numbers = #tpu.dot_dimension_numbers<[1], [0], [0], [1], [0, 0, 1, 1], [], []>} : vector<16x128xf32>, vector<128x512xf32>, vector<16x512xf32> -> vector<16x512xf32>
    %168 = arith.addf %165, %167 : vector<16x512xf32>
    %169 = arith.negf %168 : vector<16x512xf32>
    %170 = math.exp %169 : vector<16x512xf32>
    %cst_69 = arith.constant 1.000000e+00 : f32
    %171 = vector.broadcast %cst_69 : f32 to vector<16x512xf32>
    %172 = arith.addf %171, %170 : vector<16x512xf32>
    %173 = arith.divf %171, %172 : vector<16x512xf32>
    %174 = vector.extract_strided_slice %173 {offsets = [0, 0], sizes = [16, 128], strides = [1, 1]} : vector<16x512xf32> to vector<16x128xf32>
    %175 = vector.extract_strided_slice %173 {offsets = [0, 128], sizes = [16, 128], strides = [1, 1]} : vector<16x512xf32> to vector<16x128xf32>
    %176 = vector.extract_strided_slice %173 {offsets = [0, 256], sizes = [16, 128], strides = [1, 1]} : vector<16x512xf32> to vector<16x128xf32>
    %cst_70 = arith.constant 2.000000e+00 : f32
    %177 = vector.broadcast %cst_70 : f32 to vector<16x128xf32>
    %178 = arith.mulf %177, %176 : vector<16x128xf32>
    %cst_71 = arith.constant 1.000000e+00 : f32
    %179 = vector.broadcast %cst_71 : f32 to vector<16x128xf32>
    %180 = arith.subf %178, %179 : vector<16x128xf32>
    %181 = vector.extract_strided_slice %173 {offsets = [0, 384], sizes = [16, 128], strides = [1, 1]} : vector<16x512xf32> to vector<16x128xf32>
    %182 = arith.mulf %175, %135 : vector<16x128xf32>
    %183 = arith.mulf %174, %180 : vector<16x128xf32>
    %184 = arith.addf %182, %183 : vector<16x128xf32>
    %185 = math.tanh %184 : vector<16x128xf32>
    %186 = arith.mulf %181, %185 : vector<16x128xf32>
    %c0_72 = arith.constant 0 : index
    %c0_73 = arith.constant 0 : index
    %187 = vector.load %arg5[%c0_72, %c0_73] : memref<128x512xf32, #tpu.memory_space<vmem>>, vector<128x512xf32>
    %cst_74 = arith.constant dense<0.000000e+00> : vector<16x512xf32>
    %188 = tpu.matmul %186, %187, %cst_74 {dimension_numbers = #tpu.dot_dimension_numbers<[1], [0], [0], [1], [0, 0, 1, 1], [], []>} : vector<16x128xf32>, vector<128x512xf32>, vector<16x512xf32> -> vector<16x512xf32>
    %189 = arith.addf %188, %10 : vector<16x512xf32>
    %c0_75 = arith.constant 0 : index
    %c0_76 = arith.constant 0 : index
    %190 = vector.load %arg6[%c0_75, %c0_76] : memref<128x512xf32, #tpu.memory_space<vmem>>, vector<128x512xf32>
    %cst_77 = arith.constant dense<0.000000e+00> : vector<16x512xf32>
    %191 = tpu.matmul %161, %190, %cst_77 {dimension_numbers = #tpu.dot_dimension_numbers<[1], [0], [0], [1], [0, 0, 1, 1], [], []>} : vector<16x128xf32>, vector<128x512xf32>, vector<16x512xf32> -> vector<16x512xf32>
    %192 = arith.addf %189, %191 : vector<16x512xf32>
    %193 = arith.negf %192 : vector<16x512xf32>
    %194 = math.exp %193 : vector<16x512xf32>
    %cst_78 = arith.constant 1.000000e+00 : f32
    %195 = vector.broadcast %cst_78 : f32 to vector<16x512xf32>
    %196 = arith.addf %195, %194 : vector<16x512xf32>
    %197 = arith.divf %195, %196 : vector<16x512xf32>
    %198 = vector.extract_strided_slice %197 {offsets = [0, 0], sizes = [16, 128], strides = [1, 1]} : vector<16x512xf32> to vector<16x128xf32>
    %199 = vector.extract_strided_slice %197 {offsets = [0, 128], sizes = [16, 128], strides = [1, 1]} : vector<16x512xf32> to vector<16x128xf32>
    %200 = vector.extract_strided_slice %197 {offsets = [0, 256], sizes = [16, 128], strides = [1, 1]} : vector<16x512xf32> to vector<16x128xf32>
    %cst_79 = arith.constant 2.000000e+00 : f32
    %201 = vector.broadcast %cst_79 : f32 to vector<16x128xf32>
    %202 = arith.mulf %201, %200 : vector<16x128xf32>
    %cst_80 = arith.constant 1.000000e+00 : f32
    %203 = vector.broadcast %cst_80 : f32 to vector<16x128xf32>
    %204 = arith.subf %202, %203 : vector<16x128xf32>
    %205 = vector.extract_strided_slice %197 {offsets = [0, 384], sizes = [16, 128], strides = [1, 1]} : vector<16x512xf32> to vector<16x128xf32>
    %206 = arith.mulf %199, %159 : vector<16x128xf32>
    %207 = arith.mulf %198, %204 : vector<16x128xf32>
    %208 = arith.addf %206, %207 : vector<16x128xf32>
    %209 = math.tanh %208 : vector<16x128xf32>
    %210 = arith.mulf %205, %209 : vector<16x128xf32>
    %c4_i32 = arith.constant 4 : i32
    %c16_i32_81 = arith.constant 16 : i32
    %211 = arith.muli %c4_i32, %c16_i32_81 : i32
    %212 = tpu.assume_multiple %211, 16 : i32
    %213 = arith.index_cast %212 : i32 to index
    %c0_82 = arith.constant 0 : index
    %214 = vector.load %arg11[%213, %c0_82] : memref<128x512xf32, #tpu.memory_space<vmem>>, vector<16x512xf32>
    %c0_83 = arith.constant 0 : index
    %c0_84 = arith.constant 0 : index
    %215 = vector.load %arg3[%c0_83, %c0_84] : memref<128x512xf32, #tpu.memory_space<vmem>>, vector<128x512xf32>
    %cst_85 = arith.constant dense<0.000000e+00> : vector<16x512xf32>
    %216 = tpu.matmul %186, %215, %cst_85 {dimension_numbers = #tpu.dot_dimension_numbers<[1], [0], [0], [1], [0, 0, 1, 1], [], []>} : vector<16x128xf32>, vector<128x512xf32>, vector<16x512xf32> -> vector<16x512xf32>
    %217 = arith.addf %214, %216 : vector<16x512xf32>
    %218 = arith.negf %217 : vector<16x512xf32>
    %219 = math.exp %218 : vector<16x512xf32>
    %cst_86 = arith.constant 1.000000e+00 : f32
    %220 = vector.broadcast %cst_86 : f32 to vector<16x512xf32>
    %221 = arith.addf %220, %219 : vector<16x512xf32>
    %222 = arith.divf %220, %221 : vector<16x512xf32>
    %223 = vector.extract_strided_slice %222 {offsets = [0, 0], sizes = [16, 128], strides = [1, 1]} : vector<16x512xf32> to vector<16x128xf32>
    %224 = vector.extract_strided_slice %222 {offsets = [0, 128], sizes = [16, 128], strides = [1, 1]} : vector<16x512xf32> to vector<16x128xf32>
    %225 = vector.extract_strided_slice %222 {offsets = [0, 256], sizes = [16, 128], strides = [1, 1]} : vector<16x512xf32> to vector<16x128xf32>
    %cst_87 = arith.constant 2.000000e+00 : f32
    %226 = vector.broadcast %cst_87 : f32 to vector<16x128xf32>
    %227 = arith.mulf %226, %225 : vector<16x128xf32>
    %cst_88 = arith.constant 1.000000e+00 : f32
    %228 = vector.broadcast %cst_88 : f32 to vector<16x128xf32>
    %229 = arith.subf %227, %228 : vector<16x128xf32>
    %230 = vector.extract_strided_slice %222 {offsets = [0, 384], sizes = [16, 128], strides = [1, 1]} : vector<16x512xf32> to vector<16x128xf32>
    %231 = arith.mulf %224, %184 : vector<16x128xf32>
    %232 = arith.mulf %223, %229 : vector<16x128xf32>
    %233 = arith.addf %231, %232 : vector<16x128xf32>
    %234 = math.tanh %233 : vector<16x128xf32>
    %235 = arith.mulf %230, %234 : vector<16x128xf32>
    %c0_89 = arith.constant 0 : index
    %c0_90 = arith.constant 0 : index
    %236 = vector.load %arg5[%c0_89, %c0_90] : memref<128x512xf32, #tpu.memory_space<vmem>>, vector<128x512xf32>
    %cst_91 = arith.constant dense<0.000000e+00> : vector<16x512xf32>
    %237 = tpu.matmul %235, %236, %cst_91 {dimension_numbers = #tpu.dot_dimension_numbers<[1], [0], [0], [1], [0, 0, 1, 1], [], []>} : vector<16x128xf32>, vector<128x512xf32>, vector<16x512xf32> -> vector<16x512xf32>
    %238 = arith.addf %237, %10 : vector<16x512xf32>
    %c0_92 = arith.constant 0 : index
    %c0_93 = arith.constant 0 : index
    %239 = vector.load %arg6[%c0_92, %c0_93] : memref<128x512xf32, #tpu.memory_space<vmem>>, vector<128x512xf32>
    %cst_94 = arith.constant dense<0.000000e+00> : vector<16x512xf32>
    %240 = tpu.matmul %210, %239, %cst_94 {dimension_numbers = #tpu.dot_dimension_numbers<[1], [0], [0], [1], [0, 0, 1, 1], [], []>} : vector<16x128xf32>, vector<128x512xf32>, vector<16x512xf32> -> vector<16x512xf32>
    %241 = arith.addf %238, %240 : vector<16x512xf32>
    %242 = arith.negf %241 : vector<16x512xf32>
    %243 = math.exp %242 : vector<16x512xf32>
    %cst_95 = arith.constant 1.000000e+00 : f32
    %244 = vector.broadcast %cst_95 : f32 to vector<16x512xf32>
    %245 = arith.addf %244, %243 : vector<16x512xf32>
    %246 = arith.divf %244, %245 : vector<16x512xf32>
    %247 = vector.extract_strided_slice %246 {offsets = [0, 0], sizes = [16, 128], strides = [1, 1]} : vector<16x512xf32> to vector<16x128xf32>
    %248 = vector.extract_strided_slice %246 {offsets = [0, 128], sizes = [16, 128], strides = [1, 1]} : vector<16x512xf32> to vector<16x128xf32>
    %249 = vector.extract_strided_slice %246 {offsets = [0, 256], sizes = [16, 128], strides = [1, 1]} : vector<16x512xf32> to vector<16x128xf32>
    %cst_96 = arith.constant 2.000000e+00 : f32
    %250 = vector.broadcast %cst_96 : f32 to vector<16x128xf32>
    %251 = arith.mulf %250, %249 : vector<16x128xf32>
    %cst_97 = arith.constant 1.000000e+00 : f32
    %252 = vector.broadcast %cst_97 : f32 to vector<16x128xf32>
    %253 = arith.subf %251, %252 : vector<16x128xf32>
    %254 = vector.extract_strided_slice %246 {offsets = [0, 384], sizes = [16, 128], strides = [1, 1]} : vector<16x512xf32> to vector<16x128xf32>
    %255 = arith.mulf %248, %208 : vector<16x128xf32>
    %256 = arith.mulf %247, %253 : vector<16x128xf32>
    %257 = arith.addf %255, %256 : vector<16x128xf32>
    %258 = math.tanh %257 : vector<16x128xf32>
    %259 = arith.mulf %254, %258 : vector<16x128xf32>
    %c5_i32 = arith.constant 5 : i32
    %c16_i32_98 = arith.constant 16 : i32
    %260 = arith.muli %c5_i32, %c16_i32_98 : i32
    %261 = tpu.assume_multiple %260, 16 : i32
    %262 = arith.index_cast %261 : i32 to index
    %c0_99 = arith.constant 0 : index
    %263 = vector.load %arg11[%262, %c0_99] : memref<128x512xf32, #tpu.memory_space<vmem>>, vector<16x512xf32>
    %c0_100 = arith.constant 0 : index
    %c0_101 = arith.constant 0 : index
    %264 = vector.load %arg3[%c0_100, %c0_101] : memref<128x512xf32, #tpu.memory_space<vmem>>, vector<128x512xf32>
    %cst_102 = arith.constant dense<0.000000e+00> : vector<16x512xf32>
    %265 = tpu.matmul %235, %264, %cst_102 {dimension_numbers = #tpu.dot_dimension_numbers<[1], [0], [0], [1], [0, 0, 1, 1], [], []>} : vector<16x128xf32>, vector<128x512xf32>, vector<16x512xf32> -> vector<16x512xf32>
    %266 = arith.addf %263, %265 : vector<16x512xf32>
    %267 = arith.negf %266 : vector<16x512xf32>
    %268 = math.exp %267 : vector<16x512xf32>
    %cst_103 = arith.constant 1.000000e+00 : f32
    %269 = vector.broadcast %cst_103 : f32 to vector<16x512xf32>
    %270 = arith.addf %269, %268 : vector<16x512xf32>
    %271 = arith.divf %269, %270 : vector<16x512xf32>
    %272 = vector.extract_strided_slice %271 {offsets = [0, 0], sizes = [16, 128], strides = [1, 1]} : vector<16x512xf32> to vector<16x128xf32>
    %273 = vector.extract_strided_slice %271 {offsets = [0, 128], sizes = [16, 128], strides = [1, 1]} : vector<16x512xf32> to vector<16x128xf32>
    %274 = vector.extract_strided_slice %271 {offsets = [0, 256], sizes = [16, 128], strides = [1, 1]} : vector<16x512xf32> to vector<16x128xf32>
    %cst_104 = arith.constant 2.000000e+00 : f32
    %275 = vector.broadcast %cst_104 : f32 to vector<16x128xf32>
    %276 = arith.mulf %275, %274 : vector<16x128xf32>
    %cst_105 = arith.constant 1.000000e+00 : f32
    %277 = vector.broadcast %cst_105 : f32 to vector<16x128xf32>
    %278 = arith.subf %276, %277 : vector<16x128xf32>
    %279 = vector.extract_strided_slice %271 {offsets = [0, 384], sizes = [16, 128], strides = [1, 1]} : vector<16x512xf32> to vector<16x128xf32>
    %280 = arith.mulf %273, %233 : vector<16x128xf32>
    %281 = arith.mulf %272, %278 : vector<16x128xf32>
    %282 = arith.addf %280, %281 : vector<16x128xf32>
    %283 = math.tanh %282 : vector<16x128xf32>
    %284 = arith.mulf %279, %283 : vector<16x128xf32>
    %c0_106 = arith.constant 0 : index
    %c0_107 = arith.constant 0 : index
    %285 = vector.load %arg5[%c0_106, %c0_107] : memref<128x512xf32, #tpu.memory_space<vmem>>, vector<128x512xf32>
    %cst_108 = arith.constant dense<0.000000e+00> : vector<16x512xf32>
    %286 = tpu.matmul %284, %285, %cst_108 {dimension_numbers = #tpu.dot_dimension_numbers<[1], [0], [0], [1], [0, 0, 1, 1], [], []>} : vector<16x128xf32>, vector<128x512xf32>, vector<16x512xf32> -> vector<16x512xf32>
    %287 = arith.addf %286, %10 : vector<16x512xf32>
    %c0_109 = arith.constant 0 : index
    %c0_110 = arith.constant 0 : index
    %288 = vector.load %arg6[%c0_109, %c0_110] : memref<128x512xf32, #tpu.memory_space<vmem>>, vector<128x512xf32>
    %cst_111 = arith.constant dense<0.000000e+00> : vector<16x512xf32>
    %289 = tpu.matmul %259, %288, %cst_111 {dimension_numbers = #tpu.dot_dimension_numbers<[1], [0], [0], [1], [0, 0, 1, 1], [], []>} : vector<16x128xf32>, vector<128x512xf32>, vector<16x512xf32> -> vector<16x512xf32>
    %290 = arith.addf %287, %289 : vector<16x512xf32>
    %291 = arith.negf %290 : vector<16x512xf32>
    %292 = math.exp %291 : vector<16x512xf32>
    %cst_112 = arith.constant 1.000000e+00 : f32
    %293 = vector.broadcast %cst_112 : f32 to vector<16x512xf32>
    %294 = arith.addf %293, %292 : vector<16x512xf32>
    %295 = arith.divf %293, %294 : vector<16x512xf32>
    %296 = vector.extract_strided_slice %295 {offsets = [0, 0], sizes = [16, 128], strides = [1, 1]} : vector<16x512xf32> to vector<16x128xf32>
    %297 = vector.extract_strided_slice %295 {offsets = [0, 128], sizes = [16, 128], strides = [1, 1]} : vector<16x512xf32> to vector<16x128xf32>
    %298 = vector.extract_strided_slice %295 {offsets = [0, 256], sizes = [16, 128], strides = [1, 1]} : vector<16x512xf32> to vector<16x128xf32>
    %cst_113 = arith.constant 2.000000e+00 : f32
    %299 = vector.broadcast %cst_113 : f32 to vector<16x128xf32>
    %300 = arith.mulf %299, %298 : vector<16x128xf32>
    %cst_114 = arith.constant 1.000000e+00 : f32
    %301 = vector.broadcast %cst_114 : f32 to vector<16x128xf32>
    %302 = arith.subf %300, %301 : vector<16x128xf32>
    %303 = vector.extract_strided_slice %295 {offsets = [0, 384], sizes = [16, 128], strides = [1, 1]} : vector<16x512xf32> to vector<16x128xf32>
    %304 = arith.mulf %297, %257 : vector<16x128xf32>
    %305 = arith.mulf %296, %302 : vector<16x128xf32>
    %306 = arith.addf %304, %305 : vector<16x128xf32>
    %307 = math.tanh %306 : vector<16x128xf32>
    %308 = arith.mulf %303, %307 : vector<16x128xf32>
    %c6_i32 = arith.constant 6 : i32
    %c16_i32_115 = arith.constant 16 : i32
    %309 = arith.muli %c6_i32, %c16_i32_115 : i32
    %310 = tpu.assume_multiple %309, 16 : i32
    %311 = arith.index_cast %310 : i32 to index
    %c0_116 = arith.constant 0 : index
    %312 = vector.load %arg11[%311, %c0_116] : memref<128x512xf32, #tpu.memory_space<vmem>>, vector<16x512xf32>
    %c0_117 = arith.constant 0 : index
    %c0_118 = arith.constant 0 : index
    %313 = vector.load %arg3[%c0_117, %c0_118] : memref<128x512xf32, #tpu.memory_space<vmem>>, vector<128x512xf32>
    %cst_119 = arith.constant dense<0.000000e+00> : vector<16x512xf32>
    %314 = tpu.matmul %284, %313, %cst_119 {dimension_numbers = #tpu.dot_dimension_numbers<[1], [0], [0], [1], [0, 0, 1, 1], [], []>} : vector<16x128xf32>, vector<128x512xf32>, vector<16x512xf32> -> vector<16x512xf32>
    %315 = arith.addf %312, %314 : vector<16x512xf32>
    %316 = arith.negf %315 : vector<16x512xf32>
    %317 = math.exp %316 : vector<16x512xf32>
    %cst_120 = arith.constant 1.000000e+00 : f32
    %318 = vector.broadcast %cst_120 : f32 to vector<16x512xf32>
    %319 = arith.addf %318, %317 : vector<16x512xf32>
    %320 = arith.divf %318, %319 : vector<16x512xf32>
    %321 = vector.extract_strided_slice %320 {offsets = [0, 0], sizes = [16, 128], strides = [1, 1]} : vector<16x512xf32> to vector<16x128xf32>
    %322 = vector.extract_strided_slice %320 {offsets = [0, 128], sizes = [16, 128], strides = [1, 1]} : vector<16x512xf32> to vector<16x128xf32>
    %323 = vector.extract_strided_slice %320 {offsets = [0, 256], sizes = [16, 128], strides = [1, 1]} : vector<16x512xf32> to vector<16x128xf32>
    %cst_121 = arith.constant 2.000000e+00 : f32
    %324 = vector.broadcast %cst_121 : f32 to vector<16x128xf32>
    %325 = arith.mulf %324, %323 : vector<16x128xf32>
    %cst_122 = arith.constant 1.000000e+00 : f32
    %326 = vector.broadcast %cst_122 : f32 to vector<16x128xf32>
    %327 = arith.subf %325, %326 : vector<16x128xf32>
    %328 = vector.extract_strided_slice %320 {offsets = [0, 384], sizes = [16, 128], strides = [1, 1]} : vector<16x512xf32> to vector<16x128xf32>
    %329 = arith.mulf %322, %282 : vector<16x128xf32>
    %330 = arith.mulf %321, %327 : vector<16x128xf32>
    %331 = arith.addf %329, %330 : vector<16x128xf32>
    %332 = math.tanh %331 : vector<16x128xf32>
    %333 = arith.mulf %328, %332 : vector<16x128xf32>
    %c0_123 = arith.constant 0 : index
    %c0_124 = arith.constant 0 : index
    %334 = vector.load %arg5[%c0_123, %c0_124] : memref<128x512xf32, #tpu.memory_space<vmem>>, vector<128x512xf32>
    %cst_125 = arith.constant dense<0.000000e+00> : vector<16x512xf32>
    %335 = tpu.matmul %333, %334, %cst_125 {dimension_numbers = #tpu.dot_dimension_numbers<[1], [0], [0], [1], [0, 0, 1, 1], [], []>} : vector<16x128xf32>, vector<128x512xf32>, vector<16x512xf32> -> vector<16x512xf32>
    %336 = arith.addf %335, %10 : vector<16x512xf32>
    %c0_126 = arith.constant 0 : index
    %c0_127 = arith.constant 0 : index
    %337 = vector.load %arg6[%c0_126, %c0_127] : memref<128x512xf32, #tpu.memory_space<vmem>>, vector<128x512xf32>
    %cst_128 = arith.constant dense<0.000000e+00> : vector<16x512xf32>
    %338 = tpu.matmul %308, %337, %cst_128 {dimension_numbers = #tpu.dot_dimension_numbers<[1], [0], [0], [1], [0, 0, 1, 1], [], []>} : vector<16x128xf32>, vector<128x512xf32>, vector<16x512xf32> -> vector<16x512xf32>
    %339 = arith.addf %336, %338 : vector<16x512xf32>
    %340 = arith.negf %339 : vector<16x512xf32>
    %341 = math.exp %340 : vector<16x512xf32>
    %cst_129 = arith.constant 1.000000e+00 : f32
    %342 = vector.broadcast %cst_129 : f32 to vector<16x512xf32>
    %343 = arith.addf %342, %341 : vector<16x512xf32>
    %344 = arith.divf %342, %343 : vector<16x512xf32>
    %345 = vector.extract_strided_slice %344 {offsets = [0, 0], sizes = [16, 128], strides = [1, 1]} : vector<16x512xf32> to vector<16x128xf32>
    %346 = vector.extract_strided_slice %344 {offsets = [0, 128], sizes = [16, 128], strides = [1, 1]} : vector<16x512xf32> to vector<16x128xf32>
    %347 = vector.extract_strided_slice %344 {offsets = [0, 256], sizes = [16, 128], strides = [1, 1]} : vector<16x512xf32> to vector<16x128xf32>
    %cst_130 = arith.constant 2.000000e+00 : f32
    %348 = vector.broadcast %cst_130 : f32 to vector<16x128xf32>
    %349 = arith.mulf %348, %347 : vector<16x128xf32>
    %cst_131 = arith.constant 1.000000e+00 : f32
    %350 = vector.broadcast %cst_131 : f32 to vector<16x128xf32>
    %351 = arith.subf %349, %350 : vector<16x128xf32>
    %352 = vector.extract_strided_slice %344 {offsets = [0, 384], sizes = [16, 128], strides = [1, 1]} : vector<16x512xf32> to vector<16x128xf32>
    %353 = arith.mulf %346, %306 : vector<16x128xf32>
    %354 = arith.mulf %345, %351 : vector<16x128xf32>
    %355 = arith.addf %353, %354 : vector<16x128xf32>
    %356 = math.tanh %355 : vector<16x128xf32>
    %357 = arith.mulf %352, %356 : vector<16x128xf32>
    %c7_i32 = arith.constant 7 : i32
    %c16_i32_132 = arith.constant 16 : i32
    %358 = arith.muli %c7_i32, %c16_i32_132 : i32
    %359 = tpu.assume_multiple %358, 16 : i32
    %360 = arith.index_cast %359 : i32 to index
    %c0_133 = arith.constant 0 : index
    %361 = vector.load %arg11[%360, %c0_133] : memref<128x512xf32, #tpu.memory_space<vmem>>, vector<16x512xf32>
    %c0_134 = arith.constant 0 : index
    %c0_135 = arith.constant 0 : index
    %362 = vector.load %arg3[%c0_134, %c0_135] : memref<128x512xf32, #tpu.memory_space<vmem>>, vector<128x512xf32>
    %cst_136 = arith.constant dense<0.000000e+00> : vector<16x512xf32>
    %363 = tpu.matmul %333, %362, %cst_136 {dimension_numbers = #tpu.dot_dimension_numbers<[1], [0], [0], [1], [0, 0, 1, 1], [], []>} : vector<16x128xf32>, vector<128x512xf32>, vector<16x512xf32> -> vector<16x512xf32>
    %364 = arith.addf %361, %363 : vector<16x512xf32>
    %365 = arith.negf %364 : vector<16x512xf32>
    %366 = math.exp %365 : vector<16x512xf32>
    %cst_137 = arith.constant 1.000000e+00 : f32
    %367 = vector.broadcast %cst_137 : f32 to vector<16x512xf32>
    %368 = arith.addf %367, %366 : vector<16x512xf32>
    %369 = arith.divf %367, %368 : vector<16x512xf32>
    %370 = vector.extract_strided_slice %369 {offsets = [0, 0], sizes = [16, 128], strides = [1, 1]} : vector<16x512xf32> to vector<16x128xf32>
    %371 = vector.extract_strided_slice %369 {offsets = [0, 128], sizes = [16, 128], strides = [1, 1]} : vector<16x512xf32> to vector<16x128xf32>
    %372 = vector.extract_strided_slice %369 {offsets = [0, 256], sizes = [16, 128], strides = [1, 1]} : vector<16x512xf32> to vector<16x128xf32>
    %cst_138 = arith.constant 2.000000e+00 : f32
    %373 = vector.broadcast %cst_138 : f32 to vector<16x128xf32>
    %374 = arith.mulf %373, %372 : vector<16x128xf32>
    %cst_139 = arith.constant 1.000000e+00 : f32
    %375 = vector.broadcast %cst_139 : f32 to vector<16x128xf32>
    %376 = arith.subf %374, %375 : vector<16x128xf32>
    %377 = vector.extract_strided_slice %369 {offsets = [0, 384], sizes = [16, 128], strides = [1, 1]} : vector<16x512xf32> to vector<16x128xf32>
    %378 = arith.mulf %371, %331 : vector<16x128xf32>
    %379 = arith.mulf %370, %376 : vector<16x128xf32>
    %380 = arith.addf %378, %379 : vector<16x128xf32>
    %381 = math.tanh %380 : vector<16x128xf32>
    %382 = arith.mulf %377, %381 : vector<16x128xf32>
    %c0_140 = arith.constant 0 : index
    %c0_141 = arith.constant 0 : index
    %383 = vector.load %arg5[%c0_140, %c0_141] : memref<128x512xf32, #tpu.memory_space<vmem>>, vector<128x512xf32>
    %cst_142 = arith.constant dense<0.000000e+00> : vector<16x512xf32>
    %384 = tpu.matmul %382, %383, %cst_142 {dimension_numbers = #tpu.dot_dimension_numbers<[1], [0], [0], [1], [0, 0, 1, 1], [], []>} : vector<16x128xf32>, vector<128x512xf32>, vector<16x512xf32> -> vector<16x512xf32>
    %385 = arith.addf %384, %10 : vector<16x512xf32>
    %c0_143 = arith.constant 0 : index
    %c0_144 = arith.constant 0 : index
    %386 = vector.load %arg6[%c0_143, %c0_144] : memref<128x512xf32, #tpu.memory_space<vmem>>, vector<128x512xf32>
    %cst_145 = arith.constant dense<0.000000e+00> : vector<16x512xf32>
    %387 = tpu.matmul %357, %386, %cst_145 {dimension_numbers = #tpu.dot_dimension_numbers<[1], [0], [0], [1], [0, 0, 1, 1], [], []>} : vector<16x128xf32>, vector<128x512xf32>, vector<16x512xf32> -> vector<16x512xf32>
    %388 = arith.addf %385, %387 : vector<16x512xf32>
    %389 = arith.negf %388 : vector<16x512xf32>
    %390 = math.exp %389 : vector<16x512xf32>
    %cst_146 = arith.constant 1.000000e+00 : f32
    %391 = vector.broadcast %cst_146 : f32 to vector<16x512xf32>
    %392 = arith.addf %391, %390 : vector<16x512xf32>
    %393 = arith.divf %391, %392 : vector<16x512xf32>
    %394 = vector.extract_strided_slice %393 {offsets = [0, 0], sizes = [16, 128], strides = [1, 1]} : vector<16x512xf32> to vector<16x128xf32>
    %395 = vector.extract_strided_slice %393 {offsets = [0, 128], sizes = [16, 128], strides = [1, 1]} : vector<16x512xf32> to vector<16x128xf32>
    %396 = vector.extract_strided_slice %393 {offsets = [0, 256], sizes = [16, 128], strides = [1, 1]} : vector<16x512xf32> to vector<16x128xf32>
    %cst_147 = arith.constant 2.000000e+00 : f32
    %397 = vector.broadcast %cst_147 : f32 to vector<16x128xf32>
    %398 = arith.mulf %397, %396 : vector<16x128xf32>
    %cst_148 = arith.constant 1.000000e+00 : f32
    %399 = vector.broadcast %cst_148 : f32 to vector<16x128xf32>
    %400 = arith.subf %398, %399 : vector<16x128xf32>
    %401 = vector.extract_strided_slice %393 {offsets = [0, 384], sizes = [16, 128], strides = [1, 1]} : vector<16x512xf32> to vector<16x128xf32>
    %402 = arith.mulf %395, %355 : vector<16x128xf32>
    %403 = arith.mulf %394, %400 : vector<16x128xf32>
    %404 = arith.addf %402, %403 : vector<16x128xf32>
    %405 = math.tanh %404 : vector<16x128xf32>
    %406 = arith.mulf %401, %405 : vector<16x128xf32>
    %c8_i32 = arith.constant 8 : i32
    %c0_149 = arith.constant 0 : index
    %c0_150 = arith.constant 0 : index
    %407 = vector.load %arg8[%c0_149, %c0_150] : memref<128x128xf32, #tpu.memory_space<vmem>>, vector<128x128xf32>
    %cst_151 = arith.constant dense<0.000000e+00> : vector<16x128xf32>
    %408 = tpu.matmul %406, %407, %cst_151 {dimension_numbers = #tpu.dot_dimension_numbers<[1], [0], [0], [1], [0, 0, 1, 1], [], []>} : vector<16x128xf32>, vector<128x128xf32>, vector<16x128xf32> -> vector<16x128xf32>
    %c0_152 = arith.constant 0 : index
    %c0_153 = arith.constant 0 : index
    %409 = vector.load %arg9[%c0_152, %c0_153] : memref<1x128xf32, #tpu.memory_space<vmem>>, vector<1x128xf32>
    %410 = vector.broadcast %409 : vector<1x128xf32> to vector<16x128xf32>
    %411 = arith.addf %408, %410 : vector<16x128xf32>
    %c0_154 = arith.constant 0 : index
    %c0_155 = arith.constant 0 : index
    %412 = vector.load %arg10[%c0_154, %c0_155] : memref<16x128xf32, #tpu.memory_space<vmem>>, vector<16x128xf32>
    tpu.vector_store %arg10[%c0_154, %c0_155], %411 {strides = array<i32>} : memref<16x128xf32, #tpu.memory_space<vmem>>, vector<16x128xf32>,
    return
  }
  func.func @transform_0(%arg0: i32) -> (i32, i32, i32) {
    %c0_i32 = arith.constant 0 : i32
    %c0_i32_0 = arith.constant 0 : i32
    %c0_i32_1 = arith.constant 0 : i32
    return %arg0, %c0_i32, %c0_i32_0 : i32, i32, i32
  }
  func.func @transform_1(%arg0: i32) -> (i32, i32) {
    %c0_i32 = arith.constant 0 : i32
    %c0_i32_0 = arith.constant 0 : i32
    %c0_i32_1 = arith.constant 0 : i32
    return %c0_i32, %c0_i32_0 : i32, i32
  }
  func.func @transform_2(%arg0: i32) -> (i32, i32) {
    %c0_i32 = arith.constant 0 : i32
    %c0_i32_0 = arith.constant 0 : i32
    %c0_i32_1 = arith.constant 0 : i32
    return %c0_i32, %c0_i32_0 : i32, i32
  }
  func.func @transform_3(%arg0: i32) -> (i32, i32) {
    %c0_i32 = arith.constant 0 : i32
    %c0_i32_0 = arith.constant 0 : i32
    %c0_i32_1 = arith.constant 0 : i32
    return %c0_i32, %c0_i32_0 : i32, i32
  }
  func.func @transform_4(%arg0: i32) -> (i32, i32) {
    %c0_i32 = arith.constant 0 : i32
    %c0_i32_0 = arith.constant 0 : i32
    %c0_i32_1 = arith.constant 0 : i32
    return %c0_i32, %c0_i32_0 : i32, i32
  }
  func.func @transform_5(%arg0: i32) -> (i32, i32) {
    %c0_i32 = arith.constant 0 : i32
    %c0_i32_0 = arith.constant 0 : i32
    %c0_i32_1 = arith.constant 0 : i32
    return %c0_i32, %c0_i32_0 : i32, i32
  }
  func.func @transform_6(%arg0: i32) -> (i32, i32) {
    %c0_i32 = arith.constant 0 : i32
    %c0_i32_0 = arith.constant 0 : i32
    %c0_i32_1 = arith.constant 0 : i32
    return %c0_i32, %c0_i32_0 : i32, i32
  }
  func.func @transform_7(%arg0: i32) -> (i32, i32) {
    %c0_i32 = arith.constant 0 : i32
    %c0_i32_0 = arith.constant 0 : i32
    %c0_i32_1 = arith.constant 0 : i32
    return %c0_i32, %c0_i32_0 : i32, i32
  }
  func.func @transform_8(%arg0: i32) -> (i32, i32) {
    %c0_i32 = arith.constant 0 : i32
    %c0_i32_0 = arith.constant 0 : i32
    %c0_i32_1 = arith.constant 0 : i32
    return %c0_i32, %c0_i32_0 : i32, i32
  }
  func.func @transform_9(%arg0: i32) -> (i32, i32) {
    %c0_i32 = arith.constant 0 : i32
    %c0_i32_0 = arith.constant 0 : i32
    return %arg0, %c0_i32 : i32, i32
  }
}

</mosaic_0001>

<bundles_post_ra>
// kernel: rnn_classify_simple_forward.1
= control target key start
LH: loop header
LB: loop body
LE: loop exit
PB: predicated region body
PF: predicated region fallthrough
CT: control target
= control target key end

     0   :  { %v10874_v3 = vmov 0.0   ;;  %s10864_s1 = inlined_call_operand.vmem [shape: f32[128,512], index: 1, kind: input, shape index: {}]   ;;  %s10865_s2 = inlined_call_operand.vmem [shape: f32[128,512], index: 2, kind: input, shape index: {}]   ;;  %s10866_s0 = inlined_call_operand.vmem [shape: f32[1,128,128], index: 0, kind: input, shape index: {}]   ;;  %s10867_s4 = inlined_call_operand.vmem [shape: f32[128,512], index: 4, kind: input, shape index: {}]   ;;  %s10868_s5 = inlined_call_operand.vmem [shape: f32[128,512], index: 5, kind: input, shape index: {}]   ;;  %s10869_s3 = inlined_call_operand.vmem [shape: f32[1,512], index: 3, kind: input, shape index: {}]   ;;  %s10870_s6 = inlined_call_operand.vmem [shape: f32[1,512], index: 6, kind: input, shape index: {}]   ;;  %s10871_s7 = inlined_call_operand.vmem [shape: f32[128,128], index: 7, kind: input, shape index: {}]   ;;  %s10872_s8 = inlined_call_operand.vmem [shape: f32[1,128], index: 8, kind: input, shape index: {}]   ;;  %s10873_s9 = inlined_call_operand.vmem [shape: f32[16,128], index: 9, kind: output, shape index: {}]  }
   0x1   :  { %v49_v0 = vld [vmem:[%s10864_s1 + $0x8] sm:$0xff]  ;;  %v51_v2 = vld [vmem:[%s10864_s1 + $0x18] sm:$0xff]  ;;  %198 = vmatprep.mubr.f32.mxu0 %v10874_v3  ;;  %359 = vmatprep.mubr.f32.mxu1 %v10874_v3  ;;  %v48_v6 = vld [vmem:[%s10864_s1] sm:$0xff] }
   0x2   :  { %v53_v1 = vld [vmem:[%s10864_s1 + $0x28] sm:$0xff]  ;;  %v55_v5 = vld [vmem:[%s10864_s1 + $0x38] sm:$0xff]  ;;  %v52_v7 = vld [vmem:[%s10864_s1 + $0x20] sm:$0xff] }
   0x3   :  { %v5963_v4 = vpack.c.bf16 %v53_v1, %v49_v0  ;;  %v5995_v8 = vpack.c.bf16 %v55_v5, %v51_v2  ;;  %v5965_v9 = vpack.c.bf16 %v52_v7, %v48_v6  ;;  %v50_v10 = vld [vmem:[%s10864_s1 + $0x10] sm:$0xff]  ;;  %v57_v12 = vld [vmem:[%s10864_s1 + $0x48] sm:$0xff]  ;;  %v59_v15 = vld [vmem:[%s10864_s1 + $0x58] sm:$0xff] }
   0x4   :  { %v54_v11 = vld [vmem:[%s10864_s1 + $0x30] sm:$0xff]  ;;  %v61_v14 = vld [vmem:[%s10864_s1 + $0x68] sm:$0xff]  ;;  %v63_v16 = vld [vmem:[%s10864_s1 + $0x78] sm:$0xff] }
   0x5   :  { %5964 = vmatprep.subr.bf16.mxu0 %v5963_v4  ;;  %v5997_v13 = vpack.c.bf16 %v54_v11, %v50_v10  ;;  %5996 = vmatprep.subr.bf16.mxu1 %v5995_v8  ;;  %v5967_v17 = vpack.c.bf16 %v61_v14, %v57_v12  ;;  %v5999_v18 = vpack.c.bf16 %v63_v16, %v59_v15  ;;  %v56_v19 = vld [vmem:[%s10864_s1 + $0x40] sm:$0xff]  ;;  %v58_v21 = vld [vmem:[%s10864_s1 + $0x50] sm:$0xff]  ;;  %v65_v24 = vld [vmem:[%s10864_s1 + $0x88] sm:$0xff] }
   0x6   :  { %5966 = vmatpush1.bf16.msra.mxu0 %v5965_v9  ;;  %v60_v20 = vld [vmem:[%s10864_s1 + $0x60] sm:$0xff]  ;;  %v62_v23 = vld [vmem:[%s10864_s1 + $0x70] sm:$0xff]  ;;  %v69_v25 = vld [vmem:[%s10864_s1 + $0xa8] sm:$0xff] }
   0x7   :  { %5998 = vmatpush1.bf16.msra.mxu1 %v5997_v13  ;;  %v5969_v22 = vpack.c.bf16 %v60_v20, %v56_v19  ;;  %5968 = vmatprep.subr.bf16.mxu0 %v5967_v17  ;;  %v6001_v26 = vpack.c.bf16 %v62_v23, %v58_v21  ;;  %v5971_v27 = vpack.c.bf16 %v69_v25, %v65_v24  ;;  %v67_v28 = vld [vmem:[%s10864_s1 + $0x98] sm:$0xff]  ;;  %v64_v30 = vld [vmem:[%s10864_s1 + $0x80] sm:$0xff]  ;;  %v66_v33 = vld [vmem:[%s10864_s1 + $0x90] sm:$0xff] }
   0x8   :  { %6000 = vmatprep.subr.bf16.mxu1 %v5999_v18  ;;  %v71_v29 = vld [vmem:[%s10864_s1 + $0xb8] sm:$0xff]  ;;  %v68_v32 = vld [vmem:[%s10864_s1 + $0xa0] sm:$0xff]  ;;  %v70_v34 = vld [vmem:[%s10864_s1 + $0xb0] sm:$0xff] }
   0x9   :  { %v6003_v31 = vpack.c.bf16 %v71_v29, %v67_v28  ;;  %v5973_v35 = vpack.c.bf16 %v68_v32, %v64_v30  ;;  %v73_v36 = vld [vmem:[%s10864_s1 + $0xc8] sm:$0xff]  ;;  %v75_v38 = vld [vmem:[%s10864_s1 + $0xd8] sm:$0xff]  ;;  %v6005_v39 = vpack.c.bf16 %v70_v34, %v66_v33  ;;  %v72_v42 = vld [vmem:[%s10864_s1 + $0xc0] sm:$0xff] }
   0xa   :  { %5970 = vmatpush1.bf16.msra.mxu0 %v5969_v22  ;;  %v77_v37 = vld [vmem:[%s10864_s1 + $0xe8] sm:$0xff]  ;;  %v79_v41 = vld [vmem:[%s10864_s1 + $0xf8] sm:$0xff]  ;;  %v76_v43 = vld [vmem:[%s10864_s1 + $0xe0] sm:$0xff] }
   0xb   :  { %6002 = vmatpush1.bf16.msra.mxu1 %v6001_v26  ;;  %5972 = vmatprep.subr.bf16.mxu0 %v5971_v27  ;;  %v5975_v40 = vpack.c.bf16 %v77_v37, %v73_v36  ;;  %v6007_v44 = vpack.c.bf16 %v79_v41, %v75_v38  ;;  %v74_v45 = vld [vmem:[%s10864_s1 + $0xd0] sm:$0xff]  ;;  %v81_v47 = vld [vmem:[%s10864_s1 + $0x108] sm:$0xff]  ;;  %v83_v49 = vld [vmem:[%s10864_s1 + $0x118] sm:$0xff]  ;;  %v5977_v51 = vpack.c.bf16 %v76_v43, %v72_v42 }
   0xc   :  { %6004 = vmatprep.subr.bf16.mxu1 %v6003_v31  ;;  %v78_v46 = vld [vmem:[%s10864_s1 + $0xf0] sm:$0xff]  ;;  %v85_v48 = vld [vmem:[%s10864_s1 + $0x128] sm:$0xff]  ;;  %v87_v50 = vld [vmem:[%s10864_s1 + $0x138] sm:$0xff] }
   0xd   :  { %v6009_v52 = vpack.c.bf16 %v78_v46, %v74_v45  ;;  %v5979_v53 = vpack.c.bf16 %v85_v48, %v81_v47  ;;  %v80_v54 = vld [vmem:[%s10864_s1 + $0x100] sm:$0xff]  ;;  %v82_v56 = vld [vmem:[%s10864_s1 + $0x110] sm:$0xff]  ;;  %v6011_v57 = vpack.c.bf16 %v87_v50, %v83_v49  ;;  %v89_v59 = vld [vmem:[%s10864_s1 + $0x148] sm:$0xff] }
   0xe   :  { %5974 = vmatpush1.bf16.msra.mxu0 %v5973_v35  ;;  %v84_v55 = vld [vmem:[%s10864_s1 + $0x120] sm:$0xff]  ;;  %v86_v58 = vld [vmem:[%s10864_s1 + $0x130] sm:$0xff]  ;;  %v93_v60 = vld [vmem:[%s10864_s1 + $0x168] sm:$0xff] }
   0xf   :  { %6006 = vmatpush1.bf16.msra.mxu1 %v6005_v39  ;;  %5976 = vmatprep.subr.bf16.mxu0 %v5975_v40  ;;  %v91_v61 = vld [vmem:[%s10864_s1 + $0x158] sm:$0xff]  ;;  %v5981_v63 = vpack.c.bf16 %v84_v55, %v80_v54  ;;  %v6013_v0 = vpack.c.bf16 %v86_v58, %v82_v56  ;;  %v5983_v1 = vpack.c.bf16 %v93_v60, %v89_v59  ;;  %v88_v2 = vld [vmem:[%s10864_s1 + $0x140] sm:$0xff]  ;;  %v90_v5 = vld [vmem:[%s10864_s1 + $0x150] sm:$0xff] }
  0x10   :  { %6008 = vmatprep.subr.bf16.mxu1 %v6007_v44  ;;  %v95_v62 = vld [vmem:[%s10864_s1 + $0x178] sm:$0xff]  ;;  %v92_v4 = vld [vmem:[%s10864_s1 + $0x160] sm:$0xff]  ;;  %v94_v7 = vld [vmem:[%s10864_s1 + $0x170] sm:$0xff] }
  0x11   :  { %v6015_v6 = vpack.c.bf16 %v95_v62, %v91_v61  ;;  %v97_v8 = vld [vmem:[%s10864_s1 + $0x188] sm:$0xff]  ;;  %v99_v10 = vld [vmem:[%s10864_s1 + $0x198] sm:$0xff]  ;;  %v5985_v12 = vpack.c.bf16 %v92_v4, %v88_v2  ;;  %v6017_v13 = vpack.c.bf16 %v94_v7, %v90_v5  ;;  %v96_v15 = vld [vmem:[%s10864_s1 + $0x180] sm:$0xff] }
  0x12   :  { %5978 = vmatpush1.bf16.msra.mxu0 %v5977_v51  ;;  %v101_v9 = vld [vmem:[%s10864_s1 + $0x1a8] sm:$0xff]  ;;  %v103_v11 = vld [vmem:[%s10864_s1 + $0x1b8] sm:$0xff]  ;;  %v100_v16 = vld [vmem:[%s10864_s1 + $0x1a0] sm:$0xff] }
  0x13   :  { %6010 = vmatpush1.bf16.msra.mxu1 %v6009_v52  ;;  %5980 = vmatprep.subr.bf16.mxu0 %v5979_v53  ;;  %v5987_v14 = vpack.c.bf16 %v101_v9, %v97_v8  ;;  %v98_v17 = vld [vmem:[%s10864_s1 + $0x190] sm:$0xff]  ;;  %v6019_v18 = vpack.c.bf16 %v103_v11, %v99_v10  ;;  %v105_v20 = vld [vmem:[%s10864_s1 + $0x1c8] sm:$0xff]  ;;  %v107_v22 = vld [vmem:[%s10864_s1 + $0x1d8] sm:$0xff]  ;;  %v5989_v24 = vpack.c.bf16 %v100_v16, %v96_v15 }
  0x14   :  { %6012 = vmatprep.subr.bf16.mxu1 %v6011_v57  ;;  %v102_v19 = vld [vmem:[%s10864_s1 + $0x1b0] sm:$0xff]  ;;  %v109_v21 = vld [vmem:[%s10864_s1 + $0x1e8] sm:$0xff]  ;;  %v111_v23 = vld [vmem:[%s10864_s1 + $0x1f8] sm:$0xff] }
  0x15   :  { %v6021_v25 = vpack.c.bf16 %v102_v19, %v98_v17  ;;  %v5991_v26 = vpack.c.bf16 %v109_v21, %v105_v20  ;;  %v104_v27 = vld [vmem:[%s10864_s1 + $0x1c0] sm:$0xff]  ;;  %v106_v29 = vld [vmem:[%s10864_s1 + $0x1d0] sm:$0xff]  ;;  %v6023_v30 = vpack.c.bf16 %v111_v23, %v107_v22  ;;  %v554_v32 = vld [vmem:[%s10865_s2 + $0x8] sm:$0xff] }
  0x16   :  { %5982 = vmatpush1.bf16.msra.mxu0 %v5981_v63  ;;  %v108_v28 = vld [vmem:[%s10864_s1 + $0x1e0] sm:$0xff]  ;;  %v110_v31 = vld [vmem:[%s10864_s1 + $0x1f0] sm:$0xff]  ;;  %v558_v33 = vld [vmem:[%s10865_s2 + $0x28] sm:$0xff] }
  0x17   :  { %6014 = vmatpush1.bf16.msra.mxu1 %v6013_v0  ;;  %5984 = vmatprep.subr.bf16.mxu0 %v5983_v1  ;;  %v556_v34 = vld [vmem:[%s10865_s2 + $0x18] sm:$0xff]  ;;  %v5993_v36 = vpack.c.bf16 %v108_v28, %v104_v27  ;;  %v6025_v37 = vpack.c.bf16 %v110_v31, %v106_v29  ;;  %v8685_v38 = vpack.c.bf16 %v558_v33, %v554_v32  ;;  %v555_v40 = vld [vmem:[%s10865_s2 + $0x10] sm:$0xff]  ;;  %v553_v42 = vld [vmem:[%s10865_s2] sm:$0xff] }
  0x18   :  { %6016 = vmatprep.subr.bf16.mxu1 %v6015_v6  ;;  %v560_v35 = vld [vmem:[%s10865_s2 + $0x38] sm:$0xff]  ;;  %v559_v41 = vld [vmem:[%s10865_s2 + $0x30] sm:$0xff]  ;;  %v557_v43 = vld [vmem:[%s10865_s2 + $0x20] sm:$0xff] }
  0x19   :  { %11094 = vst [vmem:[#allocation3_spill] sm:$0xff] %v8685_v38  ;;  %v8687_v39 = vpack.c.bf16 %v560_v35, %v556_v34  ;;  %v564_v44 = vld [vmem:[%s10865_s2 + $0x58] sm:$0xff]  ;;  %v32_v46 = vld [vmem:[%s10866_s0] sm:$0xff]  ;;  %v562_v47 = vld [vmem:[%s10865_s2 + $0x48] sm:$0xff]  ;;  %v8716_v49 = vpack.c.bf16 %v559_v41, %v555_v40  ;;  %v8720_v50 = vpack.c.bf16 %v557_v43, %v553_v42 }
  0x1a   :  { %5986 = vmatpush1.bf16.msra.mxu0 %v5985_v12  ;;  %v568_v45 = vld [vmem:[%s10865_s2 + $0x78] sm:$0xff]  ;;  %v566_v48 = vld [vmem:[%s10865_s2 + $0x68] sm:$0xff]  ;;  %v563_v52 = vld [vmem:[%s10865_s2 + $0x50] sm:$0xff] }
  0x1b   :  { %6018 = vmatpush1.bf16.msra.mxu1 %v6017_v13  ;;  %5988 = vmatprep.subr.bf16.mxu0 %v5987_v14  ;;  %11095 = vst [vmem:[#allocation4_spill] sm:$0xff] %v8687_v39  ;;  %11096 = vst [vmem:[#allocation5_spill] sm:$0xff] %v8716_v49  ;;  %v8722_v51 = vpack.c.bf16 %v568_v45, %v564_v44  ;;  %v567_v53 = vld [vmem:[%s10865_s2 + $0x70] sm:$0xff]  ;;  %v561_v54 = vld [vmem:[%s10865_s2 + $0x40] sm:$0xff]  ;;  %v8733_v55 = vpack.c.bf16 %v566_v48, %v562_v47 }
  0x1c   :  { %6020 = vmatprep.subr.bf16.mxu1 %v6019_v18  ;;  %11097 = vst [vmem:[#allocation6_spill] sm:$0xff] %v8720_v50  ;;  %v565_v56 = vld [vmem:[%s10865_s2 + $0x60] sm:$0xff]  ;;  %v572_v57 = vld [vmem:[%s10865_s2 + $0x98] sm:$0xff]  ;;  %v33_v59 = vld [vmem:[%s10866_s0 + $0x8] sm:$0xff]  ;;  %v8756_v62 = vpack.c.bf16 %v567_v53, %v563_v52 }
  0x1d   :  { %11098 = vst [vmem:[#allocation7_spill] sm:$0xff] %v8722_v51  ;;  %11099 = vst [vmem:[#allocation8_spill] sm:$0xff] %v8733_v55  ;;  %v576_v58 = vld [vmem:[%s10865_s2 + $0xb8] sm:$0xff]  ;;  %v570_v60 = vld [vmem:[%s10865_s2 + $0x88] sm:$0xff]  ;;  %v8760_v63 = vpack.c.bf16 %v565_v56, %v561_v54 }
  0x1e   :  { %5990 = vmatpush1.bf16.msra.mxu0 %v5989_v24  ;;  %v574_v61 = vld [vmem:[%s10865_s2 + $0xa8] sm:$0xff]  ;;  %11100 = vst [vmem:[#allocation9_spill] sm:$0xff] %v8756_v62  ;;  %v8762_v0 = vpack.c.bf16 %v576_v58, %v572_v57  ;;  %v571_v1 = vld [vmem:[%s10865_s2 + $0x90] sm:$0xff]  ;;  %v569_v4 = vld [vmem:[%s10865_s2 + $0x80] sm:$0xff] }
  0x1f   :  { %6022 = vmatpush1.bf16.msra.mxu1 %v6021_v25  ;;  %5992 = vmatprep.subr.bf16.mxu0 %v5991_v26  ;;  %11101 = vst [vmem:[#allocation10_spill] sm:$0xff] %v8760_v63  ;;  %v575_v2 = vld [vmem:[%s10865_s2 + $0xb0] sm:$0xff]  ;;  %v8774_v5 = vpack.c.bf16 %v574_v61, %v570_v60  ;;  %v573_v6 = vld [vmem:[%s10865_s2 + $0xa0] sm:$0xff]  ;;  %v580_v7 = vld [vmem:[%s10865_s2 + $0xd8] sm:$0xff] }
  0x20   :  { %6024 = vmatprep.subr.bf16.mxu1 %v6023_v30  ;;  %11102 = vst [vmem:[#allocation11_spill] sm:$0xff] %v8762_v0  ;;  %v584_v8 = vld [vmem:[%s10865_s2 + $0xf8] sm:$0xff]  ;;  %v34_v9 = vld [vmem:[%s10866_s0 + $0x10] sm:$0xff]  ;;  %v578_v10 = vld [vmem:[%s10865_s2 + $0xc8] sm:$0xff]  ;;  %v8797_v12 = vpack.c.bf16 %v575_v2, %v571_v1  ;;  %v8801_v13 = vpack.c.bf16 %v573_v6, %v569_v4 }
  0x21   :  { %11103 = vst [vmem:[#allocation12_spill] sm:$0xff] %v8774_v5  ;;  %v582_v11 = vld [vmem:[%s10865_s2 + $0xe8] sm:$0xff]  ;;  %v8803_v14 = vpack.c.bf16 %v584_v8, %v580_v7  ;;  %v579_v15 = vld [vmem:[%s10865_s2 + $0xd0] sm:$0xff]  ;;  %v577_v17 = vld [vmem:[%s10865_s2 + $0xc0] sm:$0xff] }
  0x22   :  { %5994 = vmatpush1.bf16.msra.mxu0 %v5993_v36  ;;  %11104 = vst [vmem:[#allocation13_spill] sm:$0xff] %v8797_v12  ;;  %11105 = vst [vmem:[#allocation14_spill] sm:$0xff] %v8801_v13  ;;  %v583_v16 = vld [vmem:[%s10865_s2 + $0xf0] sm:$0xff]  ;;  %v8815_v18 = vpack.c.bf16 %v582_v11, %v578_v10  ;;  %v581_v19 = vld [vmem:[%s10865_s2 + $0xe0] sm:$0xff] }
  0x23   :  { %6026 = vmatpush1.bf16.msra.mxu1 %v6025_v37  ;;  %6028 = vmatprep.subr.bf16.mxu0 %v8685_v38  ;;  %11106 = vst [vmem:[#allocation15_spill] sm:$0xff] %v8803_v14  ;;  %v588_v20 = vld [vmem:[%s10865_s2 + $0x118] sm:$0xff]  ;;  %v586_v23 = vld [vmem:[%s10865_s2 + $0x108] sm:$0xff]  ;;  %v8838_v25 = vpack.c.bf16 %v583_v16, %v579_v15  ;;  %v8842_v26 = vpack.c.bf16 %v581_v19, %v577_v17  ;;  %v587_v28 = vld [vmem:[%s10865_s2 + $0x110] sm:$0xff] }
  0x24   :  { %6060 = vmatprep.subr.bf16.mxu1 %v8687_v39  ;;  %11107 = vst [vmem:[#allocation16_spill] sm:$0xff] %v8815_v18  ;;  %v592_v21 = vld [vmem:[%s10865_s2 + $0x138] sm:$0xff]  ;;  %v590_v24 = vld [vmem:[%s10865_s2 + $0x128] sm:$0xff]  ;;  %v591_v29 = vld [vmem:[%s10865_s2 + $0x130] sm:$0xff] }
  0x25   :  { %199 = vmatmul.mubr.f32.vlgmr.msra.gmra.mrb[0].mxu0 %v32_v46  ;;  %v35_v22 = vld [vmem:[%s10866_s0 + $0x18] sm:$0xff]  ;;  %11108 = vst [vmem:[#allocation17_spill] sm:$0xff] %v8838_v25  ;;  %11109 = vst [vmem:[#allocation18_spill] sm:$0xff] %v8842_v26  ;;  %v8844_v27 = vpack.c.bf16 %v592_v21, %v588_v20  ;;  %v585_v30 = vld [vmem:[%s10865_s2 + $0x100] sm:$0xff]  ;;  %v8856_v31 = vpack.c.bf16 %v590_v24, %v586_v23  ;;  %v8879_v40 = vpack.c.bf16 %v591_v29, %v587_v28 }
  0x26   :  { %360 = vmatmul.mubr.f32.vlgmr.msra.gmra.mrb[0].mxu1 %v32_v46  ;;  %204 = vmatprep.mubr.f32.mxu0 %v10874_v3  ;;  %v589_v32 = vld [vmem:[%s10865_s2 + $0x120] sm:$0xff]  ;;  %v596_v33 = vld [vmem:[%s10865_s2 + $0x158] sm:$0xff]  ;;  %v594_v36 = vld [vmem:[%s10865_s2 + $0x148] sm:$0xff] }
  0x27   :  { %6062 = vmatpush1.bf16.msra.mxu1 %v8716_v49  ;;  %365 = vmatprep.mubr.f32.mxu1 %v10874_v3  ;;  %11110 = vst [vmem:[#allocation19_spill] sm:$0xff] %v8844_v27  ;;  %11111 = vst [vmem:[#allocation20_spill] sm:$0xff] %v8856_v31  ;;  %v600_v34 = vld [vmem:[%s10865_s2 + $0x178] sm:$0xff]  ;;  %v36_v35 = vld [vmem:[%s10866_s0 + $0x20] sm:$0xff]  ;;  %v8883_v41 = vpack.c.bf16 %v589_v32, %v585_v30 }
  0x28   :  { %6030 = vmatpush1.bf16.msra.mxu0 %v8720_v50  ;;  %6064 = vmatprep.subr.bf16.mxu1 %v8722_v51  ;;  %v598_v37 = vld [vmem:[%s10865_s2 + $0x168] sm:$0xff]  ;;  %11112 = vst [vmem:[#allocation21_spill] sm:$0xff] %v8879_v40  ;;  %v8885_v42 = vpack.c.bf16 %v600_v34, %v596_v33  ;;  %v595_v43 = vld [vmem:[%s10865_s2 + $0x150] sm:$0xff]  ;;  %v593_v45 = vld [vmem:[%s10865_s2 + $0x140] sm:$0xff] }
  0x29   :  { %205 = vmatmul.mubr.f32.gmra.mrb[2].mxu0 %v33_v59  ;;  %6032 = vmatprep.subr.bf16.mxu0 %v8733_v55  ;;  %11113 = vst [vmem:[#allocation22_spill] sm:$0xff] %v8883_v41  ;;  %v599_v44 = vld [vmem:[%s10865_s2 + $0x170] sm:$0xff]  ;;  %v8897_v46 = vpack.c.bf16 %v598_v37, %v594_v36  ;;  %v597_v47 = vld [vmem:[%s10865_s2 + $0x160] sm:$0xff]  ;;  %v604_v48 = vld [vmem:[%s10865_s2 + $0x198] sm:$0xff] }
  0x2a   :  { %366 = vmatmul.mubr.f32.gmra.mrb[2].mxu1 %v33_v59  ;;  %210 = vmatprep.mubr.f32.mxu0 %v10874_v3  ;;  %11114 = vst [vmem:[#allocation23_spill] sm:$0xff] %v8885_v42  ;;  %v608_v52 = vld [vmem:[%s10865_s2 + $0x1b8] sm:$0xff]  ;;  %v37_v53 = vld [vmem:[%s10866_s0 + $0x28] sm:$0xff]  ;;  %v8920_v57 = vpack.c.bf16 %v599_v44, %v595_v43  ;;  %v8924_v58 = vpack.c.bf16 %v597_v47, %v593_v45  ;;  %v603_v60 = vld [vmem:[%s10865_s2 + $0x190] sm:$0xff] }
  0x2b   :  { %371 = vmatprep.mubr.f32.mxu1 %v10874_v3  ;;  %6066 = vmatpush1.bf16.msra.mxu1 %v8756_v62  ;;  %11115 = vst [vmem:[#allocation24_spill] sm:$0xff] %v8897_v46  ;;  %v602_v54 = vld [vmem:[%s10865_s2 + $0x188] sm:$0xff]  ;;  %v8926_v59 = vpack.c.bf16 %v608_v52, %v604_v48  ;;  %v607_v61 = vld [vmem:[%s10865_s2 + $0x1b0] sm:$0xff]  ;;  %v601_v1 = vld [vmem:[%s10865_s2 + $0x180] sm:$0xff] }
  0x2c   :  { %6034 = vmatpush1.bf16.msra.mxu0 %v8760_v63  ;;  %6068 = vmatprep.subr.bf16.mxu1 %v8762_v0  ;;  %v606_v56 = vld [vmem:[%s10865_s2 + $0x1a8] sm:$0xff]  ;;  %11116 = vst [vmem:[#allocation25_spill] sm:$0xff] %v8920_v57  ;;  %11117 = vst [vmem:[#allocation26_spill] sm:$0xff] %v8924_v58  ;;  %v605_v4 = vld [vmem:[%s10865_s2 + $0x1a0] sm:$0xff]  ;;  %v8961_v11 = vpack.c.bf16 %v607_v61, %v603_v60 }
  0x2d   :  { %211 = vmatmul.mubr.f32.gmra.mrb[4].mxu0 %v34_v9  ;;  %6036 = vmatprep.subr.bf16.mxu0 %v8774_v5  ;;  %11118 = vst [vmem:[#allocation27_spill] sm:$0xff] %v8926_v59  ;;  %v8938_v2 = vpack.c.bf16 %v606_v56, %v602_v54  ;;  %v612_v6 = vld [vmem:[%s10865_s2 + $0x1d8] sm:$0xff]  ;;  %v38_v8 = vld [vmem:[%s10866_s0 + $0x30] sm:$0xff]  ;;  %v614_v10 = vld [vmem:[%s10865_s2 + $0x1e8] sm:$0xff]  ;;  %v8965_v15 = vpack.c.bf16 %v605_v4, %v601_v1 }
  0x2e   :  { %372 = vmatmul.mubr.f32.gmra.mrb[4].mxu1 %v34_v9  ;;  %216 = vmatprep.mubr.f32.mxu0 %v10874_v3  ;;  %v616_v7 = vld [vmem:[%s10865_s2 + $0x1f8] sm:$0xff]  ;;  %v610_v9 = vld [vmem:[%s10865_s2 + $0x1c8] sm:$0xff]  ;;  %11120 = vst [vmem:[#allocation29_spill] sm:$0xff] %v8961_v11  ;;  %v611_v17 = vld [vmem:[%s10865_s2 + $0x1d0] sm:$0xff] }
  0x2f   :  { %377 = vmatprep.mubr.f32.mxu1 %v10874_v3  ;;  %6070 = vmatpush1.bf16.msra.mxu1 %v8797_v12  ;;  %11119 = vst [vmem:[#allocation28_spill] sm:$0xff] %v8938_v2  ;;  %11121 = vst [vmem:[#allocation30_spill] sm:$0xff] %v8965_v15  ;;  %v8967_v16 = vpack.c.bf16 %v616_v7, %v612_v6  ;;  %v615_v19 = vld [vmem:[%s10865_s2 + $0x1f0] sm:$0xff]  ;;  %v8976_v20 = vpack.c.bf16 %v614_v10, %v610_v9  ;;  %v609_v21 = vld [vmem:[%s10865_s2 + $0x1c0] sm:$0xff] }
  0x30   :  { %6038 = vmatpush1.bf16.msra.mxu0 %v8801_v13  ;;  %6072 = vmatprep.subr.bf16.mxu1 %v8803_v14  ;;  %v39_v23 = vld [vmem:[%s10866_s0 + $0x38] sm:$0xff]  ;;  %v8990_v24 = vpack.c.bf16 %v615_v19, %v611_v17  ;;  %v40_v29 = vld [vmem:[%s10866_s0 + $0x40] sm:$0xff]  ;;  %v41_v30 = vld [vmem:[%s10866_s0 + $0x48] sm:$0xff] }
  0x31   :  { %217 = vmatmul.mubr.f32.gmra.mrb[6].mxu0 %v35_v22  ;;  %6040 = vmatprep.subr.bf16.mxu0 %v8815_v18  ;;  %11122 = vst [vmem:[#allocation31_spill] sm:$0xff] %v8967_v16  ;;  %11123 = vst [vmem:[#allocation32_spill] sm:$0xff] %v8976_v20  ;;  %v42_v32 = vld [vmem:[%s10866_s0 + $0x50] sm:$0xff]  ;;  %v43_v33 = vld [vmem:[%s10866_s0 + $0x58] sm:$0xff] }
  0x32   :  { %378 = vmatmul.mubr.f32.gmra.mrb[6].mxu1 %v35_v22  ;;  %222 = vmatprep.mubr.f32.mxu0 %v10874_v3  ;;  %v613_v22 = vld [vmem:[%s10865_s2 + $0x1e0] sm:$0xff]  ;;  %11124 = vst [vmem:[#allocation33_spill] sm:$0xff] %v8990_v24  ;;  %v46_v36 = vld [vmem:[%s10866_s0 + $0x70] sm:$0xff]  ;;  %v47_v37 = vld [vmem:[%s10866_s0 + $0x78] sm:$0xff] }
  0x33   :  { %383 = vmatprep.mubr.f32.mxu1 %v10874_v3  ;;  %6074 = vmatpush1.bf16.msra.mxu1 %v8838_v25  ;;  %v8994_v28 = vpack.c.bf16 %v613_v22, %v609_v21  ;;  %v44_v34 = vld [vmem:[%s10866_s0 + $0x60] sm:$0xff]  ;;  %v842_v43 = vld [vmem:[%s10867_s4 + $0x8] sm:$0xff]  ;;  %v844_v45 = vld [vmem:[%s10867_s4 + $0x18] sm:$0xff] }
  0x34   :  { %6042 = vmatpush1.bf16.msra.mxu0 %v8842_v26  ;;  %6076 = vmatprep.subr.bf16.mxu1 %v8844_v27  ;;  %v846_v44 = vld [vmem:[%s10867_s4 + $0x28] sm:$0xff]  ;;  %v848_v48 = vld [vmem:[%s10867_s4 + $0x38] sm:$0xff]  ;;  %v841_v52 = vld [vmem:[%s10867_s4] sm:$0xff] }
  0x35   :  { %223 = vmatmul.mubr.f32.gmra.mrb[8].mxu0 %v36_v35  ;;  %6044 = vmatprep.subr.bf16.mxu0 %v8856_v31  ;;  %11125 = vst [vmem:[#allocation34_spill] sm:$0xff] %v8994_v28  ;;  %v9058_v47 = vpack.c.bf16 %v846_v44, %v842_v43  ;;  %v9069_v54 = vpack.c.bf16 %v848_v48, %v844_v45  ;;  %v843_v60 = vld [vmem:[%s10867_s4 + $0x10] sm:$0xff]  ;;  %v850_v4 = vld [vmem:[%s10867_s4 + $0x48] sm:$0xff]  ;;  %v852_v7 = vld [vmem:[%s10867_s4 + $0x58] sm:$0xff] }
  0x36   :  { %384 = vmatmul.mubr.f32.gmra.mrb[8].mxu1 %v36_v35  ;;  %228 = vmatprep.mubr.f32.mxu0 %v10874_v3  ;;  %v45_v35 = vld [vmem:[%s10866_s0 + $0x68] sm:$0xff]  ;;  %v847_v61 = vld [vmem:[%s10867_s4 + $0x30] sm:$0xff]  ;;  %v856_v9 = vld [vmem:[%s10867_s4 + $0x78] sm:$0xff] }
  0x37   :  { %389 = vmatprep.mubr.f32.mxu1 %v10874_v3  ;;  %6078 = vmatpush1.bf16.msra.mxu1 %v8879_v40  ;;  %11126 = vst [vmem:[#allocation35_spill] sm:$0xff] %v9058_v47  ;;  %11127 = vst [vmem:[#allocation36_spill] sm:$0xff] %v9069_v54  ;;  %v9080_v1 = vpack.c.bf16 %v847_v61, %v843_v60  ;;  %v854_v6 = vld [vmem:[%s10867_s4 + $0x68] sm:$0xff]  ;;  %v849_v10 = vld [vmem:[%s10867_s4 + $0x40] sm:$0xff]  ;;  %v9105_v19 = vpack.c.bf16 %v856_v9, %v852_v7 }
  0x38   :  { %6046 = vmatpush1.bf16.msra.mxu0 %v8883_v41  ;;  %6080 = vmatprep.subr.bf16.mxu1 %v8885_v42  ;;  %v853_v17 = vld [vmem:[%s10867_s4 + $0x60] sm:$0xff]  ;;  %v851_v22 = vld [vmem:[%s10867_s4 + $0x50] sm:$0xff]  ;;  %v870_v60 = vld [vmem:[%s10867_s4 + $0xe8] sm:$0xff] }
  0x39   :  { %229 = vmatmul.mubr.f32.gmra.mrb[10].mxu0 %v37_v53  ;;  %6048 = vmatprep.subr.bf16.mxu0 %v8897_v46  ;;  %11129 = vst [vmem:[#allocation38_spill] sm:$0xff] %v9080_v1  ;;  %11131 = vst [vmem:[#allocation40_spill] sm:$0xff] %v9105_v19  ;;  %v9107_v21 = vpack.c.bf16 %v853_v17, %v849_v10  ;;  %v859_v45 = vld [vmem:[%s10867_s4 + $0x90] sm:$0xff]  ;;  %v868_v61 = vld [vmem:[%s10867_s4 + $0xd8] sm:$0xff] }
  0x3a   :  { %390 = vmatmul.mubr.f32.gmra.mrb[10].mxu1 %v37_v53  ;;  %234 = vmatprep.mubr.f32.mxu0 %v10874_v3  ;;  %v845_v53 = vld [vmem:[%s10867_s4 + $0x20] sm:$0xff]  ;;  %v863_v48 = vld [vmem:[%s10867_s4 + $0xb0] sm:$0xff] }
  0x3b   :  { %395 = vmatprep.mubr.f32.mxu1 %v10874_v3  ;;  %6082 = vmatpush1.bf16.msra.mxu1 %v8920_v57  ;;  %v9071_v56 = vpack.c.bf16 %v845_v53, %v841_v52  ;;  %11132 = vst [vmem:[#allocation41_spill] sm:$0xff] %v9107_v21  ;;  %v9152_v52 = vpack.c.bf16 %v863_v48, %v859_v45  ;;  %v866_v53 = vld [vmem:[%s10867_s4 + $0xc8] sm:$0xff]  ;;  %v865_v7 = vld [vmem:[%s10867_s4 + $0xc0] sm:$0xff] }
  0x3c   :  { %6050 = vmatpush1.bf16.msra.mxu0 %v8924_v58  ;;  %6084 = vmatprep.subr.bf16.mxu1 %v8926_v59  ;;  %v869_v9 = vld [vmem:[%s10867_s4 + $0xe0] sm:$0xff] }
  0x3d   :  { %235 = vmatmul.mubr.f32.gmra.mrb[12].mxu0 %v38_v8  ;;  %6052 = vmatprep.subr.bf16.mxu0 %v8938_v2  ;;  %11128 = vst [vmem:[#allocation37_spill] sm:$0xff] %v9071_v56  ;;  %11137 = vst [vmem:[#allocation46_spill] sm:$0xff] %v9152_v52  ;;  %v9179_v17 = vpack.c.bf16 %v869_v9, %v865_v7  ;;  %v873_v45 = vld [vmem:[%s10867_s4 + $0x100] sm:$0xff]  ;;  %v882_v9 = vld [vmem:[%s10867_s4 + $0x148] sm:$0xff] }
  0x3e   :  { %396 = vmatmul.mubr.f32.gmra.mrb[12].mxu1 %v38_v8  ;;  %240 = vmatprep.mubr.f32.mxu0 %v10874_v3  ;;  %v9094_v8 = vpack.c.bf16 %v854_v6, %v850_v4  ;;  %v9166_v4 = vpack.c.bf16 %v870_v60, %v866_v53  ;;  %v872_v6 = vld [vmem:[%s10867_s4 + $0xf8] sm:$0xff]  ;;  %v877_v48 = vld [vmem:[%s10867_s4 + $0x120] sm:$0xff] }
  0x3f   :  { %401 = vmatprep.mubr.f32.mxu1 %v10874_v3  ;;  %6086 = vmatpush1.bf16.msra.mxu1 %v8961_v11  ;;  %v9177_v10 = vpack.c.bf16 %v872_v6, %v868_v61  ;;  %11140 = vst [vmem:[#allocation49_spill] sm:$0xff] %v9179_v17  ;;  %v9215_v60 = vpack.c.bf16 %v877_v48, %v873_v45  ;;  %v875_v61 = vld [vmem:[%s10867_s4 + $0x110] sm:$0xff] }
  0x40   :  { %6054 = vmatpush1.bf16.msra.mxu0 %v8965_v15  ;;  %6088 = vmatprep.subr.bf16.mxu1 %v8967_v16  ;;  %11130 = vst [vmem:[#allocation39_spill] sm:$0xff] %v9094_v8  ;;  %11138 = vst [vmem:[#allocation47_spill] sm:$0xff] %v9166_v4  ;;  %v879_v6 = vld [vmem:[%s10867_s4 + $0x130] sm:$0xff] }
  0x41   :  { %241 = vmatmul.mubr.f32.gmra.mrb[14].mxu0 %v39_v23  ;;  %6056 = vmatprep.subr.bf16.mxu0 %v8976_v20  ;;  %11139 = vst [vmem:[#allocation48_spill] sm:$0xff] %v9177_v10  ;;  %11144 = vst [vmem:[#allocation53_spill] sm:$0xff] %v9215_v60  ;;  %v9224_v7 = vpack.c.bf16 %v879_v6, %v875_v61  ;;  %v883_v61 = vld [vmem:[%s10867_s4 + $0x150] sm:$0xff] }
  0x42   :  { %402 = vmatmul.mubr.f32.gmra.mrb[14].mxu1 %v39_v23  ;;  %246 = vmatprep.mubr.f32.mxu0 %v10874_v3  ;;  %v855_v23 = vld [vmem:[%s10867_s4 + $0x70] sm:$0xff] }
  0x43   :  { %407 = vmatprep.mubr.f32.mxu1 %v10874_v3  ;;  %6090 = vmatpush1.bf16.msra.mxu1 %v8990_v24  ;;  %11145 = vst [vmem:[#allocation54_spill] sm:$0xff] %v9224_v7  ;;  %v887_v6 = vld [vmem:[%s10867_s4 + $0x170] sm:$0xff] }
  0x44   :  { %6058 = vmatpush1.bf16.msra.mxu0 %v8994_v28  ;;  %6124 = vmatprep.subr.bf16.mxu1 %v9069_v54 }
  0x45   :  { %247 = vmatmul.mubr.f32.gmra.mrb[16].mxu0 %v40_v29  ;;  %6092 = vmatprep.subr.bf16.mxu0 %v9058_v47 }
  0x46   :  { %408 = vmatmul.mubr.f32.gmra.mrb[16].mxu1 %v40_v29  ;;  %252 = vmatprep.mubr.f32.mxu0 %v10874_v3  ;;  %v9116_v29 = vpack.c.bf16 %v855_v23, %v851_v22  ;;  %v867_v22 = vld [vmem:[%s10867_s4 + $0xd0] sm:$0xff] }
  0x47   :  { %413 = vmatprep.mubr.f32.mxu1 %v10874_v3  ;;  %v871_v23 = vld [vmem:[%s10867_s4 + $0xf0] sm:$0xff] }
  0x48   :  { %11133 = vst [vmem:[#allocation42_spill] sm:$0xff] %v9116_v29 }
  0x49   :  { %253 = vmatmul.mubr.f32.gmra.mrb[18].mxu0 %v41_v30 }
  0x4a   :  { %414 = vmatmul.mubr.f32.gmra.mrb[18].mxu1 %v41_v30  ;;  %258 = vmatprep.mubr.f32.mxu0 %v10874_v3  ;;  %v858_v30 = vld [vmem:[%s10867_s4 + $0x88] sm:$0xff] }
  0x4b   :  { %419 = vmatprep.mubr.f32.mxu1 %v10874_v3 }
  0x4d   :  { %259 = vmatmul.mubr.f32.gmra.mrb[20].mxu0 %v42_v32 }
  0x4e   :  { %420 = vmatmul.mubr.f32.gmra.mrb[20].mxu1 %v42_v32  ;;  %264 = vmatprep.mubr.f32.mxu0 %v10874_v3  ;;  %v862_v32 = vld [vmem:[%s10867_s4 + $0xa8] sm:$0xff] }
  0x4f   :  { %425 = vmatprep.mubr.f32.mxu1 %v10874_v3 }
  0x51   :  { %265 = vmatmul.mubr.f32.gmra.mrb[22].mxu0 %v43_v33 }
  0x52   :  { %426 = vmatmul.mubr.f32.gmra.mrb[22].mxu1 %v43_v33  ;;  %270 = vmatprep.mubr.f32.mxu0 %v10874_v3  ;;  %v860_v33 = vld [vmem:[%s10867_s4 + $0x98] sm:$0xff] }
  0x53   :  { %431 = vmatprep.mubr.f32.mxu1 %v10874_v3 }
  0x55   :  { %271 = vmatmul.mubr.f32.gmra.mrb[24].mxu0 %v44_v34 }
  0x56   :  { %432 = vmatmul.mubr.f32.gmra.mrb[24].mxu1 %v44_v34  ;;  %276 = vmatprep.mubr.f32.mxu0 %v10874_v3  ;;  %v9130_v34 = vpack.c.bf16 %v862_v32, %v858_v30  ;;  %v9188_v30 = vpack.c.bf16 %v871_v23, %v867_v22  ;;  %v874_v32 = vld [vmem:[%s10867_s4 + $0x108] sm:$0xff]  ;;  %v884_v23 = vld [vmem:[%s10867_s4 + $0x158] sm:$0xff] }
  0x57   :  { %437 = vmatprep.mubr.f32.mxu1 %v10874_v3  ;;  %v886_v22 = vld [vmem:[%s10867_s4 + $0x168] sm:$0xff] }
  0x58   :  { %11134 = vst [vmem:[#allocation43_spill] sm:$0xff] %v9130_v34  ;;  %11141 = vst [vmem:[#allocation50_spill] sm:$0xff] %v9188_v30 }
  0x59   :  { %277 = vmatmul.mubr.f32.gmra.mrb[26].mxu0 %v45_v35 }
  0x5a   :  { %438 = vmatmul.mubr.f32.gmra.mrb[26].mxu1 %v45_v35  ;;  %282 = vmatprep.mubr.f32.mxu0 %v10874_v3  ;;  %v864_v35 = vld [vmem:[%s10867_s4 + $0xb8] sm:$0xff] }
  0x5b   :  { %443 = vmatprep.mubr.f32.mxu1 %v10874_v3  ;;  %v9141_v43 = vpack.c.bf16 %v864_v35, %v860_v33  ;;  %v878_v33 = vld [vmem:[%s10867_s4 + $0x128] sm:$0xff]  ;;  %v876_v35 = vld [vmem:[%s10867_s4 + $0x118] sm:$0xff] }
  0x5d   :  { %283 = vmatmul.mubr.f32.gmra.mrb[28].mxu0 %v46_v36  ;;  %11135 = vst [vmem:[#allocation44_spill] sm:$0xff] %v9141_v43 }
  0x5e   :  { %444 = vmatmul.mubr.f32.gmra.mrb[28].mxu1 %v46_v36  ;;  %288 = vmatprep.mubr.f32.mxu0 %v10874_v3  ;;  %v857_v36 = vld [vmem:[%s10867_s4 + $0x80] sm:$0xff] }
  0x5f   :  { %449 = vmatprep.mubr.f32.mxu1 %v10874_v3 }
  0x61   :  { %289 = vmatmul.mubr.f32.gmra.mrb[30].mxu0 %v47_v37 }
  0x62   :  { %450 = vmatmul.mubr.f32.gmra.mrb[30].mxu1 %v47_v37  ;;  %681 = vmatprep.mubr.f32.mxu0 %v10874_v3  ;;  %v861_v37 = vld [vmem:[%s10867_s4 + $0xa0] sm:$0xff] }
  0x63   :  { %758 = vmatprep.mubr.f32.mxu1 %v10874_v3  ;;  %v9143_v44 = vpack.c.bf16 %v861_v37, %v857_v36  ;;  %v9202_v36 = vpack.c.bf16 %v878_v33, %v874_v32  ;;  %v880_v37 = vld [vmem:[%s10867_s4 + $0x138] sm:$0xff]  ;;  %v9238_v32 = vpack.c.bf16 %v886_v22, %v882_v9  ;;  %v9260_v9 = vpack.c.bf16 %v887_v6, %v883_v61  ;;  %v890_v22 = vld [vmem:[%s10867_s4 + $0x188] sm:$0xff]  ;;  %v889_v61 = vld [vmem:[%s10867_s4 + $0x180] sm:$0xff] }
  0x64   :  { %v9213_v53 = vpack.c.bf16 %v880_v37, %v876_v35  ;;  %v888_v33 = vld [vmem:[%s10867_s4 + $0x178] sm:$0xff]  ;;  %v881_v35 = vld [vmem:[%s10867_s4 + $0x140] sm:$0xff] }
  0x65   :  { %682 = vmatmul.mubr.f32.vlgmr.msra.gmra.mrb[0].mxu0 %v10874_v3  ;;  %11136 = vst [vmem:[#allocation45_spill] sm:$0xff] %v9143_v44  ;;  %11142 = vst [vmem:[#allocation51_spill] sm:$0xff] %v9202_v36  ;;  %v885_v37 = vld [vmem:[%s10867_s4 + $0x160] sm:$0xff]  ;;  %v9249_v45 = vpack.c.bf16 %v888_v33, %v884_v23  ;;  %v894_v23 = vld [vmem:[%s10867_s4 + $0x1a8] sm:$0xff] }
  0x66   :  { %759 = vmatmul.mubr.f32.vlgmr.msra.gmra.mrb[0].mxu1 %v10874_v3  ;;  %687 = vmatprep.mubr.f32.mxu0 %v10874_v3  ;;  %11143 = vst [vmem:[#allocation52_spill] sm:$0xff] %v9213_v53  ;;  %11146 = vst [vmem:[#allocation55_spill] sm:$0xff] %v9238_v32  ;;  %v9251_v48 = vpack.c.bf16 %v885_v37, %v881_v35  ;;  %v892_v33 = vld [vmem:[%s10867_s4 + $0x198] sm:$0xff]  ;;  %v9274_v35 = vpack.c.bf16 %v894_v23, %v890_v22  ;;  %v893_v6 = vld [vmem:[%s10867_s4 + $0x1a0] sm:$0xff] }
  0x67   :  { %764 = vmatprep.mubr.f32.mxu1 %v10874_v3  ;;  %6094 = vmatpush1.bf16.msra.mxu0 %v9071_v56  ;;  %11147 = vst [vmem:[#allocation56_spill] sm:$0xff] %v9249_v45  ;;  %11149 = vst [vmem:[#allocation58_spill] sm:$0xff] %v9260_v9  ;;  %v896_v37 = vld [vmem:[%s10867_s4 + $0x1b8] sm:$0xff]  ;;  %v891_v22 = vld [vmem:[%s10867_s4 + $0x190] sm:$0xff] }
  0x68   :  { %6126 = vmatpush1.bf16.msra.mxu1 %v9080_v1  ;;  %6096 = vmatprep.subr.bf16.mxu0 %v9094_v8  ;;  %11148 = vst [vmem:[#allocation57_spill] sm:$0xff] %v9251_v48  ;;  %11150 = vst [vmem:[#allocation59_spill] sm:$0xff] %v9274_v35  ;;  %v895_v23 = vld [vmem:[%s10867_s4 + $0x1b0] sm:$0xff] }
  0x69   :  { %688 = vmatmul.mubr.f32.gmra.mrb[2].mxu0 %v10874_v3  ;;  %6128 = vmatprep.subr.bf16.mxu1 %v9105_v19 }
  0x6a   :  { %765 = vmatmul.mubr.f32.gmra.mrb[2].mxu1 %v10874_v3  ;;  %969 = vmatprep.mubr.f32.mxu0 %v10874_v3 }
  0x6b   :  { %1046 = vmatprep.mubr.f32.mxu1 %v10874_v3  ;;  %6098 = vmatpush1.bf16.msra.mxu0 %v9107_v21  ;;  %v9285_v3 = vpack.c.bf16 %v896_v37, %v892_v33  ;;  %v902_v33 = vld [vmem:[%s10867_s4 + $0x1e8] sm:$0xff]  ;;  %v900_v37 = vld [vmem:[%s10867_s4 + $0x1d8] sm:$0xff] }
  0x6c   :  { %6130 = vmatpush1.bf16.msra.mxu1 %v9116_v29  ;;  %6100 = vmatprep.subr.bf16.mxu0 %v9130_v34 }
  0x6d   :  { %6132 = vmatprep.subr.bf16.mxu1 %v9141_v43  ;;  %11151 = vst [vmem:[#allocation60_spill] sm:$0xff] %v9285_v3 }
  0x6f   :  { %6102 = vmatpush1.bf16.msra.mxu0 %v9143_v44 }
  0x70   :  { %6134 = vmatpush1.bf16.msra.mxu1 %v9152_v52  ;;  %6104 = vmatprep.subr.bf16.mxu0 %v9166_v4 }
  0x71   :  { %6136 = vmatprep.subr.bf16.mxu1 %v9177_v10 }
  0x73   :  { %6106 = vmatpush1.bf16.msra.mxu0 %v9179_v17 }
  0x74   :  { %6138 = vmatpush1.bf16.msra.mxu1 %v9188_v30  ;;  %6108 = vmatprep.subr.bf16.mxu0 %v9202_v36 }
  0x75   :  { %6140 = vmatprep.subr.bf16.mxu1 %v9213_v53 }
  0x77   :  { %6110 = vmatpush1.bf16.msra.mxu0 %v9215_v60 }
  0x78   :  { %6142 = vmatpush1.bf16.msra.mxu1 %v9224_v7  ;;  %6112 = vmatprep.subr.bf16.mxu0 %v9238_v32  ;;  %v899_v32 = vld [vmem:[%s10867_s4 + $0x1d0] sm:$0xff] }
  0x79   :  { %6144 = vmatprep.subr.bf16.mxu1 %v9249_v45  ;;  %v9299_v45 = vpack.c.bf16 %v895_v23, %v891_v22  ;;  %v897_v23 = vld [vmem:[%s10867_s4 + $0x1c0] sm:$0xff] }
  0x7b   :  { %6114 = vmatpush1.bf16.msra.mxu0 %v9251_v48  ;;  %v9287_v48 = vpack.c.bf16 %v893_v6, %v889_v61  ;;  %11153 = vst [vmem:[#allocation62_spill] sm:$0xff] %v9299_v45  ;;  %v904_v61 = vld [vmem:[%s10867_s4 + $0x1f8] sm:$0xff] }
  0x7c   :  { %6146 = vmatpush1.bf16.msra.mxu1 %v9260_v9  ;;  %v898_v9 = vld [vmem:[%s10867_s4 + $0x1c8] sm:$0xff]  ;;  %6116 = vmatprep.subr.bf16.mxu0 %v9274_v35  ;;  %v9314_v22 = vpack.c.bf16 %v904_v61, %v900_v37  ;;  %v901_v35 = vld [vmem:[%s10867_s4 + $0x1e0] sm:$0xff] }
  0x7d   :  { %11152 = vst [vmem:[#allocation61_spill] sm:$0xff] %v9287_v48  ;;  %6148 = vmatprep.subr.bf16.mxu1 %v9285_v3  ;;  %v9312_v6 = vpack.c.bf16 %v902_v33, %v898_v9  ;;  %v9326_v3 = vpack.c.bf16 %v901_v35, %v897_v23  ;;  %v903_v9 = vld [vmem:[%s10867_s4 + $0x1f0] sm:$0xff]  ;;  %v1060_v33 = vld [vmem:[%s10868_s5 + $0x8] sm:$0xff]  ;;  %v1062_v23 = vld [vmem:[%s10868_s5 + $0x18] sm:$0xff] }
  0x7e   :  { %11155 = vst [vmem:[#allocation64_spill] sm:$0xff] %v9314_v22  ;;  %v1064_v37 = vld [vmem:[%s10868_s5 + $0x28] sm:$0xff]  ;;  %v9339_v61 = vpack.c.bf16 %v903_v9, %v899_v32  ;;  %v114_v32 = vlaneseq }
  0x7f   :  { %6118 = vmatpush1.bf16.msra.mxu0 %v9287_v48  ;;  %11154 = vst [vmem:[#allocation63_spill] sm:$0xff] %v9312_v6  ;;  %11156 = vst [vmem:[#allocation65_spill] sm:$0xff] %v9326_v3  ;;  %v9341_v35 = vpack.c.bf16 %v1064_v37, %v1060_v33  ;;  %v112_v37 = vld [vmem:[%s10869_s3] sm:$0xf] }
  0x80   :  { %6150 = vmatpush1.bf16.msra.mxu1 %v9299_v45  ;;  %6120 = vmatprep.subr.bf16.mxu0 %v9312_v6  ;;  %11157 = vst [vmem:[#allocation66_spill] sm:$0xff] %v9339_v61  ;;  %v1066_v45 = vld [vmem:[%s10868_s5 + $0x38] sm:$0xff]  ;;  %v9355_v9 = vshrl.u32 %v114_v32, 7 }
  0x81   :  { %6152 = vmatprep.subr.bf16.mxu1 %v9314_v22  ;;  %11158 = vst [vmem:[#allocation67_spill] sm:$0xff] %v9341_v35  ;;  %v9349_v48 = vpack.c.bf16 %v1066_v45, %v1062_v23 }
  0x82   :  { %11160 = vst [vmem:[#allocation69_spill] sm:$0xff] %v9355_v9  ;;  %v10910_v33 = vsub.s32 0, %v9355_v9  ;;  %v10915_v45 = vsub.s32 2, %v9355_v9  ;;  %v10918_v23 = vsub.s32 1, %v9355_v9 }
  0x83   :  { %11159 = vst [vmem:[#allocation68_spill] sm:$0xff] %v9349_v48  ;;  %6122 = vmatpush1.bf16.msra.mxu0 %v9326_v3 }
  0x84   :  { %6154 = vmatpush1.bf16.msra.mxu1 %v9339_v61  ;;  %6156 = vmatprep.subr.bf16.mxu0 %v9341_v35  ;;  %v9365_v61 = vrot.slane %v112_v37, %v10910_v33  ;;  %v9373_v32 = vrot.slane %v112_v37, %v10918_v23 }
  0x85   :  { %6188 = vmatprep.subr.bf16.mxu1 %v9349_v48  ;;  %v9369_v48 = vrot.slane %v112_v37, %v10915_v45  ;;  %v10931_v45 = vsub.s32 3, %v9355_v9 }
  0x86   :  { %11161 = vst [vmem:[#allocation70_spill] sm:$0xff] %v9365_v61  ;;  %11163 = vst [vmem:[#allocation72_spill] sm:$0xff] %v9373_v32 }
  0x87   :  { %11162 = vst [vmem:[#allocation71_spill] sm:$0xff] %v9369_v48 }
 0x138   :  { %v683_v35 = vpop.f32.mrb[0].mxu0 }
 0x139   :  { %v7595_v3 = vadd.f32 %v683_v35, %v9365_v61  ;;  %v760_v22 = vpop.f32.mrb[0].mxu1  ;;  %v685_v6 = vpop.f32.mrb[1].mxu0 }
 0x13a   :  { %v7627_v7 = vadd.f32 %v760_v22, %v9369_v48  ;;  %v7596_v60 = vadd.f32 %v685_v6, %v9373_v32  ;;  %v762_v53 = vpop.f32.mrb[1].mxu1 }
 0x13b   :  { %v5749_v33 = vmul.f32 -1.442695, %v7595_v3  ;;  %v9384_v3 = vrot.slane %v112_v37, %v10931_v45 }
 0x13c   :  { %v5751_v36 = vmul.f32 -1.442695, %v7627_v7  ;;  %v5750_v30 = vmul.f32 -1.442695, %v7596_v60  ;;  %v689_v17 = vpop.f32.mrb[2].mxu0 }
 0x13d   :  { %7852 = vpow2.f32 %v5749_v33  ;;  %v7597_v23 = vadd.f32 %v689_v17, %v9365_v61  ;;  %v766_v10 = vpop.f32.mrb[2].mxu1  ;;  %v691_v4 = vpop.f32.mrb[3].mxu0  ;;  %11164 = vst [vmem:[#allocation73_spill] sm:$0xff] %v9384_v3  ;;  %v7628_v17 = vadd.f32 %v762_v53, %v9384_v3 }
 0x13e   :  { %7854 = vpow2.f32 %v5751_v36  ;;  %v7629_v35 = vadd.f32 %v766_v10, %v9369_v48  ;;  %v7598_v52 = vadd.f32 %v691_v4, %v9373_v32  ;;  %v768_v22 = vpop.f32.mrb[3].mxu1 }
 0x13f   :  { %7856 = vpow2.f32 %v5750_v30  ;;  %v5753_v6 = vmul.f32 -1.442695, %v7597_v23  ;;  %v5752_v61 = vmul.f32 -1.442695, %v7628_v17  ;;  %v7630_v10 = vadd.f32 %v768_v22, %v9384_v3 }
 0x140   :  { %v5755_v60 = vmul.f32 -1.442695, %v7629_v35  ;;  %v5754_v7 = vmul.f32 -1.442695, %v7598_v52 }
 0x141   :  { %7858 = vpow2.f32 %v5753_v6  ;;  %v5756_v35 = vmul.f32 -1.442695, %v7630_v10 }
 0x142   :  { %7860 = vpow2.f32 %v5755_v60 }
 0x143   :  { %7862 = vpow2.f32 %v5754_v7 }
 0x147   :  { %v7853_v33 = vpop.eup %7852 }
 0x148   :  { %v7855_v36 = vpop.eup %7854  ;;  %v803_v30 = vadd.f32 1.0, %v7853_v33 }
 0x149   :  { %v7857_v4 = vpop.eup %7856  ;;  %v805_v32 = vadd.f32 1.0, %v7855_v36 }
 0x14a   :  { %v804_v23 = vadd.f32 1.0, %v7857_v4 }
 0x14b   :  { %v7859_v48 = vpop.eup %7858  ;;  %7864 = vrcp.f32 %v805_v32 }
 0x14c   :  { %v7861_v37 = vpop.eup %7860  ;;  %7866 = vpow2.f32 %v5752_v61  ;;  %v807_v53 = vadd.f32 1.0, %v7859_v48 }
 0x14d   :  { %v7863_v52 = vpop.eup %7862  ;;  %7868 = vrcp.f32 %v804_v23  ;;  %v809_v6 = vadd.f32 1.0, %v7861_v37 }
 0x14e   :  { %7870 = vrcp.f32 %v803_v30  ;;  %v808_v60 = vadd.f32 1.0, %v7863_v52 }
 0x14f   :  { %7872 = vrcp.f32 %v809_v6 }
 0x150   :  { %7874 = vpow2.f32 %v5756_v35 }
 0x151   :  { %7876 = vrcp.f32 %v808_v60 }
 0x152   :  { %7878 = vrcp.f32 %v807_v53 }
 0x155   :  { %v7865_v22 = vpop.eup %7864 }
 0x156   :  { %v7867_v7 = vpop.eup %7866  ;;  %v827_v17 = vmul.f32 2.0, %v7865_v22  ;;  %v1059_v22 = vld [vmem:[%s10868_s5] sm:$0xff] }
 0x157   :  { %v7869_v33 = vpop.eup %7868  ;;  %v806_v45 = vadd.f32 1.0, %v7867_v7  ;;  %v1065_v7 = vld [vmem:[%s10868_s5 + $0x30] sm:$0xff] }
 0x158   :  { %v7871_v36 = vpop.eup %7870  ;;  %v5757_v4 = vadd.f32 -1.0, %v827_v17  ;;  %v831_v3 = vmul.f32 0.0, %v7869_v33  ;;  %v1068_v17 = vld [vmem:[%s10868_s5 + $0x48] sm:$0xff] }
 0x159   :  { %v7873_v32 = vpop.eup %7872  ;;  %7880 = vrcp.f32 %v806_v45  ;;  %v1061_v45 = vld [vmem:[%s10868_s5 + $0x10] sm:$0xff] }
 0x15a   :  { %v7875_v61 = vpop.eup %7874  ;;  %v833_v10 = vmul.f32 %v7871_v36, %v5757_v4  ;;  %v828_v23 = vmul.f32 2.0, %v7873_v32  ;;  %v1072_v36 = vld [vmem:[%s10868_s5 + $0x68] sm:$0xff]  ;;  %v1070_v4 = vld [vmem:[%s10868_s5 + $0x58] sm:$0xff] }
 0x15b   :  { %v7877_v37 = vpop.eup %7876  ;;  %v810_v35 = vadd.f32 1.0, %v7875_v61  ;;  %v1074_v32 = vld [vmem:[%s10868_s5 + $0x78] sm:$0xff] }
 0x15c   :  { %v9388_v30 = vadd.f32 %v833_v10, %v831_v3  ;;  %v5758_v48 = vadd.f32 -1.0, %v828_v23  ;;  %v7879_v52 = vpop.eup %7878  ;;  %v832_v60 = vmul.f32 0.0, %v7877_v37  ;;  %v1063_v3 = vld [vmem:[%s10868_s5 + $0x20] sm:$0xff]  ;;  %v9420_v23 = vpack.c.bf16 %v1065_v7, %v1061_v45  ;;  %v1080_v45 = vld [vmem:[%s10868_s5 + $0xa8] sm:$0xff]  ;;  %v1078_v7 = vld [vmem:[%s10868_s5 + $0x98] sm:$0xff] }
 0x15d   :  { %v9418_v10 = vpack.c.bf16 %v1063_v3, %v1059_v22  ;;  %v1067_v37 = vld [vmem:[%s10868_s5 + $0x40] sm:$0xff]  ;;  %v9439_v22 = vpack.c.bf16 %v1072_v36, %v1068_v17  ;;  %v9441_v3 = vpack.c.bf16 %v1074_v32, %v1070_v4 }
 0x15e   :  { %11165 = vst [vmem:[#allocation74_spill] sm:$0xff] %v9388_v30  ;;  %7882 = vtanh.f32 %v9388_v30  ;;  %v834_v6 = vmul.f32 %v7879_v52, %v5758_v48  ;;  %v1071_v48 = vld [vmem:[%s10868_s5 + $0x60] sm:$0xff]  ;;  %v11172_v30 = vmov 0.0  }
 0x15f   :  { %7884 = vrcp.f32 %v810_v35  ;;  %11167 = vst [vmem:[#allocation76_spill] sm:$0xff] %v9418_v10  ;;  %v1069_v35 = vld [vmem:[%s10868_s5 + $0x50] sm:$0xff]  ;;  %11168 = vst [vmem:[#allocation77_spill] sm:$0xff] %v9439_v22  ;;  %v9456_v36 = vpack.c.bf16 %v1071_v48, %v1067_v37  ;;  %v1075_v32 = vld [vmem:[%s10868_s5 + $0x80] sm:$0xff] }
 0x160   :  { %v9391_v53 = vadd.f32 %v834_v6, %v832_v60  ;;  %v1073_v6 = vld [vmem:[%s10868_s5 + $0x70] sm:$0xff]  ;;  %v1076_v60 = vld [vmem:[%s10868_s5 + $0x88] sm:$0xff]  ;;  %11169 = vst [vmem:[#allocation78_spill] sm:$0xff] %v9441_v3 }
 0x161   :  { %11170 = vst [vmem:[#allocation79_spill] sm:$0xff] %v9456_v36  ;;  %v9458_v4 = vpack.c.bf16 %v1073_v6, %v1069_v35  ;;  %v1077_v48 = vld [vmem:[%s10868_s5 + $0x90] sm:$0xff]  ;;  %v1084_v6 = vld [vmem:[%s10868_s5 + $0xc8] sm:$0xff] }
 0x162   :  { %11166 = vst [vmem:[#allocation75_spill] sm:$0xff] %v9391_v53  ;;  %7886 = vtanh.f32 %v9391_v53  ;;  %v1079_v53 = vld [vmem:[%s10868_s5 + $0xa0] sm:$0xff]  ;;  %v1081_v35 = vld [vmem:[%s10868_s5 + $0xb0] sm:$0xff] }
 0x163   :  { %v7881_v33 = vpop.eup %7880  ;;  %11171 = vst [vmem:[#allocation80_spill] sm:$0xff] %v9458_v4 }
 0x168   :  { %v7883_v61 = vpop.eup %7882 }
 0x169   :  { %v9428_v52 = vmul.f32 %v7883_v61, %v7881_v33  ;;  %v1082_v33 = vld [vmem:[%s10868_s5 + $0xb8] sm:$0xff]  ;;  %v7885_v61 = vpop.eup %7884 }
 0x16a   :  { %v9472_v37 = vpack.c.bf16 %v1082_v33, %v1078_v7  ;;  %v1090_v7 = vld [vmem:[%s10868_s5 + $0xf8] sm:$0xff]  ;;  %v9498_v33 = vpack.c.bf16 %v1079_v53, %v1075_v32  ;;  %v1085_v53 = vld [vmem:[%s10868_s5 + $0xd0] sm:$0xff] }
 0x16b   :  { %970 = vmatmul.mubr.f32.vlgmr.msra.gmra.mrb[32].mxu0 %v9428_v52  ;;  %1047 = vmatmul.mubr.f32.vlgmr.msra.gmra.mrb[32].mxu1 %v9428_v52  ;;  %v1089_v32 = vld [vmem:[%s10868_s5 + $0xf0] sm:$0xff] }
 0x16c   :  { %v7887_v17 = vpop.eup %7886  ;;  %6158 = vmatpush1.bf16.msra.mxu0 %v9418_v10  ;;  %6190 = vmatpush1.bf16.msra.mxu1 %v9420_v23  ;;  %v9470_v10 = vpack.c.bf16 %v1080_v45, %v1076_v60  ;;  %11174 = vst [vmem:[#allocation82_spill] sm:$0xff] %v9472_v37  ;;  %v1088_v60 = vld [vmem:[%s10868_s5 + $0xe8] sm:$0xff]  ;;  %v1086_v45 = vld [vmem:[%s10868_s5 + $0xd8] sm:$0xff]  ;;  %11175 = vst [vmem:[#allocation83_spill] sm:$0xff] %v9498_v33 }
 0x16d   :  { %975 = vmatprep.mubr.f32.mxu0 %v11172_v30  ;;  %1052 = vmatprep.mubr.f32.mxu1 %v11172_v30  ;;  %v9468_v9 = vmul.f32 %v7887_v17, %v7885_v61  ;;  %v9500_v61 = vpack.c.bf16 %v1081_v35, %v1077_v48  ;;  %v1083_v17 = vld [vmem:[%s10868_s5 + $0xc0] sm:$0xff]  ;;  %v1092_v48 = vld [vmem:[%s10868_s5 + $0x108] sm:$0xff] }
 0x16e   :  { %11173 = vst [vmem:[#allocation81_spill] sm:$0xff] %v9470_v10  ;;  %6160 = vmatprep.subr.bf16.mxu0 %v9439_v22  ;;  %6192 = vmatprep.subr.bf16.mxu1 %v9441_v3  ;;  %v1087_v3 = vld [vmem:[%s10868_s5 + $0xe0] sm:$0xff]  ;;  %v9510_v22 = vpack.c.bf16 %v1088_v60, %v1084_v6  ;;  %v1096_v35 = vld [vmem:[%s10868_s5 + $0x128] sm:$0xff]  ;;  %v1094_v6 = vld [vmem:[%s10868_s5 + $0x118] sm:$0xff] }
 0x16f   :  { %976 = vmatmul.mubr.f32.gmra.mrb[34].mxu0 %v9468_v9  ;;  %1053 = vmatmul.mubr.f32.gmra.mrb[34].mxu1 %v9468_v9  ;;  %11176 = vst [vmem:[#allocation84_spill] sm:$0xff] %v9500_v61  ;;  %v1098_v60 = vld [vmem:[%s10868_s5 + $0x138] sm:$0xff] }
 0x170   :  { %6162 = vmatpush1.bf16.msra.mxu0 %v9456_v36  ;;  %6194 = vmatpush1.bf16.msra.mxu1 %v9458_v4  ;;  %11177 = vst [vmem:[#allocation85_spill] sm:$0xff] %v9510_v22  ;;  %v9512_v36 = vpack.c.bf16 %v1090_v7, %v1086_v45  ;;  %v9536_v45 = vpack.c.bf16 %v1087_v3, %v1083_v17  ;;  %v1093_v3 = vld [vmem:[%s10868_s5 + $0x110] sm:$0xff] }
 0x171   :  { %6164 = vmatprep.subr.bf16.mxu0 %v9470_v10  ;;  %6196 = vmatprep.subr.bf16.mxu1 %v9472_v37  ;;  %v9538_v7 = vpack.c.bf16 %v1089_v32, %v1085_v53  ;;  %v1091_v37 = vld [vmem:[%s10868_s5 + $0x100] sm:$0xff]  ;;  %v9548_v4 = vpack.c.bf16 %v1096_v35, %v1092_v48  ;;  %v1097_v17 = vld [vmem:[%s10868_s5 + $0x130] sm:$0xff]  ;;  %v1100_v53 = vld [vmem:[%s10868_s5 + $0x148] sm:$0xff] }
 0x172   :  { %11178 = vst [vmem:[#allocation86_spill] sm:$0xff] %v9512_v36  ;;  %1187 = vmatprep.mubr.f32.mxu0 %v11172_v30  ;;  %1264 = vmatprep.mubr.f32.mxu1 %v11172_v30  ;;  %11179 = vst [vmem:[#allocation87_spill] sm:$0xff] %v9536_v45  ;;  %v1095_v10 = vld [vmem:[%s10868_s5 + $0x120] sm:$0xff]  ;;  %v1104_v32 = vld [vmem:[%s10868_s5 + $0x168] sm:$0xff] }
 0x173   :  { %11180 = vst [vmem:[#allocation88_spill] sm:$0xff] %v9538_v7  ;;  %11181 = vst [vmem:[#allocation89_spill] sm:$0xff] %v9548_v4  ;;  %v1102_v48 = vld [vmem:[%s10868_s5 + $0x158] sm:$0xff] }
 0x174   :  { %6166 = vmatpush1.bf16.msra.mxu0 %v9498_v33  ;;  %6198 = vmatpush1.bf16.msra.mxu1 %v9500_v61  ;;  %v9550_v33 = vpack.c.bf16 %v1098_v60, %v1094_v6  ;;  %v1106_v35 = vld [vmem:[%s10868_s5 + $0x178] sm:$0xff]  ;;  %v9572_v6 = vpack.c.bf16 %v1095_v10, %v1091_v37  ;;  %v9574_v60 = vpack.c.bf16 %v1097_v17, %v1093_v3  ;;  %v1101_v10 = vld [vmem:[%s10868_s5 + $0x150] sm:$0xff]  ;;  %v1108_v3 = vld [vmem:[%s10868_s5 + $0x188] sm:$0xff] }
 0x175   :  { %6168 = vmatprep.subr.bf16.mxu0 %v9510_v22  ;;  %6200 = vmatprep.subr.bf16.mxu1 %v9512_v36  ;;  %v1099_v36 = vld [vmem:[%s10868_s5 + $0x140] sm:$0xff]  ;;  %v9584_v61 = vpack.c.bf16 %v1104_v32, %v1100_v53  ;;  %v1105_v37 = vld [vmem:[%s10868_s5 + $0x170] sm:$0xff]  ;;  %v1112_v17 = vld [vmem:[%s10868_s5 + $0x1a8] sm:$0xff] }
 0x176   :  { %11182 = vst [vmem:[#allocation90_spill] sm:$0xff] %v9550_v33  ;;  %11183 = vst [vmem:[#allocation91_spill] sm:$0xff] %v9572_v6  ;;  %v1103_v22 = vld [vmem:[%s10868_s5 + $0x160] sm:$0xff]  ;;  %v1110_v53 = vld [vmem:[%s10868_s5 + $0x198] sm:$0xff] }
 0x177   :  { %11184 = vst [vmem:[#allocation92_spill] sm:$0xff] %v9574_v60  ;;  %11185 = vst [vmem:[#allocation93_spill] sm:$0xff] %v9584_v61  ;;  %v1114_v32 = vld [vmem:[%s10868_s5 + $0x1b8] sm:$0xff] }
 0x178   :  { %6170 = vmatpush1.bf16.msra.mxu0 %v9536_v45  ;;  %6202 = vmatpush1.bf16.msra.mxu1 %v9538_v7  ;;  %v9586_v45 = vpack.c.bf16 %v1106_v35, %v1102_v48  ;;  %v9608_v48 = vpack.c.bf16 %v1103_v22, %v1099_v36  ;;  %v9610_v35 = vpack.c.bf16 %v1105_v37, %v1101_v10  ;;  %v1109_v22 = vld [vmem:[%s10868_s5 + $0x190] sm:$0xff]  ;;  %v1116_v10 = vld [vmem:[%s10868_s5 + $0x1c8] sm:$0xff] }
 0x179   :  { %6172 = vmatprep.subr.bf16.mxu0 %v9548_v4  ;;  %6204 = vmatprep.subr.bf16.mxu1 %v9550_v33  ;;  %v1107_v33 = vld [vmem:[%s10868_s5 + $0x180] sm:$0xff]  ;;  %v9620_v7 = vpack.c.bf16 %v1112_v17, %v1108_v3  ;;  %v1113_v36 = vld [vmem:[%s10868_s5 + $0x1b0] sm:$0xff]  ;;  %v1120_v37 = vld [vmem:[%s10868_s5 + $0x1e8] sm:$0xff] }
 0x17a   :  { %11186 = vst [vmem:[#allocation94_spill] sm:$0xff] %v9586_v45  ;;  %11187 = vst [vmem:[#allocation95_spill] sm:$0xff] %v9610_v35  ;;  %v1111_v4 = vld [vmem:[%s10868_s5 + $0x1a0] sm:$0xff]  ;;  %v1118_v3 = vld [vmem:[%s10868_s5 + $0x1d8] sm:$0xff] }
 0x17b   :  { %v1122_v17 = vld [vmem:[%s10868_s5 + $0x1f8] sm:$0xff] }
 0x17c   :  { %6174 = vmatpush1.bf16.msra.mxu0 %v9572_v6  ;;  %6206 = vmatpush1.bf16.msra.mxu1 %v9574_v60  ;;  %v9622_v6 = vpack.c.bf16 %v1114_v32, %v1110_v53  ;;  %v9644_v53 = vpack.c.bf16 %v1111_v4, %v1107_v33  ;;  %v9646_v32 = vpack.c.bf16 %v1113_v36, %v1109_v22  ;;  %v1117_v4 = vld [vmem:[%s10868_s5 + $0x1d0] sm:$0xff] }
 0x17d   :  { %6176 = vmatprep.subr.bf16.mxu0 %v9584_v61  ;;  %6208 = vmatprep.subr.bf16.mxu1 %v9586_v45  ;;  %v1115_v45 = vld [vmem:[%s10868_s5 + $0x1c0] sm:$0xff]  ;;  %v9653_v61 = vpack.c.bf16 %v1120_v37, %v1116_v10  ;;  %v9655_v60 = vpack.c.bf16 %v1122_v17, %v1118_v3  ;;  %v1121_v33 = vld [vmem:[%s10868_s5 + $0x1f0] sm:$0xff]  ;;  %v11195_v10 = vld [vmem:[#allocation50_spill] sm:$0xff] }
 0x17e   :  { %11188 = vst [vmem:[#allocation96_spill] sm:$0xff] %v9644_v53  ;;  %v9670_v36 = vpack.c.bf16 %v1121_v33, %v1117_v4  ;;  %v11196_v37 = vld [vmem:[#allocation51_spill] sm:$0xff]  ;;  %v11197_v3 = vld [vmem:[#allocation52_spill] sm:$0xff]  ;;  %v11198_v17 = vld [vmem:[#allocation53_spill] sm:$0xff] }
 0x17f   :  { %v11199_v4 = vld [vmem:[#allocation54_spill] sm:$0xff]  ;;  %v11200_v33 = vld [vmem:[#allocation55_spill] sm:$0xff] }
 0x180   :  { %6178 = vmatpush1.bf16.msra.mxu0 %v9608_v48  ;;  %6210 = vmatpush1.bf16.msra.mxu1 %v9610_v35  ;;  %v1119_v35 = vld [vmem:[%s10868_s5 + $0x1e0] sm:$0xff]  ;;  %11190 = vst [vmem:[#allocation98_spill] sm:$0xff] %v9670_v36 }
 0x181   :  { %6180 = vmatprep.subr.bf16.mxu0 %v9620_v7  ;;  %6212 = vmatprep.subr.bf16.mxu1 %v9622_v6  ;;  %v9668_v22 = vpack.c.bf16 %v1119_v35, %v1115_v45  ;;  %v11192_v45 = vld [vmem:[#allocation47_spill] sm:$0xff]  ;;  %v11193_v35 = vld [vmem:[#allocation48_spill] sm:$0xff] }
 0x183   :  { %11189 = vst [vmem:[#allocation97_spill] sm:$0xff] %v9668_v22 }
 0x184   :  { %6182 = vmatpush1.bf16.msra.mxu0 %v9644_v53  ;;  %6214 = vmatpush1.bf16.msra.mxu1 %v9646_v32 }
 0x185   :  { %6184 = vmatprep.subr.bf16.mxu0 %v9653_v61  ;;  %6216 = vmatprep.subr.bf16.mxu1 %v9655_v60 }
 0x188   :  { %6186 = vmatpush1.bf16.msra.mxu0 %v9668_v22  ;;  %6218 = vmatpush1.bf16.msra.mxu1 %v9670_v36 }
 0x189   :  { %6220 = vmatprep.subr.bf16.mxu0 %v8685_v38  ;;  %6252 = vmatprep.subr.bf16.mxu1 %v8687_v39 }
 0x18b   :  { %1188 = vmatmul.mubr.f32.vlgmr.msra.gmra.mrb[32].mxu0 %v11172_v30  ;;  %1265 = vmatmul.mubr.f32.vlgmr.msra.gmra.mrb[32].mxu1 %v11172_v30 }
 0x18c   :  { %6222 = vmatpush1.bf16.msra.mxu0 %v8720_v50  ;;  %6254 = vmatpush1.bf16.msra.mxu1 %v8716_v49 }
 0x18d   :  { %1193 = vmatprep.mubr.f32.mxu0 %v11172_v30  ;;  %1270 = vmatprep.mubr.f32.mxu1 %v11172_v30 }
 0x18e   :  { %6224 = vmatprep.subr.bf16.mxu0 %v8733_v55  ;;  %6256 = vmatprep.subr.bf16.mxu1 %v8722_v51 }
 0x18f   :  { %1194 = vmatmul.mubr.f32.gmra.mrb[34].mxu0 %v11172_v30  ;;  %1271 = vmatmul.mubr.f32.gmra.mrb[34].mxu1 %v11172_v30 }
 0x190   :  { %6226 = vmatpush1.bf16.msra.mxu0 %v8760_v63  ;;  %6258 = vmatpush1.bf16.msra.mxu1 %v8756_v62 }
 0x191   :  { %6228 = vmatprep.subr.bf16.mxu0 %v8774_v5  ;;  %6260 = vmatprep.subr.bf16.mxu1 %v8762_v0 }
 0x192   :  { %1422 = vmatprep.mubr.f32.mxu0 %v11172_v30  ;;  %1499 = vmatprep.mubr.f32.mxu1 %v11172_v30 }
 0x194   :  { %6230 = vmatpush1.bf16.msra.mxu0 %v8801_v13  ;;  %6262 = vmatpush1.bf16.msra.mxu1 %v8797_v12 }
 0x195   :  { %6232 = vmatprep.subr.bf16.mxu0 %v8815_v18  ;;  %6264 = vmatprep.subr.bf16.mxu1 %v8803_v14 }
 0x198   :  { %6234 = vmatpush1.bf16.msra.mxu0 %v8842_v26  ;;  %6266 = vmatpush1.bf16.msra.mxu1 %v8838_v25 }
 0x199   :  { %6236 = vmatprep.subr.bf16.mxu0 %v8856_v31  ;;  %6268 = vmatprep.subr.bf16.mxu1 %v8844_v27 }
 0x19c   :  { %6238 = vmatpush1.bf16.msra.mxu0 %v8883_v41  ;;  %6270 = vmatpush1.bf16.msra.mxu1 %v8879_v40 }
 0x19d   :  { %6240 = vmatprep.subr.bf16.mxu0 %v8897_v46  ;;  %6272 = vmatprep.subr.bf16.mxu1 %v8885_v42 }
 0x1a0   :  { %6242 = vmatpush1.bf16.msra.mxu0 %v8924_v58  ;;  %6274 = vmatpush1.bf16.msra.mxu1 %v8920_v57 }
 0x1a1   :  { %6244 = vmatprep.subr.bf16.mxu0 %v8938_v2  ;;  %6276 = vmatprep.subr.bf16.mxu1 %v8926_v59 }
 0x1a4   :  { %6246 = vmatpush1.bf16.msra.mxu0 %v8965_v15  ;;  %6278 = vmatpush1.bf16.msra.mxu1 %v8961_v11 }
 0x1a5   :  { %6248 = vmatprep.subr.bf16.mxu0 %v8976_v20  ;;  %6280 = vmatprep.subr.bf16.mxu1 %v8967_v16 }
 0x1a8   :  { %6250 = vmatpush1.bf16.msra.mxu0 %v8994_v28  ;;  %6282 = vmatpush1.bf16.msra.mxu1 %v8990_v24 }
 0x1a9   :  { %6284 = vmatprep.subr.bf16.mxu0 %v9058_v47  ;;  %6316 = vmatprep.subr.bf16.mxu1 %v9069_v54 }
 0x1ab   :  { %1423 = vmatmul.mubr.f32.vlgmr.msra.gmra.mrb[4].mxu0 %v9428_v52  ;;  %1500 = vmatmul.mubr.f32.vlgmr.msra.gmra.mrb[4].mxu1 %v9428_v52  ;;  %v11191_v52 = vld [vmem:[#allocation46_spill] sm:$0xff] }
 0x1ac   :  { %1428 = vmatprep.mubr.f32.mxu0 %v11172_v30  ;;  %1505 = vmatprep.mubr.f32.mxu1 %v11172_v30 }
 0x1ad   :  { %6286 = vmatpush1.bf16.msra.mxu0 %v9071_v56  ;;  %6318 = vmatpush1.bf16.msra.mxu1 %v9080_v1 }
 0x1ae   :  { %6288 = vmatprep.subr.bf16.mxu0 %v9094_v8  ;;  %6320 = vmatprep.subr.bf16.mxu1 %v9105_v19 }
 0x1af   :  { %1429 = vmatmul.mubr.f32.gmra.mrb[6].mxu0 %v9468_v9  ;;  %1506 = vmatmul.mubr.f32.gmra.mrb[6].mxu1 %v9468_v9  ;;  %v11194_v9 = vld [vmem:[#allocation49_spill] sm:$0xff] }
 0x1b0   :  { %1646 = vmatprep.mubr.f32.mxu0 %v11172_v30  ;;  %1723 = vmatprep.mubr.f32.mxu1 %v11172_v30 }
 0x1b1   :  { %6290 = vmatpush1.bf16.msra.mxu0 %v9107_v21  ;;  %6322 = vmatpush1.bf16.msra.mxu1 %v9116_v29 }
 0x1b2   :  { %6292 = vmatprep.subr.bf16.mxu0 %v9130_v34  ;;  %6324 = vmatprep.subr.bf16.mxu1 %v9141_v43 }
 0x1b5   :  { %6294 = vmatpush1.bf16.msra.mxu0 %v9143_v44  ;;  %6326 = vmatpush1.bf16.msra.mxu1 %v11191_v52  ;;  %v11201_v44 = vld [vmem:[#allocation56_spill] sm:$0xff]  ;;  %v11202_v52 = vld [vmem:[#allocation57_spill] sm:$0xff] }
 0x1b6   :  { %6296 = vmatprep.subr.bf16.mxu0 %v11192_v45  ;;  %6328 = vmatprep.subr.bf16.mxu1 %v11193_v35  ;;  %v11203_v45 = vld [vmem:[#allocation58_spill] sm:$0xff]  ;;  %v11204_v35 = vld [vmem:[#allocation59_spill] sm:$0xff] }
 0x1b9   :  { %6298 = vmatpush1.bf16.msra.mxu0 %v11194_v9  ;;  %6330 = vmatpush1.bf16.msra.mxu1 %v11195_v10  ;;  %v11205_v9 = vld [vmem:[#allocation60_spill] sm:$0xff]  ;;  %v11206_v10 = vld [vmem:[#allocation61_spill] sm:$0xff] }
 0x1ba   :  { %6300 = vmatprep.subr.bf16.mxu0 %v11196_v37  ;;  %6332 = vmatprep.subr.bf16.mxu1 %v11197_v3  ;;  %v11207_v37 = vld [vmem:[#allocation62_spill] sm:$0xff]  ;;  %v11208_v3 = vld [vmem:[#allocation63_spill] sm:$0xff] }
 0x1bd   :  { %6302 = vmatpush1.bf16.msra.mxu0 %v11198_v17  ;;  %6334 = vmatpush1.bf16.msra.mxu1 %v11199_v4  ;;  %v11209_v17 = vld [vmem:[#allocation64_spill] sm:$0xff]  ;;  %v11210_v4 = vld [vmem:[#allocation65_spill] sm:$0xff] }
 0x1be   :  { %6304 = vmatprep.subr.bf16.mxu0 %v11200_v33  ;;  %6336 = vmatprep.subr.bf16.mxu1 %v11201_v44  ;;  %v11211_v33 = vld [vmem:[#allocation66_spill] sm:$0xff]  ;;  %v11212_v44 = vld [vmem:[#allocation67_spill] sm:$0xff] }
 0x1c1   :  { %6306 = vmatpush1.bf16.msra.mxu0 %v11202_v52  ;;  %6338 = vmatpush1.bf16.msra.mxu1 %v11203_v45  ;;  %v11213_v52 = vld [vmem:[#allocation68_spill] sm:$0xff] }
 0x1c2   :  { %6308 = vmatprep.subr.bf16.mxu0 %v11204_v35  ;;  %6340 = vmatprep.subr.bf16.mxu1 %v11205_v9  ;;  %v9761_v9 = vld [vmem:[%s10870_s6] sm:$0xf] }
 0x1c5   :  { %6310 = vmatpush1.bf16.msra.mxu0 %v11206_v10  ;;  %6342 = vmatpush1.bf16.msra.mxu1 %v11207_v37  ;;  %v11214_v10 = vld [vmem:[#allocation69_spill] sm:$0xff] }
 0x1c6   :  { %6312 = vmatprep.subr.bf16.mxu0 %v11208_v3  ;;  %6344 = vmatprep.subr.bf16.mxu1 %v11209_v17  ;;  %v11215_v35 = vsub.s32 0, %v11214_v10  ;;  %v11217_v17 = vsub.s32 2, %v11214_v10 }
 0x1c8   :  { %v9766_v37 = vrot.slane %v9761_v9, %v11215_v35 }
 0x1c9   :  { %6314 = vmatpush1.bf16.msra.mxu0 %v11210_v4  ;;  %6346 = vmatpush1.bf16.msra.mxu1 %v11211_v33  ;;  %v9771_v4 = vrot.slane %v9761_v9, %v11217_v17  ;;  %v11219_v33 = vsub.s32 1, %v11214_v10 }
 0x1ca   :  { %6348 = vmatprep.subr.bf16.mxu0 %v11212_v44  ;;  %6380 = vmatprep.subr.bf16.mxu1 %v11213_v52  ;;  %11216 = vst [vmem:[#allocation69_spill] sm:$0xff] %v9766_v37 }
 0x1cb   :  { %11218 = vst [vmem:[#allocation99_spill] sm:$0xff] %v9771_v4  ;;  %v9776_v44 = vrot.slane %v9761_v9, %v11219_v33 }
 0x1cd   :  { %11220 = vst [vmem:[#allocation100_spill] sm:$0xff] %v9776_v44 }
 0x25e   :  { %v1189_v52 = vpop.f32.mrb[32].mxu0  ;;  %v1266_v3 = vpop.f32.mrb[32].mxu1 }
 0x25f   :  { %v7659_v45 = vadd.f32 %v1189_v52, %v9766_v37  ;;  %v7663_v43 = vadd.f32 %v1266_v3, %v9771_v4  ;;  %v1191_v34 = vpop.f32.mrb[33].mxu0  ;;  %v9780_v29 = vpop.f32.mrb[33].mxu1 }
 0x260   :  { %v7660_v35 = vadd.f32 %v1191_v34, %v9776_v44 }
 0x261   :  { %v5759_v21 = vmul.f32 -1.442695, %v7659_v45  ;;  %v5761_v19 = vmul.f32 -1.442695, %v7663_v43 }
 0x262   :  { %v5760_v17 = vmul.f32 -1.442695, %v7660_v35  ;;  %v1195_v8 = vpop.f32.mrb[34].mxu0  ;;  %v1272_v1 = vpop.f32.mrb[34].mxu1 }
 0x263   :  { %7888 = vpow2.f32 %v5759_v21  ;;  %v7661_v33 = vadd.f32 %v1195_v8, %v9766_v37  ;;  %v7665_v56 = vadd.f32 %v1272_v1, %v9771_v4  ;;  %v1197_v54 = vpop.f32.mrb[35].mxu0  ;;  %v9785_v47 = vpop.f32.mrb[35].mxu1 }
 0x264   :  { %7890 = vpow2.f32 %v5761_v19  ;;  %v7662_v52 = vadd.f32 %v1197_v54, %v9776_v44  ;;  %v11222_v44 = vld [vmem:[#allocation71_spill] sm:$0xff] }
 0x265   :  { %7892 = vpow2.f32 %v5760_v17  ;;  %v5763_v3 = vmul.f32 -1.442695, %v7661_v33  ;;  %v5765_v24 = vmul.f32 -1.442695, %v7665_v56 }
 0x266   :  { %v5764_v34 = vmul.f32 -1.442695, %v7662_v52 }
 0x267   :  { %7894 = vpow2.f32 %v5763_v3 }
 0x268   :  { %7896 = vpow2.f32 %v5765_v24 }
 0x269   :  { %7898 = vpow2.f32 %v5764_v34 }
 0x26d   :  { %v7889_v43 = vpop.eup %7888 }
 0x26e   :  { %v7891_v45 = vpop.eup %7890  ;;  %v1309_v8 = vadd.f32 1.0, %v7889_v43 }
 0x26f   :  { %v7893_v21 = vpop.eup %7892  ;;  %v1311_v35 = vadd.f32 1.0, %v7891_v45 }
 0x270   :  { %v1310_v37 = vadd.f32 1.0, %v7893_v21  ;;  %v11221_v21 = vld [vmem:[#allocation70_spill] sm:$0xff] }
 0x271   :  { %v7895_v1 = vpop.eup %7894  ;;  %7900 = vrcp.f32 %v1311_v35 }
 0x272   :  { %v7897_v4 = vpop.eup %7896  ;;  %7902 = vrcp.f32 %v1310_v37  ;;  %v1313_v17 = vadd.f32 1.0, %v7895_v1 }
 0x273   :  { %v7899_v28 = vpop.eup %7898  ;;  %v1315_v19 = vadd.f32 1.0, %v7897_v4  ;;  %7904 = vrcp.f32 %v1309_v8 }
 0x274   :  { %v1314_v54 = vadd.f32 1.0, %v7899_v28 }
 0x275   :  { %7906 = vrcp.f32 %v1315_v19 }
 0x276   :  { %7908 = vrcp.f32 %v1314_v54  ;;  %v11223_v54 = vld [vmem:[#allocation72_spill] sm:$0xff] }
 0x277   :  { %7910 = vrcp.f32 %v1313_v17 }
 0x27b   :  { %v7901_v24 = vpop.eup %7900 }
 0x27c   :  { %v1333_v56 = vmul.f32 2.0, %v7901_v24  ;;  %v7903_v33 = vpop.eup %7902 }
 0x27d   :  { %v7905_v52 = vpop.eup %7904  ;;  %v1337_v1 = vmul.f32 0.0, %v7903_v33 }
 0x27e   :  { %v5767_v3 = vadd.f32 -1.0, %v1333_v56  ;;  %v1424_v34 = vpop.f32.mrb[4].mxu0  ;;  %v1501_v43 = vpop.f32.mrb[4].mxu1 }
 0x27f   :  { %v7907_v45 = vpop.eup %7906  ;;  %v7599_v35 = vadd.f32 %v1424_v34, %v11221_v21  ;;  %v7631_v16 = vadd.f32 %v1501_v43, %v11222_v44  ;;  %v1426_v37 = vpop.f32.mrb[5].mxu0 }
 0x280   :  { %v1503_v4 = vpop.f32.mrb[5].mxu1  ;;  %v7909_v8 = vpop.eup %7908  ;;  %v1339_v28 = vmul.f32 %v7905_v52, %v5767_v3  ;;  %v1334_v19 = vmul.f32 2.0, %v7907_v45  ;;  %v7600_v17 = vadd.f32 %v1426_v37, %v11223_v54 }
 0x281   :  { %v5769_v20 = vmul.f32 -1.442695, %v7599_v35  ;;  %v5771_v24 = vmul.f32 -1.442695, %v7631_v16  ;;  %v7911_v2 = vpop.eup %7910  ;;  %v1338_v57 = vmul.f32 0.0, %v7909_v8  ;;  %v11224_v8 = vld [vmem:[#allocation73_spill] sm:$0xff] }
 0x282   :  { %v9791_v11 = vadd.f32 %v1339_v28, %v1337_v1  ;;  %v5768_v56 = vadd.f32 -1.0, %v1334_v19  ;;  %v5770_v15 = vmul.f32 -1.442695, %v7600_v17  ;;  %v1430_v59 = vpop.f32.mrb[6].mxu0  ;;  %v1507_v43 = vpop.f32.mrb[6].mxu1 }
 0x283   :  { %v7601_v34 = vadd.f32 %v1430_v59, %v11221_v21  ;;  %v1432_v58 = vpop.f32.mrb[7].mxu0  ;;  %7912 = vpow2.f32 %v5769_v20  ;;  %v7633_v33 = vadd.f32 %v1507_v43, %v11222_v44  ;;  %v1509_v3 = vpop.f32.mrb[7].mxu1  ;;  %v7632_v59 = vadd.f32 %v1503_v4, %v11224_v8 }
 0x284   :  { %v1340_v42 = vmul.f32 %v7911_v2, %v5768_v56  ;;  %v7602_v52 = vadd.f32 %v1432_v58, %v11223_v54  ;;  %7914 = vpow2.f32 %v5771_v24  ;;  %v7634_v58 = vadd.f32 %v1509_v3, %v11224_v8 }
 0x285   :  { %v5773_v16 = vmul.f32 -1.442695, %v7601_v34  ;;  %7916 = vpow2.f32 %v5770_v15  ;;  %v5775_v35 = vmul.f32 -1.442695, %v7633_v33  ;;  %v5772_v20 = vmul.f32 -1.442695, %v7632_v59 }
 0x286   :  { %v9796_v45 = vadd.f32 %v1340_v42, %v1338_v57  ;;  %v5774_v37 = vmul.f32 -1.442695, %v7602_v52  ;;  %v5776_v15 = vmul.f32 -1.442695, %v7634_v58 }
 0x287   :  { %7918 = vpow2.f32 %v5773_v16 }
 0x288   :  { %7920 = vpow2.f32 %v5775_v35 }
 0x289   :  { %7922 = vpow2.f32 %v5774_v37 }
 0x28d   :  { %v7913_v28 = vpop.eup %7912 }
 0x28e   :  { %v7915_v2 = vpop.eup %7914  ;;  %v1544_v24 = vadd.f32 1.0, %v7913_v28 }
 0x28f   :  { %v7917_v1 = vpop.eup %7916  ;;  %v1546_v19 = vadd.f32 1.0, %v7915_v2 }
 0x290   :  { %v1545_v17 = vadd.f32 1.0, %v7917_v1 }
 0x291   :  { %7924 = vrcp.f32 %v1546_v19  ;;  %v7919_v42 = vpop.eup %7918 }
 0x292   :  { %7926 = vpow2.f32 %v5772_v20  ;;  %v7921_v57 = vpop.eup %7920  ;;  %v1548_v43 = vadd.f32 1.0, %v7919_v42  ;;  %v11225_v20 = vld [vmem:[#allocation74_spill] sm:$0xff] }
 0x293   :  { %7928 = vrcp.f32 %v1545_v17  ;;  %v7923_v56 = vpop.eup %7922  ;;  %v1550_v34 = vadd.f32 1.0, %v7921_v57 }
 0x294   :  { %7930 = vrcp.f32 %v1544_v24  ;;  %v1549_v4 = vadd.f32 1.0, %v7923_v56 }
 0x295   :  { %7932 = vrcp.f32 %v1550_v34  ;;  %v11226_v34 = vld [vmem:[#allocation75_spill] sm:$0xff] }
 0x296   :  { %7934 = vpow2.f32 %v5776_v15 }
 0x297   :  { %7936 = vrcp.f32 %v1549_v4 }
 0x298   :  { %7938 = vrcp.f32 %v1548_v43 }
 0x29b   :  { %v7925_v33 = vpop.eup %7924 }
 0x29c   :  { %v7927_v52 = vpop.eup %7926  ;;  %v1568_v3 = vmul.f32 2.0, %v7925_v33  ;;  %v11227_v33 = vsub.s32 3, %v11214_v10  ;;  %v11228_v10 = vld [vmem:[#allocation76_spill] sm:$0xff] }
 0x29d   :  { %v7929_v16 = vpop.eup %7928  ;;  %v1547_v59 = vadd.f32 1.0, %v7927_v52 }
 0x29e   :  { %v5777_v35 = vadd.f32 -1.0, %v1568_v3  ;;  %v7931_v37 = vpop.eup %7930  ;;  %v1572_v1 = vmul.f32 %v7929_v16, %v11225_v20  ;;  %v9810_v52 = vrot.slane %v9761_v9, %v11227_v33  ;;  %v11229_v20 = vld [vmem:[#allocation77_spill] sm:$0xff]  ;;  %v11239_v33 = vld [vmem:[#allocation87_spill] sm:$0xff] }
 0x29f   :  { %v7933_v28 = vpop.eup %7932  ;;  %7940 = vrcp.f32 %v1547_v59 }
 0x2a0   :  { %v1574_v2 = vmul.f32 %v7931_v37, %v5777_v35  ;;  %v7935_v19 = vpop.eup %7934  ;;  %v1569_v58 = vmul.f32 2.0, %v7933_v28  ;;  %v7664_v3 = vadd.f32 %v9780_v29, %v9810_v52  ;;  %v7666_v28 = vadd.f32 %v9785_v47, %v9810_v52 }
 0x2a1   :  { %v7937_v17 = vpop.eup %7936  ;;  %v1551_v15 = vadd.f32 1.0, %v7935_v19  ;;  %v11231_v19 = vld [vmem:[#allocation79_spill] sm:$0xff] }
 0x2a2   :  { %v9801_v24 = vadd.f32 %v1574_v2, %v1572_v1  ;;  %v5778_v42 = vadd.f32 -1.0, %v1569_v58  ;;  %v7939_v57 = vpop.eup %7938  ;;  %v1573_v4 = vmul.f32 %v7937_v17, %v11226_v34  ;;  %v5762_v59 = vmul.f32 -1.442695, %v7664_v3  ;;  %v11230_v1 = vld [vmem:[#allocation78_spill] sm:$0xff]  ;;  %v11232_v58 = vld [vmem:[#allocation80_spill] sm:$0xff]  ;;  %v11233_v17 = vld [vmem:[#allocation81_spill] sm:$0xff] }
 0x2a3   :  { %v5766_v29 = vmul.f32 -1.442695, %v7666_v28  ;;  %v11238_v34 = vld [vmem:[#allocation86_spill] sm:$0xff]  ;;  %v11240_v3 = vld [vmem:[#allocation88_spill] sm:$0xff] }
 0x2a4   :  { %7942 = vtanh.f32 %v9801_v24  ;;  %v1575_v56 = vmul.f32 %v7939_v57, %v5778_v42  ;;  %v11234_v42 = vld [vmem:[#allocation82_spill] sm:$0xff]  ;;  %v11235_v57 = vld [vmem:[#allocation83_spill] sm:$0xff] }
 0x2a5   :  { %7944 = vrcp.f32 %v1551_v15  ;;  %v11236_v15 = vld [vmem:[#allocation84_spill] sm:$0xff] }
 0x2a6   :  { %v9805_v43 = vadd.f32 %v1575_v56, %v1573_v4  ;;  %v11237_v56 = vld [vmem:[#allocation85_spill] sm:$0xff] }
 0x2a8   :  { %7946 = vtanh.f32 %v9805_v43 }
 0x2a9   :  { %v7941_v16 = vpop.eup %7940  ;;  %7948 = vpow2.f32 %v5762_v59 }
 0x2aa   :  { %7950 = vpow2.f32 %v5766_v29  ;;  %v11245_v29 = vld [vmem:[#allocation93_spill] sm:$0xff] }
 0x2ab   :  { %7952 = vtanh.f32 %v9791_v11 }
 0x2ae   :  { %v7943_v35 = vpop.eup %7942 }
 0x2af   :  { %v9815_v37 = vmul.f32 %v7943_v35, %v7941_v16  ;;  %v7945_v9 = vpop.eup %7944  ;;  %v11241_v16 = vld [vmem:[#allocation89_spill] sm:$0xff]  ;;  %v11242_v35 = vld [vmem:[#allocation90_spill] sm:$0xff] }
 0x2b1   :  { %1647 = vmatmul.mubr.f32.vlgmr.msra.gmra.mrb[36].mxu0 %v9815_v37  ;;  %1724 = vmatmul.mubr.f32.vlgmr.msra.gmra.mrb[36].mxu1 %v9815_v37 }
 0x2b2   :  { %6350 = vmatpush1.bf16.msra.mxu0 %v11228_v10  ;;  %6382 = vmatpush1.bf16.msra.mxu1 %v9420_v23  ;;  %v7947_v2 = vpop.eup %7946 }
 0x2b3   :  { %1652 = vmatprep.mubr.f32.mxu0 %v11172_v30  ;;  %1729 = vmatprep.mubr.f32.mxu1 %v11172_v30  ;;  %v9827_v47 = vmul.f32 %v7947_v2, %v7945_v9  ;;  %v7949_v4 = vpop.eup %7948  ;;  %v11243_v9 = vld [vmem:[#allocation91_spill] sm:$0xff]  ;;  %v11244_v2 = vld [vmem:[#allocation92_spill] sm:$0xff] }
 0x2b4   :  { %6352 = vmatprep.subr.bf16.mxu0 %v11229_v20  ;;  %6384 = vmatprep.subr.bf16.mxu1 %v11230_v1  ;;  %v1312_v59 = vadd.f32 1.0, %v7949_v4  ;;  %v7951_v28 = vpop.eup %7950 }
 0x2b5   :  { %1653 = vmatmul.mubr.f32.gmra.mrb[38].mxu0 %v9827_v47  ;;  %1730 = vmatmul.mubr.f32.gmra.mrb[38].mxu1 %v9827_v47  ;;  %v7953_v4 = vpop.eup %7952 }
 0x2b6   :  { %6354 = vmatpush1.bf16.msra.mxu0 %v11231_v19  ;;  %6386 = vmatpush1.bf16.msra.mxu1 %v11232_v58  ;;  %7954 = vrcp.f32 %v1312_v59 }
 0x2b7   :  { %6356 = vmatprep.subr.bf16.mxu0 %v11233_v17  ;;  %6388 = vmatprep.subr.bf16.mxu1 %v11234_v42  ;;  %7956 = vtanh.f32 %v9796_v45 }
 0x2b8   :  { %1800 = vmatprep.mubr.f32.mxu0 %v11172_v30  ;;  %1877 = vmatprep.mubr.f32.mxu1 %v11172_v30 }
 0x2ba   :  { %6358 = vmatpush1.bf16.msra.mxu0 %v11235_v57  ;;  %6390 = vmatpush1.bf16.msra.mxu1 %v11236_v15 }
 0x2bb   :  { %6360 = vmatprep.subr.bf16.mxu0 %v11237_v56  ;;  %6392 = vmatprep.subr.bf16.mxu1 %v11238_v34  ;;  %v11246_v34 = vld [vmem:[#allocation94_spill] sm:$0xff] }
 0x2be   :  { %6362 = vmatpush1.bf16.msra.mxu0 %v11239_v33  ;;  %6394 = vmatpush1.bf16.msra.mxu1 %v11240_v3  ;;  %v1316_v33 = vadd.f32 1.0, %v7951_v28 }
 0x2bf   :  { %6364 = vmatprep.subr.bf16.mxu0 %v11241_v16  ;;  %6396 = vmatprep.subr.bf16.mxu1 %v11242_v35  ;;  %v11247_v16 = vld [vmem:[#allocation95_spill] sm:$0xff] }
 0x2c0   :  { %7958 = vrcp.f32 %v1316_v33  ;;  %v7955_v59 = vpop.eup %7954 }
 0x2c1   :  { %v1345_v28 = vmul.f32 %v7955_v59, %v7953_v4  ;;  %v7957_v33 = vpop.eup %7956  ;;  %v11250_v4 = vld [vmem:[#allocation25_spill] sm:$0xff]  ;;  %v11251_v59 = vld [vmem:[#allocation28_spill] sm:$0xff] }
 0x2c2   :  { %6366 = vmatpush1.bf16.msra.mxu0 %v11243_v9  ;;  %6398 = vmatpush1.bf16.msra.mxu1 %v11244_v2 }
 0x2c3   :  { %6368 = vmatprep.subr.bf16.mxu0 %v11245_v29  ;;  %6400 = vmatprep.subr.bf16.mxu1 %v11246_v34 }
 0x2c6   :  { %6370 = vmatpush1.bf16.msra.mxu0 %v9608_v48  ;;  %6402 = vmatpush1.bf16.msra.mxu1 %v11247_v16 }
 0x2c7   :  { %6372 = vmatprep.subr.bf16.mxu0 %v9620_v7  ;;  %6404 = vmatprep.subr.bf16.mxu1 %v9622_v6 }
 0x2ca   :  { %6374 = vmatpush1.bf16.msra.mxu0 %v9644_v53  ;;  %6406 = vmatpush1.bf16.msra.mxu1 %v9646_v32  ;;  %v7959_v53 = vpop.eup %7958 }
 0x2cb   :  { %6376 = vmatprep.subr.bf16.mxu0 %v9653_v61  ;;  %6408 = vmatprep.subr.bf16.mxu1 %v9655_v60 }
 0x2ce   :  { %6378 = vmatpush1.bf16.msra.mxu0 %v9668_v22  ;;  %6410 = vmatpush1.bf16.msra.mxu1 %v9670_v36  ;;  %v1346_v22 = vmul.f32 %v7959_v53, %v7957_v33  ;;  %v11248_v53 = vld [vmem:[#allocation23_spill] sm:$0xff]  ;;  %v11253_v33 = vld [vmem:[#allocation30_spill] sm:$0xff] }
 0x2cf   :  { %6412 = vmatprep.subr.bf16.mxu0 %v8685_v38  ;;  %6444 = vmatprep.subr.bf16.mxu1 %v8687_v39 }
 0x2d1   :  { %1801 = vmatmul.mubr.f32.vlgmr.msra.gmra.mrb[36].mxu0 %v1345_v28  ;;  %1878 = vmatmul.mubr.f32.vlgmr.msra.gmra.mrb[36].mxu1 %v1345_v28  ;;  %v11252_v28 = vld [vmem:[#allocation27_spill] sm:$0xff] }
 0x2d2   :  { %6414 = vmatpush1.bf16.msra.mxu0 %v8720_v50  ;;  %6446 = vmatpush1.bf16.msra.mxu1 %v8716_v49 }
 0x2d3   :  { %1806 = vmatprep.mubr.f32.mxu0 %v11172_v30  ;;  %1883 = vmatprep.mubr.f32.mxu1 %v11172_v30 }
 0x2d4   :  { %6416 = vmatprep.subr.bf16.mxu0 %v8733_v55  ;;  %6448 = vmatprep.subr.bf16.mxu1 %v8722_v51 }
 0x2d5   :  { %1807 = vmatmul.mubr.f32.gmra.mrb[38].mxu0 %v1346_v22  ;;  %1884 = vmatmul.mubr.f32.gmra.mrb[38].mxu1 %v1346_v22  ;;  %v11249_v22 = vld [vmem:[#allocation26_spill] sm:$0xff] }
 0x2d6   :  { %6418 = vmatpush1.bf16.msra.mxu0 %v8760_v63  ;;  %6450 = vmatpush1.bf16.msra.mxu1 %v8756_v62 }
 0x2d7   :  { %6420 = vmatprep.subr.bf16.mxu0 %v8774_v5  ;;  %6452 = vmatprep.subr.bf16.mxu1 %v8762_v0 }
 0x2d8   :  { %2035 = vmatprep.mubr.f32.mxu0 %v11172_v30  ;;  %2112 = vmatprep.mubr.f32.mxu1 %v11172_v30 }
 0x2da   :  { %6422 = vmatpush1.bf16.msra.mxu0 %v8801_v13  ;;  %6454 = vmatpush1.bf16.msra.mxu1 %v8797_v12 }
 0x2db   :  { %6424 = vmatprep.subr.bf16.mxu0 %v8815_v18  ;;  %6456 = vmatprep.subr.bf16.mxu1 %v8803_v14 }
 0x2de   :  { %6426 = vmatpush1.bf16.msra.mxu0 %v8842_v26  ;;  %6458 = vmatpush1.bf16.msra.mxu1 %v8838_v25 }
 0x2df   :  { %6428 = vmatprep.subr.bf16.mxu0 %v8856_v31  ;;  %6460 = vmatprep.subr.bf16.mxu1 %v8844_v27  ;;  %v11254_v31 = vld [vmem:[#allocation29_spill] sm:$0xff]  ;;  %v11255_v27 = vld [vmem:[#allocation32_spill] sm:$0xff] }
 0x2e2   :  { %6430 = vmatpush1.bf16.msra.mxu0 %v8883_v41  ;;  %6462 = vmatpush1.bf16.msra.mxu1 %v8879_v40  ;;  %v11256_v41 = vld [vmem:[#allocation31_spill] sm:$0xff]  ;;  %v11257_v40 = vld [vmem:[#allocation34_spill] sm:$0xff] }
 0x2e3   :  { %6432 = vmatprep.subr.bf16.mxu0 %v8897_v46  ;;  %6464 = vmatprep.subr.bf16.mxu1 %v11248_v53  ;;  %v11258_v46 = vld [vmem:[#allocation33_spill] sm:$0xff]  ;;  %v11259_v53 = vld [vmem:[#allocation35_spill] sm:$0xff] }
 0x2e6   :  { %6434 = vmatpush1.bf16.msra.mxu0 %v11249_v22  ;;  %6466 = vmatpush1.bf16.msra.mxu1 %v11250_v4  ;;  %v11260_v22 = vld [vmem:[#allocation36_spill] sm:$0xff]  ;;  %v11294_v4 = vld [vmem:[#allocation99_spill] sm:$0xff] }
 0x2e7   :  { %6436 = vmatprep.subr.bf16.mxu0 %v11251_v59  ;;  %6468 = vmatprep.subr.bf16.mxu1 %v11252_v28  ;;  %v11275_v28 = vld [vmem:[#allocation51_spill] sm:$0xff]  ;;  %v11293_v59 = vld [vmem:[#allocation69_spill] sm:$0xff] }
 0x2ea   :  { %6438 = vmatpush1.bf16.msra.mxu0 %v11253_v33  ;;  %6470 = vmatpush1.bf16.msra.mxu1 %v11254_v31  ;;  %v11261_v31 = vld [vmem:[#allocation37_spill] sm:$0xff]  ;;  %v11274_v33 = vld [vmem:[#allocation50_spill] sm:$0xff] }
 0x2eb   :  { %6440 = vmatprep.subr.bf16.mxu0 %v11255_v27  ;;  %6472 = vmatprep.subr.bf16.mxu1 %v11256_v41  ;;  %v11262_v27 = vld [vmem:[#allocation38_spill] sm:$0xff]  ;;  %v11263_v41 = vld [vmem:[#allocation39_spill] sm:$0xff] }
 0x2ee   :  { %6442 = vmatpush1.bf16.msra.mxu0 %v11257_v40  ;;  %6474 = vmatpush1.bf16.msra.mxu1 %v11258_v46  ;;  %v11264_v40 = vld [vmem:[#allocation40_spill] sm:$0xff] }
 0x2ef   :  { %6476 = vmatprep.subr.bf16.mxu0 %v11259_v53  ;;  %6508 = vmatprep.subr.bf16.mxu1 %v11260_v22  ;;  %v11266_v22 = vld [vmem:[#allocation42_spill] sm:$0xff]  ;;  %v11267_v53 = vld [vmem:[#allocation43_spill] sm:$0xff]  ;;  %v11272_v46 = vld [vmem:[#allocation48_spill] sm:$0xff] }
 0x2f1   :  { %2036 = vmatmul.mubr.f32.vlgmr.msra.gmra.mrb[8].mxu0 %v9815_v37  ;;  %2113 = vmatmul.mubr.f32.vlgmr.msra.gmra.mrb[8].mxu1 %v9815_v37  ;;  %v11265_v37 = vld [vmem:[#allocation41_spill] sm:$0xff] }
 0x2f2   :  { %2041 = vmatprep.mubr.f32.mxu0 %v11172_v30  ;;  %2118 = vmatprep.mubr.f32.mxu1 %v11172_v30 }
 0x2f3   :  { %6478 = vmatpush1.bf16.msra.mxu0 %v11261_v31  ;;  %6510 = vmatpush1.bf16.msra.mxu1 %v11262_v27  ;;  %v11268_v31 = vld [vmem:[#allocation44_spill] sm:$0xff]  ;;  %v11269_v27 = vld [vmem:[#allocation45_spill] sm:$0xff] }
 0x2f4   :  { %6480 = vmatprep.subr.bf16.mxu0 %v11263_v41  ;;  %6512 = vmatprep.subr.bf16.mxu1 %v11264_v40  ;;  %v11270_v41 = vld [vmem:[#allocation46_spill] sm:$0xff]  ;;  %v11271_v40 = vld [vmem:[#allocation47_spill] sm:$0xff] }
 0x2f5   :  { %2042 = vmatmul.mubr.f32.gmra.mrb[10].mxu0 %v9827_v47  ;;  %2119 = vmatmul.mubr.f32.gmra.mrb[10].mxu1 %v9827_v47  ;;  %v11273_v47 = vld [vmem:[#allocation49_spill] sm:$0xff] }
 0x2f6   :  { %2259 = vmatprep.mubr.f32.mxu0 %v11172_v30  ;;  %2336 = vmatprep.mubr.f32.mxu1 %v11172_v30 }
 0x2f7   :  { %6482 = vmatpush1.bf16.msra.mxu0 %v11265_v37  ;;  %6514 = vmatpush1.bf16.msra.mxu1 %v11266_v22  ;;  %v11276_v37 = vld [vmem:[#allocation52_spill] sm:$0xff]  ;;  %v11277_v22 = vld [vmem:[#allocation53_spill] sm:$0xff] }
 0x2f8   :  { %6484 = vmatprep.subr.bf16.mxu0 %v11267_v53  ;;  %6516 = vmatprep.subr.bf16.mxu1 %v11268_v31  ;;  %v11278_v53 = vld [vmem:[#allocation54_spill] sm:$0xff]  ;;  %v11279_v31 = vld [vmem:[#allocation55_spill] sm:$0xff] }
 0x2fb   :  { %6486 = vmatpush1.bf16.msra.mxu0 %v11269_v27  ;;  %6518 = vmatpush1.bf16.msra.mxu1 %v11270_v41  ;;  %v11280_v27 = vld [vmem:[#allocation56_spill] sm:$0xff]  ;;  %v11281_v41 = vld [vmem:[#allocation57_spill] sm:$0xff] }
 0x2fc   :  { %6488 = vmatprep.subr.bf16.mxu0 %v11271_v40  ;;  %6520 = vmatprep.subr.bf16.mxu1 %v11272_v46  ;;  %v11282_v40 = vld [vmem:[#allocation58_spill] sm:$0xff]  ;;  %v11283_v46 = vld [vmem:[#allocation59_spill] sm:$0xff] }
 0x2ff   :  { %6490 = vmatpush1.bf16.msra.mxu0 %v11273_v47  ;;  %6522 = vmatpush1.bf16.msra.mxu1 %v11274_v33  ;;  %v11284_v47 = vld [vmem:[#allocation60_spill] sm:$0xff]  ;;  %v11285_v33 = vld [vmem:[#allocation61_spill] sm:$0xff] }
 0x300   :  { %6492 = vmatprep.subr.bf16.mxu0 %v11275_v28  ;;  %6524 = vmatprep.subr.bf16.mxu1 %v11276_v37  ;;  %v11286_v28 = vld [vmem:[#allocation62_spill] sm:$0xff]  ;;  %v11287_v37 = vld [vmem:[#allocation63_spill] sm:$0xff] }
 0x303   :  { %6494 = vmatpush1.bf16.msra.mxu0 %v11277_v22  ;;  %6526 = vmatpush1.bf16.msra.mxu1 %v11278_v53  ;;  %v11288_v22 = vld [vmem:[#allocation64_spill] sm:$0xff]  ;;  %v11289_v53 = vld [vmem:[#allocation65_spill] sm:$0xff] }
 0x304   :  { %6496 = vmatprep.subr.bf16.mxu0 %v11279_v31  ;;  %6528 = vmatprep.subr.bf16.mxu1 %v11280_v27  ;;  %v11290_v31 = vld [vmem:[#allocation66_spill] sm:$0xff]  ;;  %v11291_v27 = vld [vmem:[#allocation67_spill] sm:$0xff] }
 0x307   :  { %6498 = vmatpush1.bf16.msra.mxu0 %v11281_v41  ;;  %6530 = vmatpush1.bf16.msra.mxu1 %v11282_v40  ;;  %v11292_v41 = vld [vmem:[#allocation68_spill] sm:$0xff] }
 0x308   :  { %6500 = vmatprep.subr.bf16.mxu0 %v11283_v46  ;;  %6532 = vmatprep.subr.bf16.mxu1 %v11284_v47 }
 0x30b   :  { %6502 = vmatpush1.bf16.msra.mxu0 %v11285_v33  ;;  %6534 = vmatpush1.bf16.msra.mxu1 %v11286_v28 }
 0x30c   :  { %6504 = vmatprep.subr.bf16.mxu0 %v11287_v37  ;;  %6536 = vmatprep.subr.bf16.mxu1 %v11288_v22  ;;  %v11295_v37 = vld [vmem:[#allocation100_spill] sm:$0xff] }
 0x30f   :  { %6506 = vmatpush1.bf16.msra.mxu0 %v11289_v53  ;;  %6538 = vmatpush1.bf16.msra.mxu1 %v11290_v31 }
 0x310   :  { %6540 = vmatprep.subr.bf16.mxu0 %v11291_v27  ;;  %6572 = vmatprep.subr.bf16.mxu1 %v11292_v41 }
 0x3a4   :  { %v1802_v40 = vpop.f32.mrb[36].mxu0  ;;  %v1879_v46 = vpop.f32.mrb[36].mxu1 }
 0x3a5   :  { %v7667_v47 = vadd.f32 %v1802_v40, %v11293_v59  ;;  %v7671_v33 = vadd.f32 %v1879_v46, %v11294_v4  ;;  %v1804_v25 = vpop.f32.mrb[37].mxu0  ;;  %v9941_v28 = vpop.f32.mrb[37].mxu1 }
 0x3a6   :  { %v7668_v26 = vadd.f32 %v1804_v25, %v11295_v37 }
 0x3a7   :  { %v5779_v22 = vmul.f32 -1.442695, %v7667_v47  ;;  %v5781_v14 = vmul.f32 -1.442695, %v7671_v33 }
 0x3a8   :  { %v5780_v53 = vmul.f32 -1.442695, %v7668_v26  ;;  %v1808_v18 = vpop.f32.mrb[38].mxu0  ;;  %v1885_v31 = vpop.f32.mrb[38].mxu1 }
 0x3a9   :  { %7960 = vpow2.f32 %v5779_v22  ;;  %v7669_v27 = vadd.f32 %v1808_v18, %v11293_v59  ;;  %v7673_v41 = vadd.f32 %v1885_v31, %v11294_v4  ;;  %v1810_v12 = vpop.f32.mrb[39].mxu0  ;;  %v9946_v13 = vpop.f32.mrb[39].mxu1 }
 0x3aa   :  { %7962 = vpow2.f32 %v5781_v14  ;;  %v7670_v40 = vadd.f32 %v1810_v12, %v11295_v37 }
 0x3ab   :  { %7964 = vpow2.f32 %v5780_v53  ;;  %v5783_v46 = vmul.f32 -1.442695, %v7669_v27  ;;  %v5785_v0 = vmul.f32 -1.442695, %v7673_v41 }
 0x3ac   :  { %v5784_v25 = vmul.f32 -1.442695, %v7670_v40 }
 0x3ad   :  { %7966 = vpow2.f32 %v5783_v46 }
 0x3ae   :  { %7968 = vpow2.f32 %v5785_v0 }
 0x3af   :  { %7970 = vpow2.f32 %v5784_v25 }
 0x3b3   :  { %v7961_v26 = vpop.eup %7960 }
 0x3b4   :  { %v7963_v33 = vpop.eup %7962  ;;  %v1922_v18 = vadd.f32 1.0, %v7961_v26 }
 0x3b5   :  { %v7965_v22 = vpop.eup %7964  ;;  %v1924_v47 = vadd.f32 1.0, %v7963_v33 }
 0x3b6   :  { %v1923_v59 = vadd.f32 1.0, %v7965_v22 }
 0x3b7   :  { %v7967_v31 = vpop.eup %7966  ;;  %7972 = vrcp.f32 %v1924_v47 }
 0x3b8   :  { %v7969_v4 = vpop.eup %7968  ;;  %7974 = vrcp.f32 %v1923_v59  ;;  %v1926_v27 = vadd.f32 1.0, %v7967_v31 }
 0x3b9   :  { %v7971_v5 = vpop.eup %7970  ;;  %v1928_v14 = vadd.f32 1.0, %v7969_v4  ;;  %7976 = vrcp.f32 %v1922_v18 }
 0x3ba   :  { %v1927_v12 = vadd.f32 1.0, %v7971_v5 }
 0x3bb   :  { %7978 = vrcp.f32 %v1928_v14 }
 0x3bc   :  { %7980 = vrcp.f32 %v1927_v12 }
 0x3bd   :  { %7982 = vrcp.f32 %v1926_v27 }
 0x3c1   :  { %v7973_v0 = vpop.eup %7972 }
 0x3c2   :  { %v1946_v41 = vmul.f32 2.0, %v7973_v0  ;;  %v7975_v53 = vpop.eup %7974 }
 0x3c3   :  { %v7977_v40 = vpop.eup %7976  ;;  %v1950_v31 = vmul.f32 %v7975_v53, %v9791_v11 }
 0x3c4   :  { %v5787_v46 = vadd.f32 -1.0, %v1946_v41  ;;  %v2037_v25 = vpop.f32.mrb[8].mxu0  ;;  %v2114_v26 = vpop.f32.mrb[8].mxu1 }
 0x3c5   :  { %v7979_v33 = vpop.eup %7978  ;;  %v7603_v22 = vadd.f32 %v2037_v25, %v11221_v21  ;;  %v7635_v47 = vadd.f32 %v2114_v26, %v11222_v44  ;;  %v2039_v59 = vpop.f32.mrb[9].mxu0 }
 0x3c6   :  { %v2116_v4 = vpop.f32.mrb[9].mxu1  ;;  %v7981_v18 = vpop.eup %7980  ;;  %v1952_v5 = vmul.f32 %v7977_v40, %v5787_v46  ;;  %v1947_v14 = vmul.f32 2.0, %v7979_v33  ;;  %v7604_v12 = vadd.f32 %v2039_v59, %v11223_v54 }
 0x3c7   :  { %v5789_v27 = vmul.f32 -1.442695, %v7603_v22  ;;  %v5791_v0 = vmul.f32 -1.442695, %v7635_v47  ;;  %v7983_v51 = vpop.eup %7982  ;;  %v1951_v25 = vmul.f32 %v7981_v18, %v9796_v45 }
 0x3c8   :  { %v9953_v37 = vadd.f32 %v1952_v5, %v1950_v31  ;;  %v5788_v41 = vadd.f32 -1.0, %v1947_v14  ;;  %v5790_v62 = vmul.f32 -1.442695, %v7604_v12  ;;  %v2043_v63 = vpop.f32.mrb[10].mxu0  ;;  %v2120_v55 = vpop.f32.mrb[10].mxu1 }
 0x3c9   :  { %v7605_v26 = vadd.f32 %v2043_v63, %v11221_v21  ;;  %v2045_v49 = vpop.f32.mrb[11].mxu0  ;;  %7984 = vpow2.f32 %v5789_v27  ;;  %v7637_v11 = vadd.f32 %v2120_v55, %v11222_v44  ;;  %v2122_v46 = vpop.f32.mrb[11].mxu1  ;;  %v7636_v63 = vadd.f32 %v2116_v4, %v11224_v8 }
 0x3ca   :  { %v1953_v40 = vmul.f32 %v7983_v51, %v5788_v41  ;;  %v7606_v53 = vadd.f32 %v2045_v49, %v11223_v54  ;;  %7986 = vpow2.f32 %v5791_v0  ;;  %v7638_v55 = vadd.f32 %v2122_v46, %v11224_v8 }
 0x3cb   :  { %v5793_v33 = vmul.f32 -1.442695, %v7605_v26  ;;  %7988 = vpow2.f32 %v5790_v62  ;;  %v5795_v22 = vmul.f32 -1.442695, %v7637_v11  ;;  %v5792_v18 = vmul.f32 -1.442695, %v7636_v63 }
 0x3cc   :  { %v5794_v47 = vmul.f32 -1.442695, %v7606_v53  ;;  %v9959_v59 = vadd.f32 %v1953_v40, %v1951_v25  ;;  %v5796_v27 = vmul.f32 -1.442695, %v7638_v55 }
 0x3cd   :  { %7990 = vpow2.f32 %v5793_v33 }
 0x3ce   :  { %7992 = vpow2.f32 %v5795_v22 }
 0x3cf   :  { %7994 = vpow2.f32 %v5794_v47 }
 0x3d3   :  { %v7985_v45 = vpop.eup %7984 }
 0x3d4   :  { %v7987_v51 = vpop.eup %7986  ;;  %v2157_v31 = vadd.f32 1.0, %v7985_v45 }
 0x3d5   :  { %v7989_v5 = vpop.eup %7988  ;;  %v2159_v49 = vadd.f32 1.0, %v7987_v51 }
 0x3d6   :  { %v2158_v14 = vadd.f32 1.0, %v7989_v5 }
 0x3d7   :  { %v7991_v12 = vpop.eup %7990  ;;  %7996 = vrcp.f32 %v2159_v49 }
 0x3d8   :  { %v7993_v62 = vpop.eup %7992  ;;  %7998 = vpow2.f32 %v5792_v18  ;;  %v2161_v4 = vadd.f32 1.0, %v7991_v12 }
 0x3d9   :  { %v7995_v0 = vpop.eup %7994  ;;  %8000 = vrcp.f32 %v2158_v14  ;;  %v2163_v41 = vadd.f32 1.0, %v7993_v62 }
 0x3da   :  { %8002 = vrcp.f32 %v2157_v31  ;;  %v2162_v25 = vadd.f32 1.0, %v7995_v0 }
 0x3db   :  { %8004 = vrcp.f32 %v2163_v41 }
 0x3dc   :  { %8006 = vpow2.f32 %v5796_v27 }
 0x3dd   :  { %8008 = vrcp.f32 %v2162_v25 }
 0x3de   :  { %8010 = vrcp.f32 %v2161_v4  ;;  %v7674_v4 = vadd.f32 %v9946_v13, %v9810_v52  ;;  %v11296_v13 = vld [vmem:[#allocation86_spill] sm:$0xff] }
 0x3e1   :  { %v7997_v26 = vpop.eup %7996 }
 0x3e2   :  { %v7999_v40 = vpop.eup %7998  ;;  %v2181_v11 = vmul.f32 2.0, %v7997_v26 }
 0x3e3   :  { %v8001_v53 = vpop.eup %8000  ;;  %v2160_v47 = vadd.f32 1.0, %v7999_v40 }
 0x3e4   :  { %v8003_v46 = vpop.eup %8002  ;;  %v5797_v33 = vadd.f32 -1.0, %v2181_v11  ;;  %v2185_v51 = vmul.f32 %v8001_v53, %v9801_v24  ;;  %v7672_v24 = vadd.f32 %v9941_v28, %v9810_v52  ;;  %v5786_v28 = vmul.f32 -1.442695, %v7674_v4  ;;  %v11306_v4 = vld [vmem:[#allocation12_spill] sm:$0xff] }
 0x3e5   :  { %v8005_v22 = vpop.eup %8004  ;;  %8012 = vrcp.f32 %v2160_v47 }
 0x3e6   :  { %v8007_v63 = vpop.eup %8006  ;;  %v2187_v45 = vmul.f32 %v8003_v46, %v5797_v33  ;;  %v2182_v18 = vmul.f32 2.0, %v8005_v22  ;;  %v5782_v25 = vmul.f32 -1.442695, %v7672_v24  ;;  %v11297_v46 = vld [vmem:[#allocation87_spill] sm:$0xff]  ;;  %v11298_v33 = vld [vmem:[#allocation89_spill] sm:$0xff]  ;;  %v11302_v24 = vld [vmem:[#allocation8_spill] sm:$0xff] }
 0x3e7   :  { %v8009_v55 = vpop.eup %8008  ;;  %v2164_v14 = vadd.f32 1.0, %v8007_v63 }
 0x3e8   :  { %v9964_v5 = vadd.f32 %v2187_v45, %v2185_v51  ;;  %v5798_v49 = vadd.f32 -1.0, %v2182_v18  ;;  %v8011_v31 = vpop.eup %8010  ;;  %v2186_v62 = vmul.f32 %v8009_v55, %v9805_v43  ;;  %v11299_v45 = vld [vmem:[#allocation96_spill] sm:$0xff]  ;;  %v11300_v55 = vld [vmem:[#allocation97_spill] sm:$0xff] }
 0x3ea   :  { %8014 = vtanh.f32 %v9964_v5  ;;  %v2188_v12 = vmul.f32 %v8011_v31, %v5798_v49 }
 0x3eb   :  { %8016 = vrcp.f32 %v2164_v14 }
 0x3ec   :  { %v9968_v27 = vadd.f32 %v2188_v12, %v2186_v62  ;;  %v11301_v12 = vld [vmem:[#allocation5_spill] sm:$0xff] }
 0x3ee   :  { %8018 = vtanh.f32 %v9968_v27 }
 0x3ef   :  { %v8013_v0 = vpop.eup %8012  ;;  %8020 = vpow2.f32 %v5782_v25  ;;  %v11305_v25 = vld [vmem:[#allocation9_spill] sm:$0xff] }
 0x3f0   :  { %8022 = vpow2.f32 %v5786_v28  ;;  %v11309_v28 = vld [vmem:[#allocation13_spill] sm:$0xff] }
 0x3f1   :  { %8024 = vtanh.f32 %v9953_v37 }
 0x3f4   :  { %v8015_v41 = vpop.eup %8014 }
 0x3f5   :  { %v9975_v26 = vmul.f32 %v8015_v41, %v8013_v0  ;;  %v8017_v40 = vpop.eup %8016  ;;  %v11303_v0 = vld [vmem:[#allocation7_spill] sm:$0xff]  ;;  %v11304_v41 = vld [vmem:[#allocation10_spill] sm:$0xff] }
 0x3f7   :  { %2260 = vmatmul.mubr.f32.vlgmr.msra.gmra.mrb[40].mxu0 %v9975_v26  ;;  %2337 = vmatmul.mubr.f32.vlgmr.msra.gmra.mrb[40].mxu1 %v9975_v26 }
 0x3f8   :  { %v8019_v43 = vpop.eup %8018  ;;  %6542 = vmatpush1.bf16.msra.mxu0 %v11228_v10  ;;  %6574 = vmatpush1.bf16.msra.mxu1 %v9420_v23 }
 0x3f9   :  { %2265 = vmatprep.mubr.f32.mxu0 %v11172_v30  ;;  %2342 = vmatprep.mubr.f32.mxu1 %v11172_v30  ;;  %v9983_v11 = vmul.f32 %v8019_v43, %v8017_v40  ;;  %v8021_v53 = vpop.eup %8020  ;;  %v11307_v40 = vld [vmem:[#allocation11_spill] sm:$0xff]  ;;  %v11308_v43 = vld [vmem:[#allocation14_spill] sm:$0xff] }
 0x3fa   :  { %6544 = vmatprep.subr.bf16.mxu0 %v11229_v20  ;;  %6576 = vmatprep.subr.bf16.mxu1 %v11230_v1  ;;  %v1925_v22 = vadd.f32 1.0, %v8021_v53  ;;  %v8023_v47 = vpop.eup %8022  ;;  %v11310_v53 = vld [vmem:[#allocation16_spill] sm:$0xff] }
 0x3fb   :  { %2266 = vmatmul.mubr.f32.gmra.mrb[42].mxu0 %v9983_v11  ;;  %2343 = vmatmul.mubr.f32.gmra.mrb[42].mxu1 %v9983_v11  ;;  %v1929_v63 = vadd.f32 1.0, %v8023_v47  ;;  %v8025_v51 = vpop.eup %8024  ;;  %v11312_v47 = vld [vmem:[#allocation18_spill] sm:$0xff] }
 0x3fc   :  { %6546 = vmatpush1.bf16.msra.mxu0 %v11231_v19  ;;  %6578 = vmatpush1.bf16.msra.mxu1 %v11232_v58  ;;  %8026 = vrcp.f32 %v1925_v22  ;;  %v11311_v22 = vld [vmem:[#allocation15_spill] sm:$0xff] }
 0x3fd   :  { %6548 = vmatprep.subr.bf16.mxu0 %v11233_v17  ;;  %6580 = vmatprep.subr.bf16.mxu1 %v11234_v42  ;;  %8028 = vtanh.f32 %v9959_v59 }
 0x3fe   :  { %2413 = vmatprep.mubr.f32.mxu0 %v11172_v30  ;;  %2490 = vmatprep.mubr.f32.mxu1 %v11172_v30  ;;  %8030 = vrcp.f32 %v1929_v63  ;;  %v11313_v63 = vld [vmem:[#allocation17_spill] sm:$0xff] }
 0x400   :  { %6550 = vmatpush1.bf16.msra.mxu0 %v11235_v57  ;;  %6582 = vmatpush1.bf16.msra.mxu1 %v11236_v15 }
 0x401   :  { %6552 = vmatprep.subr.bf16.mxu0 %v11237_v56  ;;  %6584 = vmatprep.subr.bf16.mxu1 %v11296_v13 }
 0x404   :  { %6554 = vmatpush1.bf16.msra.mxu0 %v11297_v46  ;;  %6586 = vmatpush1.bf16.msra.mxu1 %v11240_v3 }
 0x405   :  { %6556 = vmatprep.subr.bf16.mxu0 %v11298_v33  ;;  %6588 = vmatprep.subr.bf16.mxu1 %v11242_v35 }
 0x406   :  { %v8027_v18 = vpop.eup %8026 }
 0x407   :  { %v1958_v49 = vmul.f32 %v8027_v18, %v8025_v51  ;;  %v8029_v31 = vpop.eup %8028  ;;  %v11314_v51 = vld [vmem:[#allocation20_spill] sm:$0xff]  ;;  %v11315_v18 = vld [vmem:[#allocation19_spill] sm:$0xff] }
 0x408   :  { %6558 = vmatpush1.bf16.msra.mxu0 %v11243_v9  ;;  %6590 = vmatpush1.bf16.msra.mxu1 %v11244_v2  ;;  %v8031_v14 = vpop.eup %8030 }
 0x409   :  { %6560 = vmatprep.subr.bf16.mxu0 %v11245_v29  ;;  %6592 = vmatprep.subr.bf16.mxu1 %v11246_v34  ;;  %v1959_v62 = vmul.f32 %v8031_v14, %v8029_v31  ;;  %v11317_v31 = vld [vmem:[#allocation21_spill] sm:$0xff]  ;;  %v11318_v14 = vld [vmem:[#allocation24_spill] sm:$0xff] }
 0x40c   :  { %6562 = vmatpush1.bf16.msra.mxu0 %v9608_v48  ;;  %6594 = vmatpush1.bf16.msra.mxu1 %v11247_v16 }
 0x40d   :  { %6564 = vmatprep.subr.bf16.mxu0 %v9620_v7  ;;  %6596 = vmatprep.subr.bf16.mxu1 %v9622_v6 }
 0x410   :  { %6566 = vmatpush1.bf16.msra.mxu0 %v11299_v45  ;;  %6598 = vmatpush1.bf16.msra.mxu1 %v9646_v32 }
 0x411   :  { %6568 = vmatprep.subr.bf16.mxu0 %v9653_v61  ;;  %6600 = vmatprep.subr.bf16.mxu1 %v9655_v60 }
 0x414   :  { %6570 = vmatpush1.bf16.msra.mxu0 %v11300_v55  ;;  %6602 = vmatpush1.bf16.msra.mxu1 %v9670_v36 }
 0x415   :  { %6604 = vmatprep.subr.bf16.mxu0 %v8685_v38  ;;  %6636 = vmatprep.subr.bf16.mxu1 %v8687_v39 }
 0x417   :  { %2414 = vmatmul.mubr.f32.vlgmr.msra.gmra.mrb[40].mxu0 %v1958_v49  ;;  %2491 = vmatmul.mubr.f32.vlgmr.msra.gmra.mrb[40].mxu1 %v1958_v49  ;;  %v11316_v49 = vld [vmem:[#allocation22_spill] sm:$0xff] }
 0x418   :  { %6606 = vmatpush1.bf16.msra.mxu0 %v8720_v50  ;;  %6638 = vmatpush1.bf16.msra.mxu1 %v11301_v12 }
 0x419   :  { %2419 = vmatprep.mubr.f32.mxu0 %v11172_v30  ;;  %2496 = vmatprep.mubr.f32.mxu1 %v11172_v30 }
 0x41a   :  { %6608 = vmatprep.subr.bf16.mxu0 %v11302_v24  ;;  %6640 = vmatprep.subr.bf16.mxu1 %v11303_v0 }
 0x41b   :  { %2420 = vmatmul.mubr.f32.gmra.mrb[42].mxu0 %v1959_v62  ;;  %2497 = vmatmul.mubr.f32.gmra.mrb[42].mxu1 %v1959_v62  ;;  %v11319_v62 = vld [vmem:[#allocation23_spill] sm:$0xff] }
 0x41c   :  { %6610 = vmatpush1.bf16.msra.mxu0 %v11304_v41  ;;  %6642 = vmatpush1.bf16.msra.mxu1 %v11305_v25 }
 0x41d   :  { %6612 = vmatprep.subr.bf16.mxu0 %v11306_v4  ;;  %6644 = vmatprep.subr.bf16.mxu1 %v11307_v40 }
 0x41e   :  { %2648 = vmatprep.mubr.f32.mxu0 %v11172_v30  ;;  %2725 = vmatprep.mubr.f32.mxu1 %v11172_v30 }
 0x420   :  { %6614 = vmatpush1.bf16.msra.mxu0 %v11308_v43  ;;  %6646 = vmatpush1.bf16.msra.mxu1 %v11309_v28  ;;  %v11320_v28 = vld [vmem:[#allocation26_spill] sm:$0xff] }
 0x421   :  { %6616 = vmatprep.subr.bf16.mxu0 %v11310_v53  ;;  %6648 = vmatprep.subr.bf16.mxu1 %v11311_v22  ;;  %v11321_v53 = vld [vmem:[#allocation25_spill] sm:$0xff]  ;;  %v11322_v22 = vld [vmem:[#allocation28_spill] sm:$0xff] }
 0x424   :  { %6618 = vmatpush1.bf16.msra.mxu0 %v11312_v47  ;;  %6650 = vmatpush1.bf16.msra.mxu1 %v11313_v63  ;;  %v11323_v47 = vld [vmem:[#allocation27_spill] sm:$0xff]  ;;  %v11324_v63 = vld [vmem:[#allocation30_spill] sm:$0xff] }
 0x425   :  { %6620 = vmatprep.subr.bf16.mxu0 %v11314_v51  ;;  %6652 = vmatprep.subr.bf16.mxu1 %v11315_v18  ;;  %v11325_v51 = vld [vmem:[#allocation29_spill] sm:$0xff]  ;;  %v11326_v18 = vld [vmem:[#allocation32_spill] sm:$0xff] }
 0x428   :  { %6622 = vmatpush1.bf16.msra.mxu0 %v11316_v49  ;;  %6654 = vmatpush1.bf16.msra.mxu1 %v11317_v31  ;;  %v11327_v49 = vld [vmem:[#allocation31_spill] sm:$0xff]  ;;  %v11328_v31 = vld [vmem:[#allocation34_spill] sm:$0xff] }
 0x429   :  { %6624 = vmatprep.subr.bf16.mxu0 %v11318_v14  ;;  %6656 = vmatprep.subr.bf16.mxu1 %v11319_v62  ;;  %v11329_v14 = vld [vmem:[#allocation33_spill] sm:$0xff]  ;;  %v11330_v62 = vld [vmem:[#allocation35_spill] sm:$0xff] }
 0x42c   :  { %6626 = vmatpush1.bf16.msra.mxu0 %v11320_v28  ;;  %6658 = vmatpush1.bf16.msra.mxu1 %v11321_v53  ;;  %v11331_v28 = vld [vmem:[#allocation36_spill] sm:$0xff]  ;;  %v11365_v53 = vld [vmem:[#allocation99_spill] sm:$0xff] }
 0x42d   :  { %6628 = vmatprep.subr.bf16.mxu0 %v11322_v22  ;;  %6660 = vmatprep.subr.bf16.mxu1 %v11323_v47  ;;  %v11346_v47 = vld [vmem:[#allocation51_spill] sm:$0xff]  ;;  %v11364_v22 = vld [vmem:[#allocation69_spill] sm:$0xff] }
 0x430   :  { %6630 = vmatpush1.bf16.msra.mxu0 %v11324_v63  ;;  %6662 = vmatpush1.bf16.msra.mxu1 %v11325_v51  ;;  %v11332_v51 = vld [vmem:[#allocation37_spill] sm:$0xff]  ;;  %v11345_v63 = vld [vmem:[#allocation50_spill] sm:$0xff] }
 0x431   :  { %6632 = vmatprep.subr.bf16.mxu0 %v11326_v18  ;;  %6664 = vmatprep.subr.bf16.mxu1 %v11327_v49  ;;  %v11333_v18 = vld [vmem:[#allocation38_spill] sm:$0xff]  ;;  %v11334_v49 = vld [vmem:[#allocation39_spill] sm:$0xff] }
 0x434   :  { %6634 = vmatpush1.bf16.msra.mxu0 %v11328_v31  ;;  %6666 = vmatpush1.bf16.msra.mxu1 %v11329_v14  ;;  %v11335_v31 = vld [vmem:[#allocation40_spill] sm:$0xff] }
 0x435   :  { %6668 = vmatprep.subr.bf16.mxu0 %v11330_v62  ;;  %6700 = vmatprep.subr.bf16.mxu1 %v11331_v28  ;;  %v11337_v28 = vld [vmem:[#allocation42_spill] sm:$0xff]  ;;  %v11338_v62 = vld [vmem:[#allocation43_spill] sm:$0xff]  ;;  %v11343_v14 = vld [vmem:[#allocation48_spill] sm:$0xff] }
 0x437   :  { %2649 = vmatmul.mubr.f32.vlgmr.msra.gmra.mrb[12].mxu0 %v9975_v26  ;;  %2726 = vmatmul.mubr.f32.vlgmr.msra.gmra.mrb[12].mxu1 %v9975_v26  ;;  %v11336_v26 = vld [vmem:[#allocation41_spill] sm:$0xff] }
 0x438   :  { %2654 = vmatprep.mubr.f32.mxu0 %v11172_v30  ;;  %2731 = vmatprep.mubr.f32.mxu1 %v11172_v30 }
 0x439   :  { %6670 = vmatpush1.bf16.msra.mxu0 %v11332_v51  ;;  %6702 = vmatpush1.bf16.msra.mxu1 %v11333_v18  ;;  %v11339_v51 = vld [vmem:[#allocation44_spill] sm:$0xff]  ;;  %v11340_v18 = vld [vmem:[#allocation45_spill] sm:$0xff] }
 0x43a   :  { %6672 = vmatprep.subr.bf16.mxu0 %v11334_v49  ;;  %6704 = vmatprep.subr.bf16.mxu1 %v11335_v31  ;;  %v11341_v49 = vld [vmem:[#allocation46_spill] sm:$0xff]  ;;  %v11342_v31 = vld [vmem:[#allocation47_spill] sm:$0xff] }
 0x43b   :  { %2655 = vmatmul.mubr.f32.gmra.mrb[14].mxu0 %v9983_v11  ;;  %2732 = vmatmul.mubr.f32.gmra.mrb[14].mxu1 %v9983_v11  ;;  %v11344_v11 = vld [vmem:[#allocation49_spill] sm:$0xff] }
 0x43c   :  { %2872 = vmatprep.mubr.f32.mxu0 %v11172_v30  ;;  %2949 = vmatprep.mubr.f32.mxu1 %v11172_v30 }
 0x43d   :  { %6674 = vmatpush1.bf16.msra.mxu0 %v11336_v26  ;;  %6706 = vmatpush1.bf16.msra.mxu1 %v11337_v28  ;;  %v11347_v26 = vld [vmem:[#allocation52_spill] sm:$0xff]  ;;  %v11348_v28 = vld [vmem:[#allocation53_spill] sm:$0xff] }
 0x43e   :  { %6676 = vmatprep.subr.bf16.mxu0 %v11338_v62  ;;  %6708 = vmatprep.subr.bf16.mxu1 %v11339_v51  ;;  %v11349_v62 = vld [vmem:[#allocation54_spill] sm:$0xff]  ;;  %v11350_v51 = vld [vmem:[#allocation55_spill] sm:$0xff] }
 0x441   :  { %6678 = vmatpush1.bf16.msra.mxu0 %v11340_v18  ;;  %6710 = vmatpush1.bf16.msra.mxu1 %v11341_v49  ;;  %v11351_v18 = vld [vmem:[#allocation56_spill] sm:$0xff]  ;;  %v11352_v49 = vld [vmem:[#allocation57_spill] sm:$0xff] }
 0x442   :  { %6680 = vmatprep.subr.bf16.mxu0 %v11342_v31  ;;  %6712 = vmatprep.subr.bf16.mxu1 %v11343_v14  ;;  %v11353_v31 = vld [vmem:[#allocation58_spill] sm:$0xff]  ;;  %v11354_v14 = vld [vmem:[#allocation59_spill] sm:$0xff] }
 0x445   :  { %6682 = vmatpush1.bf16.msra.mxu0 %v11344_v11  ;;  %6714 = vmatpush1.bf16.msra.mxu1 %v11345_v63  ;;  %v11355_v11 = vld [vmem:[#allocation60_spill] sm:$0xff]  ;;  %v11356_v63 = vld [vmem:[#allocation61_spill] sm:$0xff] }
 0x446   :  { %6684 = vmatprep.subr.bf16.mxu0 %v11346_v47  ;;  %6716 = vmatprep.subr.bf16.mxu1 %v11347_v26  ;;  %v11357_v47 = vld [vmem:[#allocation62_spill] sm:$0xff]  ;;  %v11358_v26 = vld [vmem:[#allocation63_spill] sm:$0xff] }
 0x449   :  { %6686 = vmatpush1.bf16.msra.mxu0 %v11348_v28  ;;  %6718 = vmatpush1.bf16.msra.mxu1 %v11349_v62  ;;  %v11359_v28 = vld [vmem:[#allocation64_spill] sm:$0xff]  ;;  %v11360_v62 = vld [vmem:[#allocation65_spill] sm:$0xff] }
 0x44a   :  { %6688 = vmatprep.subr.bf16.mxu0 %v11350_v51  ;;  %6720 = vmatprep.subr.bf16.mxu1 %v11351_v18  ;;  %v11361_v51 = vld [vmem:[#allocation66_spill] sm:$0xff]  ;;  %v11362_v18 = vld [vmem:[#allocation67_spill] sm:$0xff] }
 0x44d   :  { %6690 = vmatpush1.bf16.msra.mxu0 %v11352_v49  ;;  %6722 = vmatpush1.bf16.msra.mxu1 %v11353_v31  ;;  %v11363_v49 = vld [vmem:[#allocation68_spill] sm:$0xff] }
 0x44e   :  { %6692 = vmatprep.subr.bf16.mxu0 %v11354_v14  ;;  %6724 = vmatprep.subr.bf16.mxu1 %v11355_v11 }
 0x451   :  { %6694 = vmatpush1.bf16.msra.mxu0 %v11356_v63  ;;  %6726 = vmatpush1.bf16.msra.mxu1 %v11357_v47 }
 0x452   :  { %6696 = vmatprep.subr.bf16.mxu0 %v11358_v26  ;;  %6728 = vmatprep.subr.bf16.mxu1 %v11359_v28  ;;  %v11366_v26 = vld [vmem:[#allocation100_spill] sm:$0xff] }
 0x455   :  { %6698 = vmatpush1.bf16.msra.mxu0 %v11360_v62  ;;  %6730 = vmatpush1.bf16.msra.mxu1 %v11361_v51 }
 0x456   :  { %6732 = vmatprep.subr.bf16.mxu0 %v11362_v18  ;;  %6764 = vmatprep.subr.bf16.mxu1 %v11363_v49 }
 0x4ea   :  { %v2415_v31 = vpop.f32.mrb[40].mxu0  ;;  %v2492_v14 = vpop.f32.mrb[40].mxu1 }
 0x4eb   :  { %v7675_v11 = vadd.f32 %v2415_v31, %v11364_v22  ;;  %v7679_v63 = vadd.f32 %v2492_v14, %v11365_v53  ;;  %v2417_v43 = vpop.f32.mrb[41].mxu0  ;;  %v10099_v47 = vpop.f32.mrb[41].mxu1 }
 0x4ec   :  { %v7676_v40 = vadd.f32 %v2417_v43, %v11366_v26 }
 0x4ed   :  { %v5799_v28 = vmul.f32 -1.442695, %v7675_v11  ;;  %v5801_v4 = vmul.f32 -1.442695, %v7679_v63 }
 0x4ee   :  { %v5800_v62 = vmul.f32 -1.442695, %v7676_v40  ;;  %v2421_v25 = vpop.f32.mrb[42].mxu0  ;;  %v2498_v51 = vpop.f32.mrb[42].mxu1 }
 0x4ef   :  { %8032 = vpow2.f32 %v5799_v28  ;;  %v7677_v18 = vadd.f32 %v2421_v25, %v11364_v22  ;;  %v7681_v49 = vadd.f32 %v2498_v51, %v11365_v53  ;;  %v2423_v41 = vpop.f32.mrb[43].mxu0  ;;  %v10104_v0 = vpop.f32.mrb[43].mxu1 }
 0x4f0   :  { %8034 = vpow2.f32 %v5801_v4  ;;  %v7678_v31 = vadd.f32 %v2423_v41, %v11366_v26 }
 0x4f1   :  { %8036 = vpow2.f32 %v5800_v62  ;;  %v5803_v14 = vmul.f32 -1.442695, %v7677_v18  ;;  %v5805_v24 = vmul.f32 -1.442695, %v7681_v49 }
 0x4f2   :  { %v5804_v43 = vmul.f32 -1.442695, %v7678_v31 }
 0x4f3   :  { %8038 = vpow2.f32 %v5803_v14 }
 0x4f4   :  { %8040 = vpow2.f32 %v5805_v24 }
 0x4f5   :  { %8042 = vpow2.f32 %v5804_v43 }
 0x4f9   :  { %v8033_v40 = vpop.eup %8032 }
 0x4fa   :  { %v8035_v63 = vpop.eup %8034  ;;  %v2535_v25 = vadd.f32 1.0, %v8033_v40 }
 0x4fb   :  { %v8037_v28 = vpop.eup %8036  ;;  %v2537_v11 = vadd.f32 1.0, %v8035_v63 }
 0x4fc   :  { %v2536_v22 = vadd.f32 1.0, %v8037_v28 }
 0x4fd   :  { %v8039_v51 = vpop.eup %8038  ;;  %8044 = vrcp.f32 %v2537_v11 }
 0x4fe   :  { %v8041_v53 = vpop.eup %8040  ;;  %8046 = vrcp.f32 %v2536_v22  ;;  %v2539_v18 = vadd.f32 1.0, %v8039_v51 }
 0x4ff   :  { %v8043_v12 = vpop.eup %8042  ;;  %v2541_v4 = vadd.f32 1.0, %v8041_v53  ;;  %8048 = vrcp.f32 %v2535_v25 }
 0x500   :  { %v2540_v41 = vadd.f32 1.0, %v8043_v12 }
 0x501   :  { %8050 = vrcp.f32 %v2541_v4 }
 0x502   :  { %8052 = vrcp.f32 %v2540_v41 }
 0x503   :  { %8054 = vrcp.f32 %v2539_v18 }
 0x507   :  { %v8045_v24 = vpop.eup %8044 }
 0x508   :  { %v2559_v49 = vmul.f32 2.0, %v8045_v24  ;;  %v8047_v62 = vpop.eup %8046 }
 0x509   :  { %v8049_v31 = vpop.eup %8048  ;;  %v2563_v51 = vmul.f32 %v8047_v62, %v9953_v37 }
 0x50a   :  { %v5807_v14 = vadd.f32 -1.0, %v2559_v49  ;;  %v2650_v43 = vpop.f32.mrb[12].mxu0  ;;  %v2727_v40 = vpop.f32.mrb[12].mxu1 }
 0x50b   :  { %v8051_v63 = vpop.eup %8050  ;;  %v7607_v28 = vadd.f32 %v2650_v43, %v11221_v21  ;;  %v7639_v11 = vadd.f32 %v2727_v40, %v11222_v44  ;;  %v2652_v22 = vpop.f32.mrb[13].mxu0 }
 0x50c   :  { %v2729_v53 = vpop.f32.mrb[13].mxu1  ;;  %v8053_v25 = vpop.eup %8052  ;;  %v2565_v12 = vmul.f32 %v8049_v31, %v5807_v14  ;;  %v2560_v4 = vmul.f32 2.0, %v8051_v63  ;;  %v7608_v41 = vadd.f32 %v2652_v22, %v11223_v54 }
 0x50d   :  { %v5809_v18 = vmul.f32 -1.442695, %v7607_v28  ;;  %v5811_v24 = vmul.f32 -1.442695, %v7639_v11  ;;  %v8055_v38 = vpop.eup %8054  ;;  %v2564_v43 = vmul.f32 %v8053_v25, %v9959_v59 }
 0x50e   :  { %v10111_v26 = vadd.f32 %v2565_v12, %v2563_v51  ;;  %v5808_v49 = vadd.f32 -1.0, %v2560_v4  ;;  %v5810_v50 = vmul.f32 -1.442695, %v7608_v41  ;;  %v2656_v39 = vpop.f32.mrb[14].mxu0  ;;  %v2733_v36 = vpop.f32.mrb[14].mxu1 }
 0x50f   :  { %v7609_v40 = vadd.f32 %v2656_v39, %v11221_v21  ;;  %v2658_v55 = vpop.f32.mrb[15].mxu0  ;;  %8056 = vpow2.f32 %v5809_v18  ;;  %v7641_v37 = vadd.f32 %v2733_v36, %v11222_v44  ;;  %v2735_v14 = vpop.f32.mrb[15].mxu1  ;;  %v7640_v39 = vadd.f32 %v2729_v53, %v11224_v8 }
 0x510   :  { %v2566_v31 = vmul.f32 %v8055_v38, %v5808_v49  ;;  %v7610_v62 = vadd.f32 %v2658_v55, %v11223_v54  ;;  %8058 = vpow2.f32 %v5811_v24  ;;  %v7642_v36 = vadd.f32 %v2735_v14, %v11224_v8 }
 0x511   :  { %v5813_v63 = vmul.f32 -1.442695, %v7609_v40  ;;  %8060 = vpow2.f32 %v5810_v50  ;;  %v5815_v28 = vmul.f32 -1.442695, %v7641_v37  ;;  %v5812_v25 = vmul.f32 -1.442695, %v7640_v39 }
 0x512   :  { %v5814_v11 = vmul.f32 -1.442695, %v7610_v62  ;;  %v10117_v22 = vadd.f32 %v2566_v31, %v2564_v43  ;;  %v5816_v18 = vmul.f32 -1.442695, %v7642_v36 }
 0x513   :  { %8062 = vpow2.f32 %v5813_v63 }
 0x514   :  { %8064 = vpow2.f32 %v5815_v28 }
 0x515   :  { %8066 = vpow2.f32 %v5814_v11 }
 0x519   :  { %v8057_v59 = vpop.eup %8056 }
 0x51a   :  { %v8059_v38 = vpop.eup %8058  ;;  %v2770_v51 = vadd.f32 1.0, %v8057_v59 }
 0x51b   :  { %v8061_v12 = vpop.eup %8060  ;;  %v2772_v55 = vadd.f32 1.0, %v8059_v38 }
 0x51c   :  { %v2771_v4 = vadd.f32 1.0, %v8061_v12 }
 0x51d   :  { %v8063_v41 = vpop.eup %8062  ;;  %8068 = vrcp.f32 %v2772_v55 }
 0x51e   :  { %v8065_v50 = vpop.eup %8064  ;;  %8070 = vpow2.f32 %v5812_v25  ;;  %v2774_v53 = vadd.f32 1.0, %v8063_v41 }
 0x51f   :  { %v8067_v24 = vpop.eup %8066  ;;  %8072 = vrcp.f32 %v2771_v4  ;;  %v2776_v49 = vadd.f32 1.0, %v8065_v50 }
 0x520   :  { %8074 = vrcp.f32 %v2770_v51  ;;  %v2775_v43 = vadd.f32 1.0, %v8067_v24 }
 0x521   :  { %8076 = vrcp.f32 %v2776_v49 }
 0x522   :  { %8078 = vpow2.f32 %v5816_v18 }
 0x523   :  { %8080 = vrcp.f32 %v2775_v43 }
 0x524   :  { %8082 = vrcp.f32 %v2774_v53  ;;  %v7682_v53 = vadd.f32 %v10104_v0, %v9810_v52 }
 0x527   :  { %v8069_v40 = vpop.eup %8068 }
 0x528   :  { %v8071_v31 = vpop.eup %8070  ;;  %v2794_v37 = vmul.f32 2.0, %v8069_v40 }
 0x529   :  { %v8073_v62 = vpop.eup %8072  ;;  %v2773_v11 = vadd.f32 1.0, %v8071_v31 }
 0x52a   :  { %v8075_v14 = vpop.eup %8074  ;;  %v5817_v63 = vadd.f32 -1.0, %v2794_v37  ;;  %v2798_v38 = vmul.f32 %v8073_v62, %v9964_v5  ;;  %v7680_v5 = vadd.f32 %v10099_v47, %v9810_v52  ;;  %v5806_v47 = vmul.f32 -1.442695, %v7682_v53  ;;  %v11377_v53 = vld [vmem:[#allocation12_spill] sm:$0xff] }
 0x52b   :  { %v8077_v28 = vpop.eup %8076  ;;  %8084 = vrcp.f32 %v2773_v11 }
 0x52c   :  { %v8079_v39 = vpop.eup %8078  ;;  %v2800_v59 = vmul.f32 %v8075_v14, %v5817_v63  ;;  %v2795_v25 = vmul.f32 2.0, %v8077_v28  ;;  %v5802_v43 = vmul.f32 -1.442695, %v7680_v5  ;;  %v11373_v5 = vld [vmem:[#allocation8_spill] sm:$0xff] }
 0x52d   :  { %v8081_v36 = vpop.eup %8080  ;;  %v2777_v4 = vadd.f32 1.0, %v8079_v39  ;;  %v11367_v39 = vld [vmem:[#allocation97_spill] sm:$0xff] }
 0x52e   :  { %v10122_v12 = vadd.f32 %v2800_v59, %v2798_v38  ;;  %v5818_v55 = vadd.f32 -1.0, %v2795_v25  ;;  %v8083_v51 = vpop.eup %8082  ;;  %v2799_v50 = vmul.f32 %v8081_v36, %v9968_v27  ;;  %v11368_v59 = vld [vmem:[#allocation98_spill] sm:$0xff]  ;;  %v11369_v25 = vld [vmem:[#allocation3_spill] sm:$0xff]  ;;  %v11370_v36 = vld [vmem:[#allocation4_spill] sm:$0xff] }
 0x530   :  { %8086 = vtanh.f32 %v10122_v12  ;;  %v2801_v41 = vmul.f32 %v8083_v51, %v5818_v55 }
 0x531   :  { %8088 = vrcp.f32 %v2777_v4  ;;  %v11371_v4 = vld [vmem:[#allocation6_spill] sm:$0xff] }
 0x532   :  { %v10126_v18 = vadd.f32 %v2801_v41, %v2799_v50  ;;  %v11372_v41 = vld [vmem:[#allocation5_spill] sm:$0xff] }
 0x534   :  { %8090 = vtanh.f32 %v10126_v18 }
 0x535   :  { %v8085_v24 = vpop.eup %8084  ;;  %8092 = vpow2.f32 %v5802_v43  ;;  %v11376_v43 = vld [vmem:[#allocation9_spill] sm:$0xff] }
 0x536   :  { %8094 = vpow2.f32 %v5806_v47  ;;  %v11380_v47 = vld [vmem:[#allocation13_spill] sm:$0xff] }
 0x537   :  { %8096 = vtanh.f32 %v10111_v26 }
 0x53a   :  { %v8087_v49 = vpop.eup %8086 }
 0x53b   :  { %v10133_v40 = vmul.f32 %v8087_v49, %v8085_v24  ;;  %v8089_v31 = vpop.eup %8088  ;;  %v11374_v24 = vld [vmem:[#allocation7_spill] sm:$0xff]  ;;  %v11375_v49 = vld [vmem:[#allocation10_spill] sm:$0xff] }
 0x53d   :  { %2873 = vmatmul.mubr.f32.vlgmr.msra.gmra.mrb[44].mxu0 %v10133_v40  ;;  %2950 = vmatmul.mubr.f32.vlgmr.msra.gmra.mrb[44].mxu1 %v10133_v40 }
 0x53e   :  { %v8091_v27 = vpop.eup %8090  ;;  %6734 = vmatpush1.bf16.msra.mxu0 %v11228_v10  ;;  %6766 = vmatpush1.bf16.msra.mxu1 %v9420_v23 }
 0x53f   :  { %2878 = vmatprep.mubr.f32.mxu0 %v11172_v30  ;;  %2955 = vmatprep.mubr.f32.mxu1 %v11172_v30  ;;  %v10141_v37 = vmul.f32 %v8091_v27, %v8089_v31  ;;  %v8093_v0 = vpop.eup %8092  ;;  %v11378_v31 = vld [vmem:[#allocation11_spill] sm:$0xff]  ;;  %v11379_v27 = vld [vmem:[#allocation14_spill] sm:$0xff] }
 0x540   :  { %6736 = vmatprep.subr.bf16.mxu0 %v11229_v20  ;;  %6768 = vmatprep.subr.bf16.mxu1 %v11230_v1  ;;  %v2538_v62 = vadd.f32 1.0, %v8093_v0  ;;  %v8095_v14 = vpop.eup %8094  ;;  %v11381_v0 = vld [vmem:[#allocation16_spill] sm:$0xff] }
 0x541   :  { %2879 = vmatmul.mubr.f32.gmra.mrb[46].mxu0 %v10141_v37  ;;  %2956 = vmatmul.mubr.f32.gmra.mrb[46].mxu1 %v10141_v37  ;;  %v2542_v63 = vadd.f32 1.0, %v8095_v14  ;;  %v8097_v28 = vpop.eup %8096  ;;  %v11383_v14 = vld [vmem:[#allocation18_spill] sm:$0xff] }
 0x542   :  { %6738 = vmatpush1.bf16.msra.mxu0 %v11231_v19  ;;  %6770 = vmatpush1.bf16.msra.mxu1 %v11232_v58  ;;  %8098 = vrcp.f32 %v2538_v62  ;;  %v11382_v62 = vld [vmem:[#allocation15_spill] sm:$0xff] }
 0x543   :  { %6740 = vmatprep.subr.bf16.mxu0 %v11233_v17  ;;  %6772 = vmatprep.subr.bf16.mxu1 %v11234_v42  ;;  %8100 = vtanh.f32 %v10117_v22 }
 0x544   :  { %3026 = vmatprep.mubr.f32.mxu0 %v11172_v30  ;;  %3103 = vmatprep.mubr.f32.mxu1 %v11172_v30  ;;  %8102 = vrcp.f32 %v2542_v63  ;;  %v11384_v63 = vld [vmem:[#allocation17_spill] sm:$0xff] }
 0x546   :  { %6742 = vmatpush1.bf16.msra.mxu0 %v11235_v57  ;;  %6774 = vmatpush1.bf16.msra.mxu1 %v11236_v15 }
 0x547   :  { %6744 = vmatprep.subr.bf16.mxu0 %v11237_v56  ;;  %6776 = vmatprep.subr.bf16.mxu1 %v11296_v13 }
 0x54a   :  { %6746 = vmatpush1.bf16.msra.mxu0 %v11297_v46  ;;  %6778 = vmatpush1.bf16.msra.mxu1 %v11240_v3 }
 0x54b   :  { %6748 = vmatprep.subr.bf16.mxu0 %v11298_v33  ;;  %6780 = vmatprep.subr.bf16.mxu1 %v11242_v35 }
 0x54c   :  { %v8099_v11 = vpop.eup %8098 }
 0x54d   :  { %v2571_v38 = vmul.f32 %v8099_v11, %v8097_v28  ;;  %v8101_v55 = vpop.eup %8100  ;;  %v11385_v28 = vld [vmem:[#allocation20_spill] sm:$0xff]  ;;  %v11386_v11 = vld [vmem:[#allocation19_spill] sm:$0xff] }
 0x54e   :  { %6750 = vmatpush1.bf16.msra.mxu0 %v11243_v9  ;;  %6782 = vmatpush1.bf16.msra.mxu1 %v11244_v2  ;;  %v8103_v51 = vpop.eup %8102 }
 0x54f   :  { %6752 = vmatprep.subr.bf16.mxu0 %v11245_v29  ;;  %6784 = vmatprep.subr.bf16.mxu1 %v11246_v34  ;;  %v2572_v50 = vmul.f32 %v8103_v51, %v8101_v55  ;;  %v11388_v55 = vld [vmem:[#allocation21_spill] sm:$0xff]  ;;  %v11389_v51 = vld [vmem:[#allocation24_spill] sm:$0xff] }
 0x552   :  { %6754 = vmatpush1.bf16.msra.mxu0 %v9608_v48  ;;  %6786 = vmatpush1.bf16.msra.mxu1 %v11247_v16 }
 0x553   :  { %6756 = vmatprep.subr.bf16.mxu0 %v9620_v7  ;;  %6788 = vmatprep.subr.bf16.mxu1 %v9622_v6 }
 0x556   :  { %6758 = vmatpush1.bf16.msra.mxu0 %v11299_v45  ;;  %6790 = vmatpush1.bf16.msra.mxu1 %v9646_v32 }
 0x557   :  { %6760 = vmatprep.subr.bf16.mxu0 %v9653_v61  ;;  %6792 = vmatprep.subr.bf16.mxu1 %v9655_v60 }
 0x55a   :  { %6762 = vmatpush1.bf16.msra.mxu0 %v11367_v39  ;;  %6794 = vmatpush1.bf16.msra.mxu1 %v11368_v59 }
 0x55b   :  { %6796 = vmatprep.subr.bf16.mxu0 %v11369_v25  ;;  %6828 = vmatprep.subr.bf16.mxu1 %v11370_v36 }
 0x55d   :  { %3027 = vmatmul.mubr.f32.vlgmr.msra.gmra.mrb[44].mxu0 %v2571_v38  ;;  %3104 = vmatmul.mubr.f32.vlgmr.msra.gmra.mrb[44].mxu1 %v2571_v38  ;;  %v11387_v38 = vld [vmem:[#allocation22_spill] sm:$0xff] }
 0x55e   :  { %6798 = vmatpush1.bf16.msra.mxu0 %v11371_v4  ;;  %6830 = vmatpush1.bf16.msra.mxu1 %v11372_v41 }
 0x55f   :  { %3032 = vmatprep.mubr.f32.mxu0 %v11172_v30  ;;  %3109 = vmatprep.mubr.f32.mxu1 %v11172_v30 }
 0x560   :  { %6800 = vmatprep.subr.bf16.mxu0 %v11373_v5  ;;  %6832 = vmatprep.subr.bf16.mxu1 %v11374_v24 }
 0x561   :  { %3033 = vmatmul.mubr.f32.gmra.mrb[46].mxu0 %v2572_v50  ;;  %3110 = vmatmul.mubr.f32.gmra.mrb[46].mxu1 %v2572_v50  ;;  %v11390_v50 = vld [vmem:[#allocation23_spill] sm:$0xff] }
 0x562   :  { %6802 = vmatpush1.bf16.msra.mxu0 %v11375_v49  ;;  %6834 = vmatpush1.bf16.msra.mxu1 %v11376_v43 }
 0x563   :  { %6804 = vmatprep.subr.bf16.mxu0 %v11377_v53  ;;  %6836 = vmatprep.subr.bf16.mxu1 %v11378_v31 }
 0x564   :  { %3261 = vmatprep.mubr.f32.mxu0 %v11172_v30  ;;  %3338 = vmatprep.mubr.f32.mxu1 %v11172_v30 }
 0x566   :  { %6806 = vmatpush1.bf16.msra.mxu0 %v11379_v27  ;;  %6838 = vmatpush1.bf16.msra.mxu1 %v11380_v47  ;;  %v11391_v47 = vld [vmem:[#allocation26_spill] sm:$0xff] }
 0x567   :  { %6808 = vmatprep.subr.bf16.mxu0 %v11381_v0  ;;  %6840 = vmatprep.subr.bf16.mxu1 %v11382_v62  ;;  %v11392_v0 = vld [vmem:[#allocation25_spill] sm:$0xff]  ;;  %v11393_v62 = vld [vmem:[#allocation28_spill] sm:$0xff] }
 0x56a   :  { %6810 = vmatpush1.bf16.msra.mxu0 %v11383_v14  ;;  %6842 = vmatpush1.bf16.msra.mxu1 %v11384_v63  ;;  %v11394_v14 = vld [vmem:[#allocation27_spill] sm:$0xff]  ;;  %v11395_v63 = vld [vmem:[#allocation30_spill] sm:$0xff] }
 0x56b   :  { %6812 = vmatprep.subr.bf16.mxu0 %v11385_v28  ;;  %6844 = vmatprep.subr.bf16.mxu1 %v11386_v11  ;;  %v11396_v28 = vld [vmem:[#allocation29_spill] sm:$0xff]  ;;  %v11397_v11 = vld [vmem:[#allocation32_spill] sm:$0xff] }
 0x56e   :  { %6814 = vmatpush1.bf16.msra.mxu0 %v11387_v38  ;;  %6846 = vmatpush1.bf16.msra.mxu1 %v11388_v55  ;;  %v11398_v38 = vld [vmem:[#allocation31_spill] sm:$0xff]  ;;  %v11399_v55 = vld [vmem:[#allocation34_spill] sm:$0xff] }
 0x56f   :  { %6816 = vmatprep.subr.bf16.mxu0 %v11389_v51  ;;  %6848 = vmatprep.subr.bf16.mxu1 %v11390_v50  ;;  %v11400_v51 = vld [vmem:[#allocation33_spill] sm:$0xff]  ;;  %v11401_v50 = vld [vmem:[#allocation35_spill] sm:$0xff] }
 0x572   :  { %6818 = vmatpush1.bf16.msra.mxu0 %v11391_v47  ;;  %6850 = vmatpush1.bf16.msra.mxu1 %v11392_v0  ;;  %v11402_v47 = vld [vmem:[#allocation36_spill] sm:$0xff]  ;;  %v11436_v0 = vld [vmem:[#allocation99_spill] sm:$0xff] }
 0x573   :  { %6820 = vmatprep.subr.bf16.mxu0 %v11393_v62  ;;  %6852 = vmatprep.subr.bf16.mxu1 %v11394_v14  ;;  %v11417_v14 = vld [vmem:[#allocation51_spill] sm:$0xff]  ;;  %v11435_v62 = vld [vmem:[#allocation69_spill] sm:$0xff] }
 0x576   :  { %6822 = vmatpush1.bf16.msra.mxu0 %v11395_v63  ;;  %6854 = vmatpush1.bf16.msra.mxu1 %v11396_v28  ;;  %v11403_v28 = vld [vmem:[#allocation37_spill] sm:$0xff]  ;;  %v11416_v63 = vld [vmem:[#allocation50_spill] sm:$0xff] }
 0x577   :  { %6824 = vmatprep.subr.bf16.mxu0 %v11397_v11  ;;  %6856 = vmatprep.subr.bf16.mxu1 %v11398_v38  ;;  %v11404_v11 = vld [vmem:[#allocation38_spill] sm:$0xff]  ;;  %v11405_v38 = vld [vmem:[#allocation39_spill] sm:$0xff] }
 0x57a   :  { %6826 = vmatpush1.bf16.msra.mxu0 %v11399_v55  ;;  %6858 = vmatpush1.bf16.msra.mxu1 %v11400_v51  ;;  %v11406_v55 = vld [vmem:[#allocation40_spill] sm:$0xff] }
 0x57b   :  { %6860 = vmatprep.subr.bf16.mxu0 %v11401_v50  ;;  %6892 = vmatprep.subr.bf16.mxu1 %v11402_v47  ;;  %v11408_v47 = vld [vmem:[#allocation42_spill] sm:$0xff]  ;;  %v11409_v50 = vld [vmem:[#allocation43_spill] sm:$0xff]  ;;  %v11414_v51 = vld [vmem:[#allocation48_spill] sm:$0xff] }
 0x57d   :  { %3262 = vmatmul.mubr.f32.vlgmr.msra.gmra.mrb[16].mxu0 %v10133_v40  ;;  %3339 = vmatmul.mubr.f32.vlgmr.msra.gmra.mrb[16].mxu1 %v10133_v40  ;;  %v11407_v40 = vld [vmem:[#allocation41_spill] sm:$0xff] }
 0x57e   :  { %3267 = vmatprep.mubr.f32.mxu0 %v11172_v30  ;;  %3344 = vmatprep.mubr.f32.mxu1 %v11172_v30 }
 0x57f   :  { %6862 = vmatpush1.bf16.msra.mxu0 %v11403_v28  ;;  %6894 = vmatpush1.bf16.msra.mxu1 %v11404_v11  ;;  %v11410_v28 = vld [vmem:[#allocation44_spill] sm:$0xff]  ;;  %v11411_v11 = vld [vmem:[#allocation45_spill] sm:$0xff] }
 0x580   :  { %6864 = vmatprep.subr.bf16.mxu0 %v11405_v38  ;;  %6896 = vmatprep.subr.bf16.mxu1 %v11406_v55  ;;  %v11412_v38 = vld [vmem:[#allocation46_spill] sm:$0xff]  ;;  %v11413_v55 = vld [vmem:[#allocation47_spill] sm:$0xff] }
 0x581   :  { %3268 = vmatmul.mubr.f32.gmra.mrb[18].mxu0 %v10141_v37  ;;  %3345 = vmatmul.mubr.f32.gmra.mrb[18].mxu1 %v10141_v37  ;;  %v11415_v37 = vld [vmem:[#allocation49_spill] sm:$0xff] }
 0x582   :  { %3485 = vmatprep.mubr.f32.mxu0 %v11172_v30  ;;  %3562 = vmatprep.mubr.f32.mxu1 %v11172_v30 }
 0x583   :  { %6866 = vmatpush1.bf16.msra.mxu0 %v11407_v40  ;;  %6898 = vmatpush1.bf16.msra.mxu1 %v11408_v47  ;;  %v11418_v40 = vld [vmem:[#allocation52_spill] sm:$0xff]  ;;  %v11419_v47 = vld [vmem:[#allocation53_spill] sm:$0xff] }
 0x584   :  { %6868 = vmatprep.subr.bf16.mxu0 %v11409_v50  ;;  %6900 = vmatprep.subr.bf16.mxu1 %v11410_v28  ;;  %v11420_v50 = vld [vmem:[#allocation54_spill] sm:$0xff]  ;;  %v11421_v28 = vld [vmem:[#allocation55_spill] sm:$0xff] }
 0x587   :  { %6870 = vmatpush1.bf16.msra.mxu0 %v11411_v11  ;;  %6902 = vmatpush1.bf16.msra.mxu1 %v11412_v38  ;;  %v11422_v11 = vld [vmem:[#allocation56_spill] sm:$0xff]  ;;  %v11423_v38 = vld [vmem:[#allocation57_spill] sm:$0xff] }
 0x588   :  { %6872 = vmatprep.subr.bf16.mxu0 %v11413_v55  ;;  %6904 = vmatprep.subr.bf16.mxu1 %v11414_v51  ;;  %v11424_v55 = vld [vmem:[#allocation58_spill] sm:$0xff]  ;;  %v11425_v51 = vld [vmem:[#allocation59_spill] sm:$0xff] }
 0x58b   :  { %6874 = vmatpush1.bf16.msra.mxu0 %v11415_v37  ;;  %6906 = vmatpush1.bf16.msra.mxu1 %v11416_v63  ;;  %v11426_v37 = vld [vmem:[#allocation60_spill] sm:$0xff]  ;;  %v11427_v63 = vld [vmem:[#allocation61_spill] sm:$0xff] }
 0x58c   :  { %6876 = vmatprep.subr.bf16.mxu0 %v11417_v14  ;;  %6908 = vmatprep.subr.bf16.mxu1 %v11418_v40  ;;  %v11428_v14 = vld [vmem:[#allocation62_spill] sm:$0xff]  ;;  %v11429_v40 = vld [vmem:[#allocation63_spill] sm:$0xff] }
 0x58f   :  { %6878 = vmatpush1.bf16.msra.mxu0 %v11419_v47  ;;  %6910 = vmatpush1.bf16.msra.mxu1 %v11420_v50  ;;  %v11430_v47 = vld [vmem:[#allocation64_spill] sm:$0xff]  ;;  %v11431_v50 = vld [vmem:[#allocation65_spill] sm:$0xff] }
 0x590   :  { %6880 = vmatprep.subr.bf16.mxu0 %v11421_v28  ;;  %6912 = vmatprep.subr.bf16.mxu1 %v11422_v11  ;;  %v11432_v28 = vld [vmem:[#allocation66_spill] sm:$0xff]  ;;  %v11433_v11 = vld [vmem:[#allocation67_spill] sm:$0xff] }
 0x593   :  { %6882 = vmatpush1.bf16.msra.mxu0 %v11423_v38  ;;  %6914 = vmatpush1.bf16.msra.mxu1 %v11424_v55  ;;  %v11434_v38 = vld [vmem:[#allocation68_spill] sm:$0xff] }
 0x594   :  { %6884 = vmatprep.subr.bf16.mxu0 %v11425_v51  ;;  %6916 = vmatprep.subr.bf16.mxu1 %v11426_v37 }
 0x597   :  { %6886 = vmatpush1.bf16.msra.mxu0 %v11427_v63  ;;  %6918 = vmatpush1.bf16.msra.mxu1 %v11428_v14 }
 0x598   :  { %6888 = vmatprep.subr.bf16.mxu0 %v11429_v40  ;;  %6920 = vmatprep.subr.bf16.mxu1 %v11430_v47  ;;  %v11437_v40 = vld [vmem:[#allocation100_spill] sm:$0xff] }
 0x59b   :  { %6890 = vmatpush1.bf16.msra.mxu0 %v11431_v50  ;;  %6922 = vmatpush1.bf16.msra.mxu1 %v11432_v28 }
 0x59c   :  { %6924 = vmatprep.subr.bf16.mxu0 %v11433_v11  ;;  %6956 = vmatprep.subr.bf16.mxu1 %v11434_v38 }
 0x630   :  { %v3028_v55 = vpop.f32.mrb[44].mxu0  ;;  %v3105_v51 = vpop.f32.mrb[44].mxu1 }
 0x631   :  { %v7683_v37 = vadd.f32 %v3028_v55, %v11435_v62  ;;  %v7687_v63 = vadd.f32 %v3105_v51, %v11436_v0  ;;  %v3030_v27 = vpop.f32.mrb[45].mxu0  ;;  %v10257_v14 = vpop.f32.mrb[45].mxu1 }
 0x632   :  { %v7684_v31 = vadd.f32 %v3030_v27, %v11437_v40 }
 0x633   :  { %v5819_v47 = vmul.f32 -1.442695, %v7683_v37  ;;  %v5821_v53 = vmul.f32 -1.442695, %v7687_v63 }
 0x634   :  { %v5820_v50 = vmul.f32 -1.442695, %v7684_v31  ;;  %v3034_v43 = vpop.f32.mrb[46].mxu0  ;;  %v3111_v28 = vpop.f32.mrb[46].mxu1 }
 0x635   :  { %8104 = vpow2.f32 %v5819_v47  ;;  %v7685_v11 = vadd.f32 %v3034_v43, %v11435_v62  ;;  %v7689_v38 = vadd.f32 %v3111_v28, %v11436_v0  ;;  %v3036_v49 = vpop.f32.mrb[47].mxu0  ;;  %v10262_v24 = vpop.f32.mrb[47].mxu1 }
 0x636   :  { %8106 = vpow2.f32 %v5821_v53  ;;  %v7686_v55 = vadd.f32 %v3036_v49, %v11437_v40 }
 0x637   :  { %8108 = vpow2.f32 %v5820_v50  ;;  %v5823_v51 = vmul.f32 -1.442695, %v7685_v11  ;;  %v5825_v5 = vmul.f32 -1.442695, %v7689_v38 }
 0x638   :  { %v5824_v27 = vmul.f32 -1.442695, %v7686_v55 }
 0x639   :  { %8110 = vpow2.f32 %v5823_v51 }
 0x63a   :  { %8112 = vpow2.f32 %v5825_v5 }
 0x63b   :  { %8114 = vpow2.f32 %v5824_v27 }
 0x63f   :  { %v8105_v31 = vpop.eup %8104 }
 0x640   :  { %v8107_v63 = vpop.eup %8106  ;;  %v3148_v43 = vadd.f32 1.0, %v8105_v31 }
 0x641   :  { %v8109_v47 = vpop.eup %8108  ;;  %v3150_v37 = vadd.f32 1.0, %v8107_v63 }
 0x642   :  { %v3149_v62 = vadd.f32 1.0, %v8109_v47 }
 0x643   :  { %v8111_v28 = vpop.eup %8110  ;;  %8116 = vrcp.f32 %v3150_v37 }
 0x644   :  { %v8113_v0 = vpop.eup %8112  ;;  %8118 = vrcp.f32 %v3149_v62  ;;  %v3152_v11 = vadd.f32 1.0, %v8111_v28 }
 0x645   :  { %v8115_v41 = vpop.eup %8114  ;;  %v3154_v53 = vadd.f32 1.0, %v8113_v0  ;;  %8120 = vrcp.f32 %v3148_v43 }
 0x646   :  { %v3153_v49 = vadd.f32 1.0, %v8115_v41 }
 0x647   :  { %8122 = vrcp.f32 %v3154_v53 }
 0x648   :  { %8124 = vrcp.f32 %v3153_v49 }
 0x649   :  { %8126 = vrcp.f32 %v3152_v11 }
 0x64d   :  { %v8117_v5 = vpop.eup %8116 }
 0x64e   :  { %v3172_v38 = vmul.f32 2.0, %v8117_v5  ;;  %v8119_v50 = vpop.eup %8118 }
 0x64f   :  { %v8121_v55 = vpop.eup %8120  ;;  %v3176_v28 = vmul.f32 %v8119_v50, %v10111_v26 }
 0x650   :  { %v5827_v51 = vadd.f32 -1.0, %v3172_v38  ;;  %v3263_v27 = vpop.f32.mrb[16].mxu0  ;;  %v3340_v31 = vpop.f32.mrb[16].mxu1 }
 0x651   :  { %v8123_v63 = vpop.eup %8122  ;;  %v7611_v47 = vadd.f32 %v3263_v27, %v11221_v21  ;;  %v7643_v37 = vadd.f32 %v3340_v31, %v11222_v44  ;;  %v3265_v62 = vpop.f32.mrb[17].mxu0 }
 0x652   :  { %v3342_v0 = vpop.f32.mrb[17].mxu1  ;;  %v8125_v43 = vpop.eup %8124  ;;  %v3178_v41 = vmul.f32 %v8121_v55, %v5827_v51  ;;  %v3173_v53 = vmul.f32 2.0, %v8123_v63  ;;  %v7612_v49 = vadd.f32 %v3265_v62, %v11223_v54 }
 0x653   :  { %v5829_v11 = vmul.f32 -1.442695, %v7611_v47  ;;  %v5831_v5 = vmul.f32 -1.442695, %v7643_v37  ;;  %v8127_v25 = vpop.eup %8126  ;;  %v3177_v27 = vmul.f32 %v8125_v43, %v10117_v22  ;;  %v7644_v22 = vadd.f32 %v3342_v0, %v11224_v8 }
 0x654   :  { %v10269_v40 = vadd.f32 %v3178_v41, %v3176_v28  ;;  %v5828_v38 = vadd.f32 -1.0, %v3173_v53  ;;  %v5830_v4 = vmul.f32 -1.442695, %v7612_v49  ;;  %v3269_v36 = vpop.f32.mrb[18].mxu0  ;;  %v3346_v59 = vpop.f32.mrb[18].mxu1 }
 0x655   :  { %v7613_v31 = vadd.f32 %v3269_v36, %v11221_v21  ;;  %v3271_v39 = vpop.f32.mrb[19].mxu0  ;;  %8128 = vpow2.f32 %v5829_v11  ;;  %v7645_v26 = vadd.f32 %v3346_v59, %v11222_v44  ;;  %v3348_v51 = vpop.f32.mrb[19].mxu1  ;;  %v5832_v43 = vmul.f32 -1.442695, %v7644_v22 }
 0x656   :  { %v3179_v55 = vmul.f32 %v8127_v25, %v5828_v38  ;;  %v7614_v50 = vadd.f32 %v3271_v39, %v11223_v54  ;;  %8130 = vpow2.f32 %v5831_v5  ;;  %v7646_v59 = vadd.f32 %v3348_v51, %v11224_v8 }
 0x657   :  { %v5833_v63 = vmul.f32 -1.442695, %v7613_v31  ;;  %8132 = vpow2.f32 %v5830_v4  ;;  %v5835_v47 = vmul.f32 -1.442695, %v7645_v26 }
 0x658   :  { %v5834_v37 = vmul.f32 -1.442695, %v7614_v50  ;;  %v10275_v62 = vadd.f32 %v3179_v55, %v3177_v27  ;;  %v5836_v11 = vmul.f32 -1.442695, %v7646_v59 }
 0x659   :  { %8134 = vpow2.f32 %v5833_v63 }
 0x65a   :  { %8136 = vpow2.f32 %v5835_v47 }
 0x65b   :  { %8138 = vpow2.f32 %v5834_v37 }
 0x65f   :  { %v8129_v36 = vpop.eup %8128 }
 0x660   :  { %v8131_v25 = vpop.eup %8130  ;;  %v3383_v28 = vadd.f32 1.0, %v8129_v36 }
 0x661   :  { %v8133_v41 = vpop.eup %8132  ;;  %v3385_v39 = vadd.f32 1.0, %v8131_v25 }
 0x662   :  { %v3384_v53 = vadd.f32 1.0, %v8133_v41 }
 0x663   :  { %v8135_v49 = vpop.eup %8134  ;;  %8140 = vrcp.f32 %v3385_v39 }
 0x664   :  { %v8137_v4 = vpop.eup %8136  ;;  %8142 = vpow2.f32 %v5832_v43  ;;  %v3387_v0 = vadd.f32 1.0, %v8135_v49 }
 0x665   :  { %v8139_v5 = vpop.eup %8138  ;;  %8144 = vrcp.f32 %v3384_v53  ;;  %v3389_v38 = vadd.f32 1.0, %v8137_v4 }
 0x666   :  { %8146 = vrcp.f32 %v3383_v28  ;;  %v3388_v27 = vadd.f32 1.0, %v8139_v5 }
 0x667   :  { %8148 = vrcp.f32 %v3389_v38 }
 0x668   :  { %8150 = vpow2.f32 %v5836_v11 }
 0x669   :  { %8152 = vrcp.f32 %v3388_v27 }
 0x66a   :  { %8154 = vrcp.f32 %v3387_v0  ;;  %v7690_v0 = vadd.f32 %v10262_v24, %v9810_v52 }
 0x66d   :  { %v8141_v31 = vpop.eup %8140 }
 0x66e   :  { %v8143_v55 = vpop.eup %8142  ;;  %v3407_v26 = vmul.f32 2.0, %v8141_v31 }
 0x66f   :  { %v8145_v50 = vpop.eup %8144  ;;  %v3386_v37 = vadd.f32 1.0, %v8143_v55 }
 0x670   :  { %v8147_v51 = vpop.eup %8146  ;;  %v5837_v63 = vadd.f32 -1.0, %v3407_v26  ;;  %v3411_v25 = vmul.f32 %v8145_v50, %v10122_v12  ;;  %v7688_v12 = vadd.f32 %v10257_v14, %v9810_v52  ;;  %v5826_v14 = vmul.f32 -1.442695, %v7690_v0  ;;  %v11448_v0 = vld [vmem:[#allocation12_spill] sm:$0xff] }
 0x671   :  { %v8149_v47 = vpop.eup %8148  ;;  %8156 = vrcp.f32 %v3386_v37 }
 0x672   :  { %v8151_v22 = vpop.eup %8150  ;;  %v3413_v36 = vmul.f32 %v8147_v51, %v5837_v63  ;;  %v3408_v43 = vmul.f32 2.0, %v8149_v47  ;;  %v5822_v27 = vmul.f32 -1.442695, %v7688_v12  ;;  %v11444_v12 = vld [vmem:[#allocation8_spill] sm:$0xff] }
 0x673   :  { %v8153_v59 = vpop.eup %8152  ;;  %v3390_v53 = vadd.f32 1.0, %v8151_v22  ;;  %v11438_v22 = vld [vmem:[#allocation97_spill] sm:$0xff] }
 0x674   :  { %v10280_v41 = vadd.f32 %v3413_v36, %v3411_v25  ;;  %v5838_v39 = vadd.f32 -1.0, %v3408_v43  ;;  %v8155_v28 = vpop.eup %8154  ;;  %v3412_v4 = vmul.f32 %v8153_v59, %v10126_v18  ;;  %v11439_v36 = vld [vmem:[#allocation98_spill] sm:$0xff]  ;;  %v11440_v43 = vld [vmem:[#allocation3_spill] sm:$0xff]  ;;  %v11441_v59 = vld [vmem:[#allocation4_spill] sm:$0xff] }
 0x676   :  { %8158 = vtanh.f32 %v10280_v41  ;;  %v3414_v49 = vmul.f32 %v8155_v28, %v5838_v39 }
 0x677   :  { %8160 = vrcp.f32 %v3390_v53  ;;  %v11442_v53 = vld [vmem:[#allocation6_spill] sm:$0xff] }
 0x678   :  { %v10284_v11 = vadd.f32 %v3414_v49, %v3412_v4  ;;  %v11443_v49 = vld [vmem:[#allocation5_spill] sm:$0xff] }
 0x67a   :  { %8162 = vtanh.f32 %v10284_v11 }
 0x67b   :  { %v8157_v5 = vpop.eup %8156  ;;  %8164 = vpow2.f32 %v5822_v27  ;;  %v11447_v27 = vld [vmem:[#allocation9_spill] sm:$0xff] }
 0x67c   :  { %8166 = vpow2.f32 %v5826_v14  ;;  %v11451_v14 = vld [vmem:[#allocation13_spill] sm:$0xff] }
 0x67d   :  { %8168 = vtanh.f32 %v10269_v40 }
 0x680   :  { %v8159_v38 = vpop.eup %8158 }
 0x681   :  { %v10291_v31 = vmul.f32 %v8159_v38, %v8157_v5  ;;  %v8161_v55 = vpop.eup %8160  ;;  %v11445_v5 = vld [vmem:[#allocation7_spill] sm:$0xff]  ;;  %v11446_v38 = vld [vmem:[#allocation10_spill] sm:$0xff] }
 0x683   :  { %3486 = vmatmul.mubr.f32.vlgmr.msra.gmra.mrb[48].mxu0 %v10291_v31  ;;  %3563 = vmatmul.mubr.f32.vlgmr.msra.gmra.mrb[48].mxu1 %v10291_v31 }
 0x684   :  { %v8163_v18 = vpop.eup %8162  ;;  %6926 = vmatpush1.bf16.msra.mxu0 %v11228_v10  ;;  %6958 = vmatpush1.bf16.msra.mxu1 %v9420_v23 }
 0x685   :  { %3491 = vmatprep.mubr.f32.mxu0 %v11172_v30  ;;  %3568 = vmatprep.mubr.f32.mxu1 %v11172_v30  ;;  %v10299_v26 = vmul.f32 %v8163_v18, %v8161_v55  ;;  %v8165_v24 = vpop.eup %8164  ;;  %v11449_v55 = vld [vmem:[#allocation11_spill] sm:$0xff]  ;;  %v11450_v18 = vld [vmem:[#allocation14_spill] sm:$0xff] }
 0x686   :  { %6928 = vmatprep.subr.bf16.mxu0 %v11229_v20  ;;  %6960 = vmatprep.subr.bf16.mxu1 %v11230_v1  ;;  %v3151_v50 = vadd.f32 1.0, %v8165_v24  ;;  %v8167_v51 = vpop.eup %8166  ;;  %v11452_v24 = vld [vmem:[#allocation16_spill] sm:$0xff] }
 0x687   :  { %3492 = vmatmul.mubr.f32.gmra.mrb[50].mxu0 %v10299_v26  ;;  %3569 = vmatmul.mubr.f32.gmra.mrb[50].mxu1 %v10299_v26  ;;  %v3155_v63 = vadd.f32 1.0, %v8167_v51  ;;  %v8169_v47 = vpop.eup %8168  ;;  %v11454_v51 = vld [vmem:[#allocation18_spill] sm:$0xff] }
 0x688   :  { %6930 = vmatpush1.bf16.msra.mxu0 %v11231_v19  ;;  %6962 = vmatpush1.bf16.msra.mxu1 %v11232_v58  ;;  %8170 = vrcp.f32 %v3151_v50  ;;  %v11453_v50 = vld [vmem:[#allocation15_spill] sm:$0xff] }
 0x689   :  { %6932 = vmatprep.subr.bf16.mxu0 %v11233_v17  ;;  %6964 = vmatprep.subr.bf16.mxu1 %v11234_v42  ;;  %8172 = vtanh.f32 %v10275_v62 }
 0x68a   :  { %3639 = vmatprep.mubr.f32.mxu0 %v11172_v30  ;;  %3716 = vmatprep.mubr.f32.mxu1 %v11172_v30  ;;  %8174 = vrcp.f32 %v3155_v63  ;;  %v11455_v63 = vld [vmem:[#allocation17_spill] sm:$0xff] }
 0x68c   :  { %6934 = vmatpush1.bf16.msra.mxu0 %v11235_v57  ;;  %6966 = vmatpush1.bf16.msra.mxu1 %v11236_v15 }
 0x68d   :  { %6936 = vmatprep.subr.bf16.mxu0 %v11237_v56  ;;  %6968 = vmatprep.subr.bf16.mxu1 %v11296_v13 }
 0x690   :  { %6938 = vmatpush1.bf16.msra.mxu0 %v11297_v46  ;;  %6970 = vmatpush1.bf16.msra.mxu1 %v11240_v3 }
 0x691   :  { %6940 = vmatprep.subr.bf16.mxu0 %v11298_v33  ;;  %6972 = vmatprep.subr.bf16.mxu1 %v11242_v35 }
 0x692   :  { %v8171_v37 = vpop.eup %8170 }
 0x693   :  { %v3184_v25 = vmul.f32 %v8171_v37, %v8169_v47  ;;  %v8173_v39 = vpop.eup %8172  ;;  %v11456_v47 = vld [vmem:[#allocation20_spill] sm:$0xff]  ;;  %v11457_v37 = vld [vmem:[#allocation19_spill] sm:$0xff] }
 0x694   :  { %6942 = vmatpush1.bf16.msra.mxu0 %v11243_v9  ;;  %6974 = vmatpush1.bf16.msra.mxu1 %v11244_v2  ;;  %v8175_v28 = vpop.eup %8174 }
 0x695   :  { %6944 = vmatprep.subr.bf16.mxu0 %v11245_v29  ;;  %6976 = vmatprep.subr.bf16.mxu1 %v11246_v34  ;;  %v3185_v4 = vmul.f32 %v8175_v28, %v8173_v39  ;;  %v11459_v39 = vld [vmem:[#allocation21_spill] sm:$0xff]  ;;  %v11460_v28 = vld [vmem:[#allocation24_spill] sm:$0xff] }
 0x698   :  { %6946 = vmatpush1.bf16.msra.mxu0 %v9608_v48  ;;  %6978 = vmatpush1.bf16.msra.mxu1 %v11247_v16 }
 0x699   :  { %6948 = vmatprep.subr.bf16.mxu0 %v9620_v7  ;;  %6980 = vmatprep.subr.bf16.mxu1 %v9622_v6 }
 0x69c   :  { %6950 = vmatpush1.bf16.msra.mxu0 %v11299_v45  ;;  %6982 = vmatpush1.bf16.msra.mxu1 %v9646_v32 }
 0x69d   :  { %6952 = vmatprep.subr.bf16.mxu0 %v9653_v61  ;;  %6984 = vmatprep.subr.bf16.mxu1 %v9655_v60 }
 0x6a0   :  { %6954 = vmatpush1.bf16.msra.mxu0 %v11438_v22  ;;  %6986 = vmatpush1.bf16.msra.mxu1 %v11439_v36 }
 0x6a1   :  { %6988 = vmatprep.subr.bf16.mxu0 %v11440_v43  ;;  %7020 = vmatprep.subr.bf16.mxu1 %v11441_v59 }
 0x6a3   :  { %3640 = vmatmul.mubr.f32.vlgmr.msra.gmra.mrb[48].mxu0 %v3184_v25  ;;  %3717 = vmatmul.mubr.f32.vlgmr.msra.gmra.mrb[48].mxu1 %v3184_v25  ;;  %v11458_v25 = vld [vmem:[#allocation22_spill] sm:$0xff] }
 0x6a4   :  { %6990 = vmatpush1.bf16.msra.mxu0 %v11442_v53  ;;  %7022 = vmatpush1.bf16.msra.mxu1 %v11443_v49 }
 0x6a5   :  { %3645 = vmatprep.mubr.f32.mxu0 %v11172_v30  ;;  %3722 = vmatprep.mubr.f32.mxu1 %v11172_v30 }
 0x6a6   :  { %6992 = vmatprep.subr.bf16.mxu0 %v11444_v12  ;;  %7024 = vmatprep.subr.bf16.mxu1 %v11445_v5 }
 0x6a7   :  { %3646 = vmatmul.mubr.f32.gmra.mrb[50].mxu0 %v3185_v4  ;;  %3723 = vmatmul.mubr.f32.gmra.mrb[50].mxu1 %v3185_v4  ;;  %v11461_v4 = vld [vmem:[#allocation23_spill] sm:$0xff] }
 0x6a8   :  { %6994 = vmatpush1.bf16.msra.mxu0 %v11446_v38  ;;  %7026 = vmatpush1.bf16.msra.mxu1 %v11447_v27 }
 0x6a9   :  { %6996 = vmatprep.subr.bf16.mxu0 %v11448_v0  ;;  %7028 = vmatprep.subr.bf16.mxu1 %v11449_v55 }
 0x6aa   :  { %3874 = vmatprep.mubr.f32.mxu0 %v11172_v30  ;;  %3951 = vmatprep.mubr.f32.mxu1 %v11172_v30 }
 0x6ac   :  { %6998 = vmatpush1.bf16.msra.mxu0 %v11450_v18  ;;  %7030 = vmatpush1.bf16.msra.mxu1 %v11451_v14  ;;  %v11462_v14 = vld [vmem:[#allocation26_spill] sm:$0xff] }
 0x6ad   :  { %7000 = vmatprep.subr.bf16.mxu0 %v11452_v24  ;;  %7032 = vmatprep.subr.bf16.mxu1 %v11453_v50  ;;  %v11463_v24 = vld [vmem:[#allocation25_spill] sm:$0xff]  ;;  %v11464_v50 = vld [vmem:[#allocation28_spill] sm:$0xff] }
 0x6b0   :  { %7002 = vmatpush1.bf16.msra.mxu0 %v11454_v51  ;;  %7034 = vmatpush1.bf16.msra.mxu1 %v11455_v63  ;;  %v11465_v51 = vld [vmem:[#allocation27_spill] sm:$0xff]  ;;  %v11466_v63 = vld [vmem:[#allocation30_spill] sm:$0xff] }
 0x6b1   :  { %7004 = vmatprep.subr.bf16.mxu0 %v11456_v47  ;;  %7036 = vmatprep.subr.bf16.mxu1 %v11457_v37  ;;  %v11467_v47 = vld [vmem:[#allocation29_spill] sm:$0xff]  ;;  %v11468_v37 = vld [vmem:[#allocation32_spill] sm:$0xff] }
 0x6b4   :  { %7006 = vmatpush1.bf16.msra.mxu0 %v11458_v25  ;;  %7038 = vmatpush1.bf16.msra.mxu1 %v11459_v39  ;;  %v11469_v25 = vld [vmem:[#allocation31_spill] sm:$0xff]  ;;  %v11470_v39 = vld [vmem:[#allocation34_spill] sm:$0xff] }
 0x6b5   :  { %7008 = vmatprep.subr.bf16.mxu0 %v11460_v28  ;;  %7040 = vmatprep.subr.bf16.mxu1 %v11461_v4  ;;  %v11471_v28 = vld [vmem:[#allocation33_spill] sm:$0xff]  ;;  %v11472_v4 = vld [vmem:[#allocation35_spill] sm:$0xff] }
 0x6b8   :  { %7010 = vmatpush1.bf16.msra.mxu0 %v11462_v14  ;;  %7042 = vmatpush1.bf16.msra.mxu1 %v11463_v24  ;;  %v11473_v14 = vld [vmem:[#allocation36_spill] sm:$0xff]  ;;  %v11507_v24 = vld [vmem:[#allocation99_spill] sm:$0xff] }
 0x6b9   :  { %7012 = vmatprep.subr.bf16.mxu0 %v11464_v50  ;;  %7044 = vmatprep.subr.bf16.mxu1 %v11465_v51  ;;  %v11488_v51 = vld [vmem:[#allocation51_spill] sm:$0xff]  ;;  %v11506_v50 = vld [vmem:[#allocation69_spill] sm:$0xff] }
 0x6bc   :  { %7014 = vmatpush1.bf16.msra.mxu0 %v11466_v63  ;;  %7046 = vmatpush1.bf16.msra.mxu1 %v11467_v47  ;;  %v11474_v47 = vld [vmem:[#allocation37_spill] sm:$0xff]  ;;  %v11487_v63 = vld [vmem:[#allocation50_spill] sm:$0xff] }
 0x6bd   :  { %7016 = vmatprep.subr.bf16.mxu0 %v11468_v37  ;;  %7048 = vmatprep.subr.bf16.mxu1 %v11469_v25  ;;  %v11475_v37 = vld [vmem:[#allocation38_spill] sm:$0xff]  ;;  %v11476_v25 = vld [vmem:[#allocation39_spill] sm:$0xff] }
 0x6c0   :  { %7018 = vmatpush1.bf16.msra.mxu0 %v11470_v39  ;;  %7050 = vmatpush1.bf16.msra.mxu1 %v11471_v28  ;;  %v11477_v39 = vld [vmem:[#allocation40_spill] sm:$0xff] }
 0x6c1   :  { %7052 = vmatprep.subr.bf16.mxu0 %v11472_v4  ;;  %7084 = vmatprep.subr.bf16.mxu1 %v11473_v14  ;;  %v11479_v14 = vld [vmem:[#allocation42_spill] sm:$0xff]  ;;  %v11480_v4 = vld [vmem:[#allocation43_spill] sm:$0xff]  ;;  %v11485_v28 = vld [vmem:[#allocation48_spill] sm:$0xff] }
 0x6c3   :  { %3875 = vmatmul.mubr.f32.vlgmr.msra.gmra.mrb[20].mxu0 %v10291_v31  ;;  %3952 = vmatmul.mubr.f32.vlgmr.msra.gmra.mrb[20].mxu1 %v10291_v31  ;;  %v11478_v31 = vld [vmem:[#allocation41_spill] sm:$0xff] }
 0x6c4   :  { %3880 = vmatprep.mubr.f32.mxu0 %v11172_v30  ;;  %3957 = vmatprep.mubr.f32.mxu1 %v11172_v30 }
 0x6c5   :  { %7054 = vmatpush1.bf16.msra.mxu0 %v11474_v47  ;;  %7086 = vmatpush1.bf16.msra.mxu1 %v11475_v37  ;;  %v11481_v47 = vld [vmem:[#allocation44_spill] sm:$0xff]  ;;  %v11482_v37 = vld [vmem:[#allocation45_spill] sm:$0xff] }
 0x6c6   :  { %7056 = vmatprep.subr.bf16.mxu0 %v11476_v25  ;;  %7088 = vmatprep.subr.bf16.mxu1 %v11477_v39  ;;  %v11483_v25 = vld [vmem:[#allocation46_spill] sm:$0xff]  ;;  %v11484_v39 = vld [vmem:[#allocation47_spill] sm:$0xff] }
 0x6c7   :  { %3881 = vmatmul.mubr.f32.gmra.mrb[22].mxu0 %v10299_v26  ;;  %3958 = vmatmul.mubr.f32.gmra.mrb[22].mxu1 %v10299_v26  ;;  %v11486_v26 = vld [vmem:[#allocation49_spill] sm:$0xff] }
 0x6c8   :  { %4098 = vmatprep.mubr.f32.mxu0 %v11172_v30  ;;  %4175 = vmatprep.mubr.f32.mxu1 %v11172_v30 }
 0x6c9   :  { %7058 = vmatpush1.bf16.msra.mxu0 %v11478_v31  ;;  %7090 = vmatpush1.bf16.msra.mxu1 %v11479_v14  ;;  %v11489_v31 = vld [vmem:[#allocation52_spill] sm:$0xff]  ;;  %v11490_v14 = vld [vmem:[#allocation53_spill] sm:$0xff] }
 0x6ca   :  { %7060 = vmatprep.subr.bf16.mxu0 %v11480_v4  ;;  %7092 = vmatprep.subr.bf16.mxu1 %v11481_v47  ;;  %v11491_v4 = vld [vmem:[#allocation54_spill] sm:$0xff]  ;;  %v11492_v47 = vld [vmem:[#allocation55_spill] sm:$0xff] }
 0x6cd   :  { %7062 = vmatpush1.bf16.msra.mxu0 %v11482_v37  ;;  %7094 = vmatpush1.bf16.msra.mxu1 %v11483_v25  ;;  %v11493_v37 = vld [vmem:[#allocation56_spill] sm:$0xff]  ;;  %v11494_v25 = vld [vmem:[#allocation57_spill] sm:$0xff] }
 0x6ce   :  { %7064 = vmatprep.subr.bf16.mxu0 %v11484_v39  ;;  %7096 = vmatprep.subr.bf16.mxu1 %v11485_v28  ;;  %v11495_v39 = vld [vmem:[#allocation58_spill] sm:$0xff]  ;;  %v11496_v28 = vld [vmem:[#allocation59_spill] sm:$0xff] }
 0x6d1   :  { %7066 = vmatpush1.bf16.msra.mxu0 %v11486_v26  ;;  %7098 = vmatpush1.bf16.msra.mxu1 %v11487_v63  ;;  %v11497_v26 = vld [vmem:[#allocation60_spill] sm:$0xff]  ;;  %v11498_v63 = vld [vmem:[#allocation61_spill] sm:$0xff] }
 0x6d2   :  { %7068 = vmatprep.subr.bf16.mxu0 %v11488_v51  ;;  %7100 = vmatprep.subr.bf16.mxu1 %v11489_v31  ;;  %v11499_v51 = vld [vmem:[#allocation62_spill] sm:$0xff]  ;;  %v11500_v31 = vld [vmem:[#allocation63_spill] sm:$0xff] }
 0x6d5   :  { %7070 = vmatpush1.bf16.msra.mxu0 %v11490_v14  ;;  %7102 = vmatpush1.bf16.msra.mxu1 %v11491_v4  ;;  %v11501_v14 = vld [vmem:[#allocation64_spill] sm:$0xff]  ;;  %v11502_v4 = vld [vmem:[#allocation65_spill] sm:$0xff] }
 0x6d6   :  { %7072 = vmatprep.subr.bf16.mxu0 %v11492_v47  ;;  %7104 = vmatprep.subr.bf16.mxu1 %v11493_v37  ;;  %v11503_v47 = vld [vmem:[#allocation66_spill] sm:$0xff]  ;;  %v11504_v37 = vld [vmem:[#allocation67_spill] sm:$0xff] }
 0x6d9   :  { %7074 = vmatpush1.bf16.msra.mxu0 %v11494_v25  ;;  %7106 = vmatpush1.bf16.msra.mxu1 %v11495_v39  ;;  %v11505_v25 = vld [vmem:[#allocation68_spill] sm:$0xff] }
 0x6da   :  { %7076 = vmatprep.subr.bf16.mxu0 %v11496_v28  ;;  %7108 = vmatprep.subr.bf16.mxu1 %v11497_v26 }
 0x6dd   :  { %7078 = vmatpush1.bf16.msra.mxu0 %v11498_v63  ;;  %7110 = vmatpush1.bf16.msra.mxu1 %v11499_v51 }
 0x6de   :  { %7080 = vmatprep.subr.bf16.mxu0 %v11500_v31  ;;  %7112 = vmatprep.subr.bf16.mxu1 %v11501_v14  ;;  %v11508_v31 = vld [vmem:[#allocation100_spill] sm:$0xff] }
 0x6e1   :  { %7082 = vmatpush1.bf16.msra.mxu0 %v11502_v4  ;;  %7114 = vmatpush1.bf16.msra.mxu1 %v11503_v47 }
 0x6e2   :  { %7116 = vmatprep.subr.bf16.mxu0 %v11504_v37  ;;  %7148 = vmatprep.subr.bf16.mxu1 %v11505_v25 }
 0x776   :  { %v3641_v39 = vpop.f32.mrb[48].mxu0  ;;  %v3718_v28 = vpop.f32.mrb[48].mxu1 }
 0x777   :  { %v7691_v26 = vadd.f32 %v3641_v39, %v11506_v50  ;;  %v7695_v63 = vadd.f32 %v3718_v28, %v11507_v24  ;;  %v3643_v18 = vpop.f32.mrb[49].mxu0  ;;  %v10415_v51 = vpop.f32.mrb[49].mxu1 }
 0x778   :  { %v7692_v55 = vadd.f32 %v3643_v18, %v11508_v31 }
 0x779   :  { %v5839_v14 = vmul.f32 -1.442695, %v7691_v26  ;;  %v5841_v0 = vmul.f32 -1.442695, %v7695_v63 }
 0x77a   :  { %v5840_v4 = vmul.f32 -1.442695, %v7692_v55  ;;  %v3647_v27 = vpop.f32.mrb[50].mxu0  ;;  %v3724_v47 = vpop.f32.mrb[50].mxu1 }
 0x77b   :  { %8176 = vpow2.f32 %v5839_v14  ;;  %v7693_v37 = vadd.f32 %v3647_v27, %v11506_v50  ;;  %v7697_v25 = vadd.f32 %v3724_v47, %v11507_v24  ;;  %v3649_v38 = vpop.f32.mrb[51].mxu0  ;;  %v10420_v5 = vpop.f32.mrb[51].mxu1 }
 0x77c   :  { %8178 = vpow2.f32 %v5841_v0  ;;  %v7694_v39 = vadd.f32 %v3649_v38, %v11508_v31 }
 0x77d   :  { %8180 = vpow2.f32 %v5840_v4  ;;  %v5843_v28 = vmul.f32 -1.442695, %v7693_v37  ;;  %v5845_v12 = vmul.f32 -1.442695, %v7697_v25 }
 0x77e   :  { %v5844_v18 = vmul.f32 -1.442695, %v7694_v39 }
 0x77f   :  { %8182 = vpow2.f32 %v5843_v28 }
 0x780   :  { %8184 = vpow2.f32 %v5845_v12 }
 0x781   :  { %8186 = vpow2.f32 %v5844_v18 }
 0x785   :  { %v8177_v55 = vpop.eup %8176 }
 0x786   :  { %v8179_v63 = vpop.eup %8178  ;;  %v3761_v27 = vadd.f32 1.0, %v8177_v55 }
 0x787   :  { %v8181_v14 = vpop.eup %8180  ;;  %v3763_v26 = vadd.f32 1.0, %v8179_v63 }
 0x788   :  { %v3762_v50 = vadd.f32 1.0, %v8181_v14 }
 0x789   :  { %v8183_v47 = vpop.eup %8182  ;;  %8188 = vrcp.f32 %v3763_v26 }
 0x78a   :  { %v8185_v24 = vpop.eup %8184  ;;  %8190 = vrcp.f32 %v3762_v50  ;;  %v3765_v37 = vadd.f32 1.0, %v8183_v47 }
 0x78b   :  { %v8187_v49 = vpop.eup %8186  ;;  %v3767_v0 = vadd.f32 1.0, %v8185_v24  ;;  %8192 = vrcp.f32 %v3761_v27 }
 0x78c   :  { %v3766_v38 = vadd.f32 1.0, %v8187_v49 }
 0x78d   :  { %8194 = vrcp.f32 %v3767_v0 }
 0x78e   :  { %8196 = vrcp.f32 %v3766_v38 }
 0x78f   :  { %8198 = vrcp.f32 %v3765_v37 }
 0x793   :  { %v8189_v12 = vpop.eup %8188 }
 0x794   :  { %v3785_v25 = vmul.f32 2.0, %v8189_v12  ;;  %v8191_v4 = vpop.eup %8190 }
 0x795   :  { %v8193_v39 = vpop.eup %8192  ;;  %v3789_v47 = vmul.f32 %v8191_v4, %v10269_v40 }
 0x796   :  { %v5847_v28 = vadd.f32 -1.0, %v3785_v25  ;;  %v3876_v18 = vpop.f32.mrb[20].mxu0  ;;  %v3953_v55 = vpop.f32.mrb[20].mxu1 }
 0x797   :  { %v8195_v63 = vpop.eup %8194  ;;  %v7615_v14 = vadd.f32 %v3876_v18, %v11221_v21  ;;  %v7647_v26 = vadd.f32 %v3953_v55, %v11222_v44  ;;  %v3878_v50 = vpop.f32.mrb[21].mxu0 }
 0x798   :  { %v3955_v24 = vpop.f32.mrb[21].mxu1  ;;  %v8197_v27 = vpop.eup %8196  ;;  %v3791_v49 = vmul.f32 %v8193_v39, %v5847_v28  ;;  %v3786_v0 = vmul.f32 2.0, %v8195_v63  ;;  %v7616_v38 = vadd.f32 %v3878_v50, %v11223_v54 }
 0x799   :  { %v5849_v37 = vmul.f32 -1.442695, %v7615_v14  ;;  %v5851_v12 = vmul.f32 -1.442695, %v7647_v26  ;;  %v8199_v43 = vpop.eup %8198  ;;  %v3790_v18 = vmul.f32 %v8197_v27, %v10275_v62  ;;  %v7648_v62 = vadd.f32 %v3955_v24, %v11224_v8 }
 0x79a   :  { %v10427_v31 = vadd.f32 %v3791_v49, %v3789_v47  ;;  %v5848_v25 = vadd.f32 -1.0, %v3786_v0  ;;  %v5850_v53 = vmul.f32 -1.442695, %v7616_v38  ;;  %v3882_v59 = vpop.f32.mrb[22].mxu0  ;;  %v3959_v36 = vpop.f32.mrb[22].mxu1 }
 0x79b   :  { %v7617_v55 = vadd.f32 %v3882_v59, %v11221_v21  ;;  %v3884_v22 = vpop.f32.mrb[23].mxu0  ;;  %8200 = vpow2.f32 %v5849_v37  ;;  %v7649_v40 = vadd.f32 %v3959_v36, %v11222_v44  ;;  %v3961_v28 = vpop.f32.mrb[23].mxu1  ;;  %v5852_v27 = vmul.f32 -1.442695, %v7648_v62 }
 0x79c   :  { %v3792_v39 = vmul.f32 %v8199_v43, %v5848_v25  ;;  %v7618_v4 = vadd.f32 %v3884_v22, %v11223_v54  ;;  %8202 = vpow2.f32 %v5851_v12  ;;  %v7650_v36 = vadd.f32 %v3961_v28, %v11224_v8 }
 0x79d   :  { %v5853_v63 = vmul.f32 -1.442695, %v7617_v55  ;;  %8204 = vpow2.f32 %v5850_v53  ;;  %v5855_v14 = vmul.f32 -1.442695, %v7649_v40 }
 0x79e   :  { %v5854_v26 = vmul.f32 -1.442695, %v7618_v4  ;;  %v10433_v50 = vadd.f32 %v3792_v39, %v3790_v18  ;;  %v5856_v37 = vmul.f32 -1.442695, %v7650_v36 }
 0x79f   :  { %8206 = vpow2.f32 %v5853_v63 }
 0x7a0   :  { %8208 = vpow2.f32 %v5855_v14 }
 0x7a1   :  { %8210 = vpow2.f32 %v5854_v26 }
 0x7a5   :  { %v8201_v59 = vpop.eup %8200 }
 0x7a6   :  { %v8203_v43 = vpop.eup %8202  ;;  %v3996_v47 = vadd.f32 1.0, %v8201_v59 }
 0x7a7   :  { %v8205_v49 = vpop.eup %8204  ;;  %v3998_v22 = vadd.f32 1.0, %v8203_v43 }
 0x7a8   :  { %v3997_v0 = vadd.f32 1.0, %v8205_v49 }
 0x7a9   :  { %v8207_v38 = vpop.eup %8206  ;;  %8212 = vrcp.f32 %v3998_v22 }
 0x7aa   :  { %v8209_v53 = vpop.eup %8208  ;;  %8214 = vpow2.f32 %v5852_v27  ;;  %v4000_v24 = vadd.f32 1.0, %v8207_v38 }
 0x7ab   :  { %v8211_v12 = vpop.eup %8210  ;;  %8216 = vrcp.f32 %v3997_v0  ;;  %v4002_v25 = vadd.f32 1.0, %v8209_v53 }
 0x7ac   :  { %8218 = vrcp.f32 %v3996_v47  ;;  %v4001_v18 = vadd.f32 1.0, %v8211_v12 }
 0x7ad   :  { %8220 = vrcp.f32 %v4002_v25 }
 0x7ae   :  { %8222 = vpow2.f32 %v5856_v37 }
 0x7af   :  { %8224 = vrcp.f32 %v4001_v18 }
 0x7b0   :  { %8226 = vrcp.f32 %v4000_v24  ;;  %v7698_v24 = vadd.f32 %v10420_v5, %v9810_v52 }
 0x7b3   :  { %v8213_v55 = vpop.eup %8212 }
 0x7b4   :  { %v8215_v39 = vpop.eup %8214  ;;  %v4020_v40 = vmul.f32 2.0, %v8213_v55 }
 0x7b5   :  { %v8217_v4 = vpop.eup %8216  ;;  %v3999_v26 = vadd.f32 1.0, %v8215_v39 }
 0x7b6   :  { %v8219_v28 = vpop.eup %8218  ;;  %v5857_v63 = vadd.f32 -1.0, %v4020_v40  ;;  %v4024_v43 = vmul.f32 %v8217_v4, %v10280_v41  ;;  %v7696_v41 = vadd.f32 %v10415_v51, %v9810_v52  ;;  %v5846_v51 = vmul.f32 -1.442695, %v7698_v24  ;;  %v11519_v24 = vld [vmem:[#allocation12_spill] sm:$0xff] }
 0x7b7   :  { %v8221_v14 = vpop.eup %8220  ;;  %8228 = vrcp.f32 %v3999_v26 }
 0x7b8   :  { %v8223_v62 = vpop.eup %8222  ;;  %v4026_v59 = vmul.f32 %v8219_v28, %v5857_v63  ;;  %v4021_v27 = vmul.f32 2.0, %v8221_v14  ;;  %v5842_v18 = vmul.f32 -1.442695, %v7696_v41  ;;  %v11515_v41 = vld [vmem:[#allocation8_spill] sm:$0xff] }
 0x7b9   :  { %v8225_v36 = vpop.eup %8224  ;;  %v4003_v0 = vadd.f32 1.0, %v8223_v62  ;;  %v11509_v62 = vld [vmem:[#allocation97_spill] sm:$0xff] }
 0x7ba   :  { %v10438_v49 = vadd.f32 %v4026_v59, %v4024_v43  ;;  %v5858_v22 = vadd.f32 -1.0, %v4021_v27  ;;  %v8227_v47 = vpop.eup %8226  ;;  %v4025_v53 = vmul.f32 %v8225_v36, %v10284_v11  ;;  %v11510_v59 = vld [vmem:[#allocation98_spill] sm:$0xff]  ;;  %v11511_v27 = vld [vmem:[#allocation3_spill] sm:$0xff]  ;;  %v11512_v36 = vld [vmem:[#allocation4_spill] sm:$0xff] }
 0x7bc   :  { %8230 = vtanh.f32 %v10438_v49  ;;  %v4027_v38 = vmul.f32 %v8227_v47, %v5858_v22 }
 0x7bd   :  { %8232 = vrcp.f32 %v4003_v0  ;;  %v11513_v0 = vld [vmem:[#allocation6_spill] sm:$0xff] }
 0x7be   :  { %v10442_v37 = vadd.f32 %v4027_v38, %v4025_v53  ;;  %v11514_v38 = vld [vmem:[#allocation5_spill] sm:$0xff] }
 0x7c0   :  { %8234 = vtanh.f32 %v10442_v37 }
 0x7c1   :  { %v8229_v12 = vpop.eup %8228  ;;  %8236 = vpow2.f32 %v5842_v18  ;;  %v11518_v18 = vld [vmem:[#allocation9_spill] sm:$0xff] }
 0x7c2   :  { %8238 = vpow2.f32 %v5846_v51  ;;  %v11522_v51 = vld [vmem:[#allocation13_spill] sm:$0xff] }
 0x7c3   :  { %8240 = vtanh.f32 %v10427_v31 }
 0x7c6   :  { %v8231_v25 = vpop.eup %8230 }
 0x7c7   :  { %v10449_v55 = vmul.f32 %v8231_v25, %v8229_v12  ;;  %v8233_v39 = vpop.eup %8232  ;;  %v11516_v12 = vld [vmem:[#allocation7_spill] sm:$0xff]  ;;  %v11517_v25 = vld [vmem:[#allocation10_spill] sm:$0xff] }
 0x7c9   :  { %4099 = vmatmul.mubr.f32.vlgmr.msra.gmra.mrb[52].mxu0 %v10449_v55  ;;  %4176 = vmatmul.mubr.f32.vlgmr.msra.gmra.mrb[52].mxu1 %v10449_v55 }
 0x7ca   :  { %v8235_v11 = vpop.eup %8234  ;;  %7118 = vmatpush1.bf16.msra.mxu0 %v11228_v10  ;;  %7150 = vmatpush1.bf16.msra.mxu1 %v9420_v23 }
 0x7cb   :  { %4104 = vmatprep.mubr.f32.mxu0 %v11172_v30  ;;  %4181 = vmatprep.mubr.f32.mxu1 %v11172_v30  ;;  %v10457_v40 = vmul.f32 %v8235_v11, %v8233_v39  ;;  %v8237_v5 = vpop.eup %8236  ;;  %v11520_v39 = vld [vmem:[#allocation11_spill] sm:$0xff]  ;;  %v11521_v11 = vld [vmem:[#allocation14_spill] sm:$0xff] }
 0x7cc   :  { %7120 = vmatprep.subr.bf16.mxu0 %v11229_v20  ;;  %7152 = vmatprep.subr.bf16.mxu1 %v11230_v1  ;;  %v3764_v4 = vadd.f32 1.0, %v8237_v5  ;;  %v8239_v28 = vpop.eup %8238  ;;  %v11523_v5 = vld [vmem:[#allocation16_spill] sm:$0xff] }
 0x7cd   :  { %4105 = vmatmul.mubr.f32.gmra.mrb[54].mxu0 %v10457_v40  ;;  %4182 = vmatmul.mubr.f32.gmra.mrb[54].mxu1 %v10457_v40  ;;  %v3768_v63 = vadd.f32 1.0, %v8239_v28  ;;  %v8241_v14 = vpop.eup %8240  ;;  %v11525_v28 = vld [vmem:[#allocation18_spill] sm:$0xff] }
 0x7ce   :  { %7122 = vmatpush1.bf16.msra.mxu0 %v11231_v19  ;;  %7154 = vmatpush1.bf16.msra.mxu1 %v11232_v58  ;;  %8242 = vrcp.f32 %v3764_v4  ;;  %v11524_v4 = vld [vmem:[#allocation15_spill] sm:$0xff] }
 0x7cf   :  { %7124 = vmatprep.subr.bf16.mxu0 %v11233_v17  ;;  %7156 = vmatprep.subr.bf16.mxu1 %v11234_v42  ;;  %8244 = vtanh.f32 %v10433_v50 }
 0x7d0   :  { %4252 = vmatprep.mubr.f32.mxu0 %v11172_v30  ;;  %4329 = vmatprep.mubr.f32.mxu1 %v11172_v30  ;;  %8246 = vrcp.f32 %v3768_v63  ;;  %v11526_v63 = vld [vmem:[#allocation17_spill] sm:$0xff] }
 0x7d2   :  { %7126 = vmatpush1.bf16.msra.mxu0 %v11235_v57  ;;  %7158 = vmatpush1.bf16.msra.mxu1 %v11236_v15 }
 0x7d3   :  { %7128 = vmatprep.subr.bf16.mxu0 %v11237_v56  ;;  %7160 = vmatprep.subr.bf16.mxu1 %v11296_v13 }
 0x7d6   :  { %7130 = vmatpush1.bf16.msra.mxu0 %v11297_v46  ;;  %7162 = vmatpush1.bf16.msra.mxu1 %v11240_v3 }
 0x7d7   :  { %7132 = vmatprep.subr.bf16.mxu0 %v11298_v33  ;;  %7164 = vmatprep.subr.bf16.mxu1 %v11242_v35 }
 0x7d8   :  { %v8243_v26 = vpop.eup %8242 }
 0x7d9   :  { %v3797_v43 = vmul.f32 %v8243_v26, %v8241_v14  ;;  %v8245_v22 = vpop.eup %8244  ;;  %v11527_v14 = vld [vmem:[#allocation20_spill] sm:$0xff]  ;;  %v11528_v26 = vld [vmem:[#allocation19_spill] sm:$0xff] }
 0x7da   :  { %7134 = vmatpush1.bf16.msra.mxu0 %v11243_v9  ;;  %7166 = vmatpush1.bf16.msra.mxu1 %v11244_v2  ;;  %v8247_v47 = vpop.eup %8246 }
 0x7db   :  { %7136 = vmatprep.subr.bf16.mxu0 %v11245_v29  ;;  %7168 = vmatprep.subr.bf16.mxu1 %v11246_v34  ;;  %v3798_v53 = vmul.f32 %v8247_v47, %v8245_v22  ;;  %v11530_v22 = vld [vmem:[#allocation21_spill] sm:$0xff]  ;;  %v11531_v47 = vld [vmem:[#allocation24_spill] sm:$0xff] }
 0x7de   :  { %7138 = vmatpush1.bf16.msra.mxu0 %v9608_v48  ;;  %7170 = vmatpush1.bf16.msra.mxu1 %v11247_v16 }
 0x7df   :  { %7140 = vmatprep.subr.bf16.mxu0 %v9620_v7  ;;  %7172 = vmatprep.subr.bf16.mxu1 %v9622_v6 }
 0x7e2   :  { %7142 = vmatpush1.bf16.msra.mxu0 %v11299_v45  ;;  %7174 = vmatpush1.bf16.msra.mxu1 %v9646_v32 }
 0x7e3   :  { %7144 = vmatprep.subr.bf16.mxu0 %v9653_v61  ;;  %7176 = vmatprep.subr.bf16.mxu1 %v9655_v60 }
 0x7e6   :  { %7146 = vmatpush1.bf16.msra.mxu0 %v11509_v62  ;;  %7178 = vmatpush1.bf16.msra.mxu1 %v11510_v59 }
 0x7e7   :  { %7180 = vmatprep.subr.bf16.mxu0 %v11511_v27  ;;  %7212 = vmatprep.subr.bf16.mxu1 %v11512_v36 }
 0x7e9   :  { %4253 = vmatmul.mubr.f32.vlgmr.msra.gmra.mrb[52].mxu0 %v3797_v43  ;;  %4330 = vmatmul.mubr.f32.vlgmr.msra.gmra.mrb[52].mxu1 %v3797_v43  ;;  %v11529_v43 = vld [vmem:[#allocation22_spill] sm:$0xff] }
 0x7ea   :  { %7182 = vmatpush1.bf16.msra.mxu0 %v11513_v0  ;;  %7214 = vmatpush1.bf16.msra.mxu1 %v11514_v38 }
 0x7eb   :  { %4258 = vmatprep.mubr.f32.mxu0 %v11172_v30  ;;  %4335 = vmatprep.mubr.f32.mxu1 %v11172_v30 }
 0x7ec   :  { %7184 = vmatprep.subr.bf16.mxu0 %v11515_v41  ;;  %7216 = vmatprep.subr.bf16.mxu1 %v11516_v12 }
 0x7ed   :  { %4259 = vmatmul.mubr.f32.gmra.mrb[54].mxu0 %v3798_v53  ;;  %4336 = vmatmul.mubr.f32.gmra.mrb[54].mxu1 %v3798_v53  ;;  %v11532_v53 = vld [vmem:[#allocation23_spill] sm:$0xff] }
 0x7ee   :  { %7186 = vmatpush1.bf16.msra.mxu0 %v11517_v25  ;;  %7218 = vmatpush1.bf16.msra.mxu1 %v11518_v18 }
 0x7ef   :  { %7188 = vmatprep.subr.bf16.mxu0 %v11519_v24  ;;  %7220 = vmatprep.subr.bf16.mxu1 %v11520_v39 }
 0x7f0   :  { %4487 = vmatprep.mubr.f32.mxu0 %v11172_v30  ;;  %4564 = vmatprep.mubr.f32.mxu1 %v11172_v30 }
 0x7f2   :  { %7190 = vmatpush1.bf16.msra.mxu0 %v11521_v11  ;;  %7222 = vmatpush1.bf16.msra.mxu1 %v11522_v51  ;;  %v11533_v51 = vld [vmem:[#allocation26_spill] sm:$0xff] }
 0x7f3   :  { %7192 = vmatprep.subr.bf16.mxu0 %v11523_v5  ;;  %7224 = vmatprep.subr.bf16.mxu1 %v11524_v4  ;;  %v11534_v5 = vld [vmem:[#allocation25_spill] sm:$0xff]  ;;  %v11535_v4 = vld [vmem:[#allocation28_spill] sm:$0xff] }
 0x7f6   :  { %7194 = vmatpush1.bf16.msra.mxu0 %v11525_v28  ;;  %7226 = vmatpush1.bf16.msra.mxu1 %v11526_v63  ;;  %v11536_v28 = vld [vmem:[#allocation27_spill] sm:$0xff]  ;;  %v11537_v63 = vld [vmem:[#allocation30_spill] sm:$0xff] }
 0x7f7   :  { %7196 = vmatprep.subr.bf16.mxu0 %v11527_v14  ;;  %7228 = vmatprep.subr.bf16.mxu1 %v11528_v26  ;;  %v11538_v14 = vld [vmem:[#allocation29_spill] sm:$0xff]  ;;  %v11539_v26 = vld [vmem:[#allocation32_spill] sm:$0xff] }
 0x7fa   :  { %7198 = vmatpush1.bf16.msra.mxu0 %v11529_v43  ;;  %7230 = vmatpush1.bf16.msra.mxu1 %v11530_v22  ;;  %v11540_v43 = vld [vmem:[#allocation31_spill] sm:$0xff]  ;;  %v11541_v22 = vld [vmem:[#allocation34_spill] sm:$0xff] }
 0x7fb   :  { %7200 = vmatprep.subr.bf16.mxu0 %v11531_v47  ;;  %7232 = vmatprep.subr.bf16.mxu1 %v11532_v53  ;;  %v11542_v47 = vld [vmem:[#allocation33_spill] sm:$0xff]  ;;  %v11543_v53 = vld [vmem:[#allocation35_spill] sm:$0xff] }
 0x7fe   :  { %7202 = vmatpush1.bf16.msra.mxu0 %v11533_v51  ;;  %7234 = vmatpush1.bf16.msra.mxu1 %v11534_v5  ;;  %v11544_v51 = vld [vmem:[#allocation36_spill] sm:$0xff]  ;;  %v11578_v5 = vld [vmem:[#allocation99_spill] sm:$0xff] }
 0x7ff   :  { %7204 = vmatprep.subr.bf16.mxu0 %v11535_v4  ;;  %7236 = vmatprep.subr.bf16.mxu1 %v11536_v28  ;;  %v11559_v28 = vld [vmem:[#allocation51_spill] sm:$0xff]  ;;  %v11577_v4 = vld [vmem:[#allocation69_spill] sm:$0xff] }
 0x802   :  { %7206 = vmatpush1.bf16.msra.mxu0 %v11537_v63  ;;  %7238 = vmatpush1.bf16.msra.mxu1 %v11538_v14  ;;  %v11545_v14 = vld [vmem:[#allocation37_spill] sm:$0xff]  ;;  %v11558_v63 = vld [vmem:[#allocation50_spill] sm:$0xff] }
 0x803   :  { %7208 = vmatprep.subr.bf16.mxu0 %v11539_v26  ;;  %7240 = vmatprep.subr.bf16.mxu1 %v11540_v43  ;;  %v11546_v26 = vld [vmem:[#allocation38_spill] sm:$0xff]  ;;  %v11547_v43 = vld [vmem:[#allocation39_spill] sm:$0xff] }
 0x806   :  { %7210 = vmatpush1.bf16.msra.mxu0 %v11541_v22  ;;  %7242 = vmatpush1.bf16.msra.mxu1 %v11542_v47  ;;  %v11548_v22 = vld [vmem:[#allocation40_spill] sm:$0xff] }
 0x807   :  { %7244 = vmatprep.subr.bf16.mxu0 %v11543_v53  ;;  %7276 = vmatprep.subr.bf16.mxu1 %v11544_v51  ;;  %v11550_v51 = vld [vmem:[#allocation42_spill] sm:$0xff]  ;;  %v11551_v53 = vld [vmem:[#allocation43_spill] sm:$0xff]  ;;  %v11556_v47 = vld [vmem:[#allocation48_spill] sm:$0xff] }
 0x809   :  { %4488 = vmatmul.mubr.f32.vlgmr.msra.gmra.mrb[24].mxu0 %v10449_v55  ;;  %4565 = vmatmul.mubr.f32.vlgmr.msra.gmra.mrb[24].mxu1 %v10449_v55  ;;  %v11549_v55 = vld [vmem:[#allocation41_spill] sm:$0xff] }
 0x80a   :  { %4493 = vmatprep.mubr.f32.mxu0 %v11172_v30  ;;  %4570 = vmatprep.mubr.f32.mxu1 %v11172_v30 }
 0x80b   :  { %7246 = vmatpush1.bf16.msra.mxu0 %v11545_v14  ;;  %7278 = vmatpush1.bf16.msra.mxu1 %v11546_v26  ;;  %v11552_v14 = vld [vmem:[#allocation44_spill] sm:$0xff]  ;;  %v11553_v26 = vld [vmem:[#allocation45_spill] sm:$0xff] }
 0x80c   :  { %7248 = vmatprep.subr.bf16.mxu0 %v11547_v43  ;;  %7280 = vmatprep.subr.bf16.mxu1 %v11548_v22  ;;  %v11554_v43 = vld [vmem:[#allocation46_spill] sm:$0xff]  ;;  %v11555_v22 = vld [vmem:[#allocation47_spill] sm:$0xff] }
 0x80d   :  { %4494 = vmatmul.mubr.f32.gmra.mrb[26].mxu0 %v10457_v40  ;;  %4571 = vmatmul.mubr.f32.gmra.mrb[26].mxu1 %v10457_v40  ;;  %v11557_v40 = vld [vmem:[#allocation49_spill] sm:$0xff] }
 0x80e   :  { %4711 = vmatprep.mubr.f32.mxu0 %v11172_v30  ;;  %4788 = vmatprep.mubr.f32.mxu1 %v11172_v30 }
 0x80f   :  { %7250 = vmatpush1.bf16.msra.mxu0 %v11549_v55  ;;  %7282 = vmatpush1.bf16.msra.mxu1 %v11550_v51  ;;  %v11560_v55 = vld [vmem:[#allocation52_spill] sm:$0xff]  ;;  %v11561_v51 = vld [vmem:[#allocation53_spill] sm:$0xff] }
 0x810   :  { %7252 = vmatprep.subr.bf16.mxu0 %v11551_v53  ;;  %7284 = vmatprep.subr.bf16.mxu1 %v11552_v14  ;;  %v11562_v53 = vld [vmem:[#allocation54_spill] sm:$0xff]  ;;  %v11563_v14 = vld [vmem:[#allocation55_spill] sm:$0xff] }
 0x813   :  { %7254 = vmatpush1.bf16.msra.mxu0 %v11553_v26  ;;  %7286 = vmatpush1.bf16.msra.mxu1 %v11554_v43  ;;  %v11564_v26 = vld [vmem:[#allocation56_spill] sm:$0xff]  ;;  %v11565_v43 = vld [vmem:[#allocation57_spill] sm:$0xff] }
 0x814   :  { %7256 = vmatprep.subr.bf16.mxu0 %v11555_v22  ;;  %7288 = vmatprep.subr.bf16.mxu1 %v11556_v47  ;;  %v11566_v22 = vld [vmem:[#allocation58_spill] sm:$0xff]  ;;  %v11567_v47 = vld [vmem:[#allocation59_spill] sm:$0xff] }
 0x817   :  { %7258 = vmatpush1.bf16.msra.mxu0 %v11557_v40  ;;  %7290 = vmatpush1.bf16.msra.mxu1 %v11558_v63  ;;  %v11568_v40 = vld [vmem:[#allocation60_spill] sm:$0xff]  ;;  %v11569_v63 = vld [vmem:[#allocation61_spill] sm:$0xff] }
 0x818   :  { %7260 = vmatprep.subr.bf16.mxu0 %v11559_v28  ;;  %7292 = vmatprep.subr.bf16.mxu1 %v11560_v55  ;;  %v11570_v28 = vld [vmem:[#allocation62_spill] sm:$0xff]  ;;  %v11571_v55 = vld [vmem:[#allocation63_spill] sm:$0xff] }
 0x81b   :  { %7262 = vmatpush1.bf16.msra.mxu0 %v11561_v51  ;;  %7294 = vmatpush1.bf16.msra.mxu1 %v11562_v53  ;;  %v11572_v51 = vld [vmem:[#allocation64_spill] sm:$0xff]  ;;  %v11573_v53 = vld [vmem:[#allocation65_spill] sm:$0xff] }
 0x81c   :  { %7264 = vmatprep.subr.bf16.mxu0 %v11563_v14  ;;  %7296 = vmatprep.subr.bf16.mxu1 %v11564_v26  ;;  %v11574_v14 = vld [vmem:[#allocation66_spill] sm:$0xff]  ;;  %v11575_v26 = vld [vmem:[#allocation67_spill] sm:$0xff] }
 0x81f   :  { %7266 = vmatpush1.bf16.msra.mxu0 %v11565_v43  ;;  %7298 = vmatpush1.bf16.msra.mxu1 %v11566_v22  ;;  %v11576_v43 = vld [vmem:[#allocation68_spill] sm:$0xff] }
 0x820   :  { %7268 = vmatprep.subr.bf16.mxu0 %v11567_v47  ;;  %7300 = vmatprep.subr.bf16.mxu1 %v11568_v40 }
 0x823   :  { %7270 = vmatpush1.bf16.msra.mxu0 %v11569_v63  ;;  %7302 = vmatpush1.bf16.msra.mxu1 %v11570_v28 }
 0x824   :  { %7272 = vmatprep.subr.bf16.mxu0 %v11571_v55  ;;  %7304 = vmatprep.subr.bf16.mxu1 %v11572_v51  ;;  %v11579_v55 = vld [vmem:[#allocation100_spill] sm:$0xff] }
 0x827   :  { %7274 = vmatpush1.bf16.msra.mxu0 %v11573_v53  ;;  %7306 = vmatpush1.bf16.msra.mxu1 %v11574_v14 }
 0x828   :  { %7308 = vmatprep.subr.bf16.mxu0 %v11575_v26  ;;  %7340 = vmatprep.subr.bf16.mxu1 %v11576_v43 }
 0x8bc   :  { %v4254_v22 = vpop.f32.mrb[52].mxu0  ;;  %v4331_v47 = vpop.f32.mrb[52].mxu1 }
 0x8bd   :  { %v7699_v40 = vadd.f32 %v4254_v22, %v11577_v4  ;;  %v7703_v63 = vadd.f32 %v4331_v47, %v11578_v5  ;;  %v4256_v11 = vpop.f32.mrb[53].mxu0  ;;  %v10573_v28 = vpop.f32.mrb[53].mxu1 }
 0x8be   :  { %v7700_v39 = vadd.f32 %v4256_v11, %v11579_v55 }
 0x8bf   :  { %v5859_v51 = vmul.f32 -1.442695, %v7699_v40  ;;  %v5861_v24 = vmul.f32 -1.442695, %v7703_v63 }
 0x8c0   :  { %v5860_v53 = vmul.f32 -1.442695, %v7700_v39  ;;  %v4260_v18 = vpop.f32.mrb[54].mxu0  ;;  %v4337_v14 = vpop.f32.mrb[54].mxu1 }
 0x8c1   :  { %8248 = vpow2.f32 %v5859_v51  ;;  %v7701_v26 = vadd.f32 %v4260_v18, %v11577_v4  ;;  %v7705_v43 = vadd.f32 %v4337_v14, %v11578_v5  ;;  %v4262_v25 = vpop.f32.mrb[55].mxu0  ;;  %v10578_v12 = vpop.f32.mrb[55].mxu1 }
 0x8c2   :  { %8250 = vpow2.f32 %v5861_v24  ;;  %v7702_v22 = vadd.f32 %v4262_v25, %v11579_v55 }
 0x8c3   :  { %8252 = vpow2.f32 %v5860_v53  ;;  %v5863_v47 = vmul.f32 -1.442695, %v7701_v26  ;;  %v5865_v41 = vmul.f32 -1.442695, %v7705_v43 }
 0x8c4   :  { %v5864_v11 = vmul.f32 -1.442695, %v7702_v22 }
 0x8c5   :  { %8254 = vpow2.f32 %v5863_v47 }
 0x8c6   :  { %8256 = vpow2.f32 %v5865_v41 }
 0x8c7   :  { %8258 = vpow2.f32 %v5864_v11 }
 0x8cb   :  { %v8249_v39 = vpop.eup %8248 }
 0x8cc   :  { %v8251_v63 = vpop.eup %8250  ;;  %v4374_v18 = vadd.f32 1.0, %v8249_v39 }
 0x8cd   :  { %v8253_v51 = vpop.eup %8252  ;;  %v4376_v40 = vadd.f32 1.0, %v8251_v63 }
 0x8ce   :  { %v4375_v4 = vadd.f32 1.0, %v8253_v51 }
 0x8cf   :  { %v8255_v14 = vpop.eup %8254  ;;  %8260 = vrcp.f32 %v4376_v40 }
 0x8d0   :  { %v8257_v5 = vpop.eup %8256  ;;  %8262 = vrcp.f32 %v4375_v4  ;;  %v4378_v26 = vadd.f32 1.0, %v8255_v14 }
 0x8d1   :  { %v8259_v38 = vpop.eup %8258  ;;  %v4380_v24 = vadd.f32 1.0, %v8257_v5  ;;  %8264 = vrcp.f32 %v4374_v18 }
 0x8d2   :  { %v4379_v25 = vadd.f32 1.0, %v8259_v38 }
 0x8d3   :  { %8266 = vrcp.f32 %v4380_v24 }
 0x8d4   :  { %8268 = vrcp.f32 %v4379_v25 }
 0x8d5   :  { %8270 = vrcp.f32 %v4378_v26 }
 0x8d9   :  { %v8261_v41 = vpop.eup %8260 }
 0x8da   :  { %v4398_v43 = vmul.f32 2.0, %v8261_v41  ;;  %v8263_v53 = vpop.eup %8262 }
 0x8db   :  { %v8265_v22 = vpop.eup %8264  ;;  %v4402_v14 = vmul.f32 %v8263_v53, %v10427_v31 }
 0x8dc   :  { %v5867_v47 = vadd.f32 -1.0, %v4398_v43  ;;  %v4489_v11 = vpop.f32.mrb[24].mxu0  ;;  %v4566_v39 = vpop.f32.mrb[24].mxu1 }
 0x8dd   :  { %v8267_v63 = vpop.eup %8266  ;;  %v7619_v51 = vadd.f32 %v4489_v11, %v11221_v21  ;;  %v7651_v40 = vadd.f32 %v4566_v39, %v11222_v44  ;;  %v4491_v4 = vpop.f32.mrb[25].mxu0 }
 0x8de   :  { %v4568_v5 = vpop.f32.mrb[25].mxu1  ;;  %v8269_v18 = vpop.eup %8268  ;;  %v4404_v38 = vmul.f32 %v8265_v22, %v5867_v47  ;;  %v4399_v24 = vmul.f32 2.0, %v8267_v63  ;;  %v7620_v25 = vadd.f32 %v4491_v4, %v11223_v54 }
 0x8df   :  { %v5869_v26 = vmul.f32 -1.442695, %v7619_v51  ;;  %v5871_v41 = vmul.f32 -1.442695, %v7651_v40  ;;  %v8271_v27 = vpop.eup %8270  ;;  %v4403_v11 = vmul.f32 %v8269_v18, %v10433_v50  ;;  %v7652_v50 = vadd.f32 %v4568_v5, %v11224_v8 }
 0x8e0   :  { %v10585_v55 = vadd.f32 %v4404_v38, %v4402_v14  ;;  %v5868_v43 = vadd.f32 -1.0, %v4399_v24  ;;  %v5870_v0 = vmul.f32 -1.442695, %v7620_v25  ;;  %v4495_v36 = vpop.f32.mrb[26].mxu0  ;;  %v4572_v59 = vpop.f32.mrb[26].mxu1 }
 0x8e1   :  { %v7621_v39 = vadd.f32 %v4495_v36, %v11221_v21  ;;  %v4497_v62 = vpop.f32.mrb[27].mxu0  ;;  %8272 = vpow2.f32 %v5869_v26  ;;  %v7653_v31 = vadd.f32 %v4572_v59, %v11222_v44  ;;  %v4574_v47 = vpop.f32.mrb[27].mxu1  ;;  %v5872_v18 = vmul.f32 -1.442695, %v7652_v50 }
 0x8e2   :  { %v4405_v22 = vmul.f32 %v8271_v27, %v5868_v43  ;;  %v7622_v53 = vadd.f32 %v4497_v62, %v11223_v54  ;;  %8274 = vpow2.f32 %v5871_v41  ;;  %v7654_v59 = vadd.f32 %v4574_v47, %v11224_v8 }
 0x8e3   :  { %v5873_v63 = vmul.f32 -1.442695, %v7621_v39  ;;  %8276 = vpow2.f32 %v5870_v0  ;;  %v5875_v51 = vmul.f32 -1.442695, %v7653_v31 }
 0x8e4   :  { %v5874_v40 = vmul.f32 -1.442695, %v7622_v53  ;;  %v10591_v4 = vadd.f32 %v4405_v22, %v4403_v11  ;;  %v5876_v26 = vmul.f32 -1.442695, %v7654_v59 }
 0x8e5   :  { %8278 = vpow2.f32 %v5873_v63 }
 0x8e6   :  { %8280 = vpow2.f32 %v5875_v51 }
 0x8e7   :  { %8282 = vpow2.f32 %v5874_v40 }
 0x8eb   :  { %v8273_v36 = vpop.eup %8272 }
 0x8ec   :  { %v8275_v27 = vpop.eup %8274  ;;  %v4609_v14 = vadd.f32 1.0, %v8273_v36 }
 0x8ed   :  { %v8277_v38 = vpop.eup %8276  ;;  %v4611_v62 = vadd.f32 1.0, %v8275_v27 }
 0x8ee   :  { %v4610_v24 = vadd.f32 1.0, %v8277_v38 }
 0x8ef   :  { %v8279_v25 = vpop.eup %8278  ;;  %8284 = vrcp.f32 %v4611_v62 }
 0x8f0   :  { %v8281_v0 = vpop.eup %8280  ;;  %8286 = vpow2.f32 %v5872_v18  ;;  %v4613_v5 = vadd.f32 1.0, %v8279_v25 }
 0x8f1   :  { %v8283_v41 = vpop.eup %8282  ;;  %8288 = vrcp.f32 %v4610_v24  ;;  %v4615_v43 = vadd.f32 1.0, %v8281_v0 }
 0x8f2   :  { %8290 = vrcp.f32 %v4609_v14  ;;  %v4614_v11 = vadd.f32 1.0, %v8283_v41 }
 0x8f3   :  { %8292 = vrcp.f32 %v4615_v43 }
 0x8f4   :  { %8294 = vpow2.f32 %v5876_v26 }
 0x8f5   :  { %8296 = vrcp.f32 %v4614_v11 }
 0x8f6   :  { %8298 = vrcp.f32 %v4613_v5  ;;  %v7706_v5 = vadd.f32 %v10578_v12, %v9810_v52 }
 0x8f9   :  { %v8285_v39 = vpop.eup %8284 }
 0x8fa   :  { %v8287_v22 = vpop.eup %8286  ;;  %v4633_v31 = vmul.f32 2.0, %v8285_v39 }
 0x8fb   :  { %v8289_v53 = vpop.eup %8288  ;;  %v4612_v40 = vadd.f32 1.0, %v8287_v22 }
 0x8fc   :  { %v8291_v47 = vpop.eup %8290  ;;  %v5877_v63 = vadd.f32 -1.0, %v4633_v31  ;;  %v4637_v27 = vmul.f32 %v8289_v53, %v10438_v49  ;;  %v7704_v49 = vadd.f32 %v10573_v28, %v9810_v52  ;;  %v5866_v28 = vmul.f32 -1.442695, %v7706_v5  ;;  %v11590_v5 = vld [vmem:[#allocation12_spill] sm:$0xff] }
 0x8fd   :  { %v8293_v51 = vpop.eup %8292  ;;  %8300 = vrcp.f32 %v4612_v40 }
 0x8fe   :  { %v8295_v50 = vpop.eup %8294  ;;  %v4639_v36 = vmul.f32 %v8291_v47, %v5877_v63  ;;  %v4634_v18 = vmul.f32 2.0, %v8293_v51  ;;  %v5862_v11 = vmul.f32 -1.442695, %v7704_v49  ;;  %v11586_v49 = vld [vmem:[#allocation8_spill] sm:$0xff] }
 0x8ff   :  { %v8297_v59 = vpop.eup %8296  ;;  %v4616_v24 = vadd.f32 1.0, %v8295_v50  ;;  %v11580_v50 = vld [vmem:[#allocation97_spill] sm:$0xff] }
 0x900   :  { %v10596_v38 = vadd.f32 %v4639_v36, %v4637_v27  ;;  %v5878_v62 = vadd.f32 -1.0, %v4634_v18  ;;  %v8299_v14 = vpop.eup %8298  ;;  %v4638_v0 = vmul.f32 %v8297_v59, %v10442_v37  ;;  %v11581_v36 = vld [vmem:[#allocation98_spill] sm:$0xff]  ;;  %v11582_v18 = vld [vmem:[#allocation3_spill] sm:$0xff]  ;;  %v11583_v59 = vld [vmem:[#allocation4_spill] sm:$0xff] }
 0x902   :  { %8302 = vtanh.f32 %v10596_v38  ;;  %v4640_v25 = vmul.f32 %v8299_v14, %v5878_v62 }
 0x903   :  { %8304 = vrcp.f32 %v4616_v24  ;;  %v11584_v24 = vld [vmem:[#allocation6_spill] sm:$0xff] }
 0x904   :  { %v10600_v26 = vadd.f32 %v4640_v25, %v4638_v0  ;;  %v11585_v25 = vld [vmem:[#allocation5_spill] sm:$0xff] }
 0x906   :  { %8306 = vtanh.f32 %v10600_v26 }
 0x907   :  { %v8301_v41 = vpop.eup %8300  ;;  %8308 = vpow2.f32 %v5862_v11  ;;  %v11589_v11 = vld [vmem:[#allocation9_spill] sm:$0xff] }
 0x908   :  { %8310 = vpow2.f32 %v5866_v28  ;;  %v11593_v28 = vld [vmem:[#allocation13_spill] sm:$0xff] }
 0x909   :  { %8312 = vtanh.f32 %v10585_v55 }
 0x90c   :  { %v8303_v43 = vpop.eup %8302 }
 0x90d   :  { %v10607_v39 = vmul.f32 %v8303_v43, %v8301_v41  ;;  %v8305_v22 = vpop.eup %8304  ;;  %v11587_v41 = vld [vmem:[#allocation7_spill] sm:$0xff]  ;;  %v11588_v43 = vld [vmem:[#allocation10_spill] sm:$0xff] }
 0x90f   :  { %4712 = vmatmul.mubr.f32.vlgmr.msra.gmra.mrb[56].mxu0 %v10607_v39  ;;  %4789 = vmatmul.mubr.f32.vlgmr.msra.gmra.mrb[56].mxu1 %v10607_v39 }
 0x910   :  { %v8307_v37 = vpop.eup %8306  ;;  %7310 = vmatpush1.bf16.msra.mxu0 %v11228_v10  ;;  %7342 = vmatpush1.bf16.msra.mxu1 %v9420_v23 }
 0x911   :  { %4717 = vmatprep.mubr.f32.mxu0 %v11172_v30  ;;  %4794 = vmatprep.mubr.f32.mxu1 %v11172_v30  ;;  %v10615_v31 = vmul.f32 %v8307_v37, %v8305_v22  ;;  %v8309_v12 = vpop.eup %8308  ;;  %v11591_v22 = vld [vmem:[#allocation11_spill] sm:$0xff]  ;;  %v11592_v37 = vld [vmem:[#allocation14_spill] sm:$0xff] }
 0x912   :  { %7312 = vmatprep.subr.bf16.mxu0 %v11229_v20  ;;  %7344 = vmatprep.subr.bf16.mxu1 %v11230_v1  ;;  %v4377_v53 = vadd.f32 1.0, %v8309_v12  ;;  %v8311_v47 = vpop.eup %8310  ;;  %v11594_v12 = vld [vmem:[#allocation16_spill] sm:$0xff] }
 0x913   :  { %4718 = vmatmul.mubr.f32.gmra.mrb[58].mxu0 %v10615_v31  ;;  %4795 = vmatmul.mubr.f32.gmra.mrb[58].mxu1 %v10615_v31  ;;  %v4381_v63 = vadd.f32 1.0, %v8311_v47  ;;  %v8313_v51 = vpop.eup %8312  ;;  %v11596_v47 = vld [vmem:[#allocation18_spill] sm:$0xff] }
 0x914   :  { %7314 = vmatpush1.bf16.msra.mxu0 %v11231_v19  ;;  %7346 = vmatpush1.bf16.msra.mxu1 %v11232_v58  ;;  %8314 = vrcp.f32 %v4377_v53  ;;  %v11595_v53 = vld [vmem:[#allocation15_spill] sm:$0xff] }
 0x915   :  { %7316 = vmatprep.subr.bf16.mxu0 %v11233_v17  ;;  %7348 = vmatprep.subr.bf16.mxu1 %v11234_v42  ;;  %8316 = vtanh.f32 %v10591_v4 }
 0x916   :  { %4865 = vmatprep.mubr.f32.mxu0 %v11172_v30  ;;  %4942 = vmatprep.mubr.f32.mxu1 %v11172_v30  ;;  %8318 = vrcp.f32 %v4381_v63  ;;  %v11597_v63 = vld [vmem:[#allocation17_spill] sm:$0xff] }
 0x918   :  { %7318 = vmatpush1.bf16.msra.mxu0 %v11235_v57  ;;  %7350 = vmatpush1.bf16.msra.mxu1 %v11236_v15 }
 0x919   :  { %7320 = vmatprep.subr.bf16.mxu0 %v11237_v56  ;;  %7352 = vmatprep.subr.bf16.mxu1 %v11296_v13 }
 0x91c   :  { %7322 = vmatpush1.bf16.msra.mxu0 %v11297_v46  ;;  %7354 = vmatpush1.bf16.msra.mxu1 %v11240_v3 }
 0x91d   :  { %7324 = vmatprep.subr.bf16.mxu0 %v11298_v33  ;;  %7356 = vmatprep.subr.bf16.mxu1 %v11242_v35 }
 0x91e   :  { %v8315_v40 = vpop.eup %8314 }
 0x91f   :  { %v4410_v27 = vmul.f32 %v8315_v40, %v8313_v51  ;;  %v8317_v62 = vpop.eup %8316  ;;  %v11598_v51 = vld [vmem:[#allocation20_spill] sm:$0xff]  ;;  %v11599_v40 = vld [vmem:[#allocation19_spill] sm:$0xff] }
 0x920   :  { %7326 = vmatpush1.bf16.msra.mxu0 %v11243_v9  ;;  %7358 = vmatpush1.bf16.msra.mxu1 %v11244_v2  ;;  %v8319_v14 = vpop.eup %8318 }
 0x921   :  { %7328 = vmatprep.subr.bf16.mxu0 %v11245_v29  ;;  %7360 = vmatprep.subr.bf16.mxu1 %v11246_v34  ;;  %v4411_v0 = vmul.f32 %v8319_v14, %v8317_v62  ;;  %v11603_v62 = vld [vmem:[#allocation23_spill] sm:$0xff]  ;;  %v11604_v14 = vld [vmem:[#allocation26_spill] sm:$0xff] }
 0x924   :  { %7330 = vmatpush1.bf16.msra.mxu0 %v9608_v48  ;;  %7362 = vmatpush1.bf16.msra.mxu1 %v11247_v16 }
 0x925   :  { %7332 = vmatprep.subr.bf16.mxu0 %v9620_v7  ;;  %7364 = vmatprep.subr.bf16.mxu1 %v9622_v6 }
 0x928   :  { %7334 = vmatpush1.bf16.msra.mxu0 %v11299_v45  ;;  %7366 = vmatpush1.bf16.msra.mxu1 %v9646_v32 }
 0x929   :  { %7336 = vmatprep.subr.bf16.mxu0 %v9653_v61  ;;  %7368 = vmatprep.subr.bf16.mxu1 %v9655_v60 }
 0x92c   :  { %7338 = vmatpush1.bf16.msra.mxu0 %v11580_v50  ;;  %7370 = vmatpush1.bf16.msra.mxu1 %v11581_v36 }
 0x92d   :  { %7372 = vmatprep.subr.bf16.mxu0 %v11582_v18  ;;  %7404 = vmatprep.subr.bf16.mxu1 %v11583_v59  ;;  %v11601_v18 = vld [vmem:[#allocation21_spill] sm:$0xff]  ;;  %v11602_v59 = vld [vmem:[#allocation24_spill] sm:$0xff] }
 0x92f   :  { %4866 = vmatmul.mubr.f32.vlgmr.msra.gmra.mrb[56].mxu0 %v4410_v27  ;;  %4943 = vmatmul.mubr.f32.vlgmr.msra.gmra.mrb[56].mxu1 %v4410_v27  ;;  %v11600_v27 = vld [vmem:[#allocation22_spill] sm:$0xff] }
 0x930   :  { %7374 = vmatpush1.bf16.msra.mxu0 %v11584_v24  ;;  %7406 = vmatpush1.bf16.msra.mxu1 %v11585_v25  ;;  %v11605_v24 = vld [vmem:[#allocation25_spill] sm:$0xff]  ;;  %v11606_v25 = vld [vmem:[#allocation28_spill] sm:$0xff] }
 0x931   :  { %4871 = vmatprep.mubr.f32.mxu0 %v11172_v30  ;;  %4948 = vmatprep.mubr.f32.mxu1 %v11172_v30 }
 0x932   :  { %7376 = vmatprep.subr.bf16.mxu0 %v11586_v49  ;;  %7408 = vmatprep.subr.bf16.mxu1 %v11587_v41  ;;  %v11608_v49 = vld [vmem:[#allocation30_spill] sm:$0xff]  ;;  %v11609_v41 = vld [vmem:[#allocation29_spill] sm:$0xff] }
 0x933   :  { %4872 = vmatmul.mubr.f32.gmra.mrb[58].mxu0 %v4411_v0  ;;  %4949 = vmatmul.mubr.f32.gmra.mrb[58].mxu1 %v4411_v0  ;;  %v11607_v0 = vld [vmem:[#allocation27_spill] sm:$0xff] }
 0x934   :  { %7378 = vmatpush1.bf16.msra.mxu0 %v11588_v43  ;;  %7410 = vmatpush1.bf16.msra.mxu1 %v11589_v11  ;;  %v11610_v43 = vld [vmem:[#allocation32_spill] sm:$0xff]  ;;  %v11611_v11 = vld [vmem:[#allocation31_spill] sm:$0xff] }
 0x935   :  { %7380 = vmatprep.subr.bf16.mxu0 %v11590_v5  ;;  %7412 = vmatprep.subr.bf16.mxu1 %v11591_v22  ;;  %v11612_v5 = vld [vmem:[#allocation34_spill] sm:$0xff]  ;;  %v11613_v22 = vld [vmem:[#allocation33_spill] sm:$0xff] }
 0x936   :  { %5100 = vmatprep.mubr.f32.mxu0 %v11172_v30  ;;  %5177 = vmatprep.mubr.f32.mxu1 %v11172_v30 }
 0x938   :  { %7382 = vmatpush1.bf16.msra.mxu0 %v11592_v37  ;;  %7414 = vmatpush1.bf16.msra.mxu1 %v11593_v28  ;;  %v11614_v37 = vld [vmem:[#allocation35_spill] sm:$0xff]  ;;  %v11615_v28 = vld [vmem:[#allocation36_spill] sm:$0xff] }
 0x939   :  { %7384 = vmatprep.subr.bf16.mxu0 %v11594_v12  ;;  %7416 = vmatprep.subr.bf16.mxu1 %v11595_v53  ;;  %v11616_v12 = vld [vmem:[#allocation37_spill] sm:$0xff]  ;;  %v11617_v53 = vld [vmem:[#allocation38_spill] sm:$0xff] }
 0x93c   :  { %7386 = vmatpush1.bf16.msra.mxu0 %v11596_v47  ;;  %7418 = vmatpush1.bf16.msra.mxu1 %v11597_v63  ;;  %v11618_v47 = vld [vmem:[#allocation39_spill] sm:$0xff]  ;;  %v11619_v63 = vld [vmem:[#allocation40_spill] sm:$0xff] }
 0x93d   :  { %7388 = vmatprep.subr.bf16.mxu0 %v11598_v51  ;;  %7420 = vmatprep.subr.bf16.mxu1 %v11599_v40  ;;  %v11621_v51 = vld [vmem:[#allocation42_spill] sm:$0xff]  ;;  %v11622_v40 = vld [vmem:[#allocation43_spill] sm:$0xff] }
 0x940   :  { %7390 = vmatpush1.bf16.msra.mxu0 %v11600_v27  ;;  %7422 = vmatpush1.bf16.msra.mxu1 %v11601_v18  ;;  %v11623_v27 = vld [vmem:[#allocation44_spill] sm:$0xff]  ;;  %v11624_v18 = vld [vmem:[#allocation45_spill] sm:$0xff] }
 0x941   :  { %7392 = vmatprep.subr.bf16.mxu0 %v11602_v59  ;;  %7424 = vmatprep.subr.bf16.mxu1 %v11603_v62  ;;  %v11625_v59 = vld [vmem:[#allocation46_spill] sm:$0xff]  ;;  %v11626_v62 = vld [vmem:[#allocation47_spill] sm:$0xff] }
 0x944   :  { %7394 = vmatpush1.bf16.msra.mxu0 %v11604_v14  ;;  %7426 = vmatpush1.bf16.msra.mxu1 %v11605_v24  ;;  %v11627_v14 = vld [vmem:[#allocation48_spill] sm:$0xff]  ;;  %v11629_v24 = vld [vmem:[#allocation50_spill] sm:$0xff] }
 0x945   :  { %7396 = vmatprep.subr.bf16.mxu0 %v11606_v25  ;;  %7428 = vmatprep.subr.bf16.mxu1 %v11607_v0  ;;  %v11630_v25 = vld [vmem:[#allocation51_spill] sm:$0xff]  ;;  %v11631_v0 = vld [vmem:[#allocation52_spill] sm:$0xff] }
 0x948   :  { %7398 = vmatpush1.bf16.msra.mxu0 %v11608_v49  ;;  %7430 = vmatpush1.bf16.msra.mxu1 %v11609_v41  ;;  %v11632_v49 = vld [vmem:[#allocation53_spill] sm:$0xff]  ;;  %v11633_v41 = vld [vmem:[#allocation54_spill] sm:$0xff] }
 0x949   :  { %7400 = vmatprep.subr.bf16.mxu0 %v11610_v43  ;;  %7432 = vmatprep.subr.bf16.mxu1 %v11611_v11  ;;  %v11634_v43 = vld [vmem:[#allocation55_spill] sm:$0xff]  ;;  %v11635_v11 = vld [vmem:[#allocation56_spill] sm:$0xff] }
 0x94c   :  { %7402 = vmatpush1.bf16.msra.mxu0 %v11612_v5  ;;  %7434 = vmatpush1.bf16.msra.mxu1 %v11613_v22  ;;  %v11636_v5 = vld [vmem:[#allocation57_spill] sm:$0xff]  ;;  %v11637_v22 = vld [vmem:[#allocation58_spill] sm:$0xff] }
 0x94d   :  { %7436 = vmatprep.subr.bf16.mxu0 %v11614_v37  ;;  %7468 = vmatprep.subr.bf16.mxu1 %v11615_v28  ;;  %v11638_v37 = vld [vmem:[#allocation59_spill] sm:$0xff]  ;;  %v11639_v28 = vld [vmem:[#allocation60_spill] sm:$0xff] }
 0x94f   :  { %5101 = vmatmul.mubr.f32.vlgmr.msra.gmra.mrb[28].mxu0 %v10607_v39  ;;  %5178 = vmatmul.mubr.f32.vlgmr.msra.gmra.mrb[28].mxu1 %v10607_v39  ;;  %v11620_v39 = vld [vmem:[#allocation41_spill] sm:$0xff] }
 0x950   :  { %5106 = vmatprep.mubr.f32.mxu0 %v11172_v30  ;;  %5183 = vmatprep.mubr.f32.mxu1 %v11172_v30 }
 0x951   :  { %7438 = vmatpush1.bf16.msra.mxu0 %v11616_v12  ;;  %7470 = vmatpush1.bf16.msra.mxu1 %v11617_v53  ;;  %v11640_v12 = vld [vmem:[#allocation61_spill] sm:$0xff]  ;;  %v11641_v53 = vld [vmem:[#allocation62_spill] sm:$0xff] }
 0x952   :  { %7440 = vmatprep.subr.bf16.mxu0 %v11618_v47  ;;  %7472 = vmatprep.subr.bf16.mxu1 %v11619_v63  ;;  %v11642_v47 = vld [vmem:[#allocation63_spill] sm:$0xff]  ;;  %v11643_v63 = vld [vmem:[#allocation64_spill] sm:$0xff] }
 0x953   :  { %5107 = vmatmul.mubr.f32.gmra.mrb[30].mxu0 %v10615_v31  ;;  %5184 = vmatmul.mubr.f32.gmra.mrb[30].mxu1 %v10615_v31  ;;  %v11628_v31 = vld [vmem:[#allocation49_spill] sm:$0xff] }
 0x954   :  { %5324 = vmatprep.mubr.f32.mxu0 %v11172_v30  ;;  %5401 = vmatprep.mubr.f32.mxu1 %v11172_v30 }
 0x955   :  { %7442 = vmatpush1.bf16.msra.mxu0 %v11620_v39  ;;  %7474 = vmatpush1.bf16.msra.mxu1 %v11621_v51  ;;  %v11644_v39 = vld [vmem:[#allocation65_spill] sm:$0xff]  ;;  %v11645_v51 = vld [vmem:[#allocation66_spill] sm:$0xff] }
 0x956   :  { %7444 = vmatprep.subr.bf16.mxu0 %v11622_v40  ;;  %7476 = vmatprep.subr.bf16.mxu1 %v11623_v27  ;;  %v11646_v40 = vld [vmem:[#allocation67_spill] sm:$0xff]  ;;  %v11647_v27 = vld [vmem:[#allocation68_spill] sm:$0xff] }
 0x959   :  { %7446 = vmatpush1.bf16.msra.mxu0 %v11624_v18  ;;  %7478 = vmatpush1.bf16.msra.mxu1 %v11625_v59 }
 0x95a   :  { %7448 = vmatprep.subr.bf16.mxu0 %v11626_v62  ;;  %7480 = vmatprep.subr.bf16.mxu1 %v11627_v14  ;;  %v11648_v62 = vld [vmem:[#allocation69_spill] sm:$0xff] }
 0x95d   :  { %7450 = vmatpush1.bf16.msra.mxu0 %v11628_v31  ;;  %7482 = vmatpush1.bf16.msra.mxu1 %v11629_v24  ;;  %v11649_v31 = vld [vmem:[#allocation99_spill] sm:$0xff] }
 0x95e   :  { %7452 = vmatprep.subr.bf16.mxu0 %v11630_v25  ;;  %7484 = vmatprep.subr.bf16.mxu1 %v11631_v0 }
 0x961   :  { %7454 = vmatpush1.bf16.msra.mxu0 %v11632_v49  ;;  %7486 = vmatpush1.bf16.msra.mxu1 %v11633_v41  ;;  %v11650_v49 = vld [vmem:[#allocation100_spill] sm:$0xff] }
 0x962   :  { %7456 = vmatprep.subr.bf16.mxu0 %v11634_v43  ;;  %7488 = vmatprep.subr.bf16.mxu1 %v11635_v11 }
 0x965   :  { %7458 = vmatpush1.bf16.msra.mxu0 %v11636_v5  ;;  %7490 = vmatpush1.bf16.msra.mxu1 %v11637_v22 }
 0x966   :  { %7460 = vmatprep.subr.bf16.mxu0 %v11638_v37  ;;  %7492 = vmatprep.subr.bf16.mxu1 %v11639_v28 }
 0x969   :  { %7462 = vmatpush1.bf16.msra.mxu0 %v11640_v12  ;;  %7494 = vmatpush1.bf16.msra.mxu1 %v11641_v53 }
 0x96a   :  { %7464 = vmatprep.subr.bf16.mxu0 %v11642_v47  ;;  %7496 = vmatprep.subr.bf16.mxu1 %v11643_v63 }
 0x96d   :  { %7466 = vmatpush1.bf16.msra.mxu0 %v11644_v39  ;;  %7498 = vmatpush1.bf16.msra.mxu1 %v11645_v51 }
 0x96e   :  { %7500 = vmatprep.subr.bf16.mxu0 %v11646_v40  ;;  %7532 = vmatprep.subr.bf16.mxu1 %v11647_v27 }
 0xa02   :  { %v4867_v18 = vpop.f32.mrb[56].mxu0  ;;  %v4944_v59 = vpop.f32.mrb[56].mxu1 }
 0xa03   :  { %v7707_v14 = vadd.f32 %v4867_v18, %v11648_v62  ;;  %v7711_v24 = vadd.f32 %v4944_v59, %v11649_v31  ;;  %v4869_v25 = vpop.f32.mrb[57].mxu0  ;;  %v10731_v0 = vpop.f32.mrb[57].mxu1 }
 0xa04   :  { %v7708_v41 = vadd.f32 %v4869_v25, %v11650_v49 }
 0xa05   :  { %v5879_v43 = vmul.f32 -1.442695, %v7707_v14  ;;  %v5881_v11 = vmul.f32 -1.442695, %v7711_v24 }
 0xa06   :  { %v5880_v5 = vmul.f32 -1.442695, %v7708_v41  ;;  %v4873_v22 = vpop.f32.mrb[58].mxu0  ;;  %v4950_v37 = vpop.f32.mrb[58].mxu1 }
 0xa07   :  { %8320 = vpow2.f32 %v5879_v43  ;;  %v7709_v28 = vadd.f32 %v4873_v22, %v11648_v62  ;;  %v7713_v12 = vadd.f32 %v4950_v37, %v11649_v31  ;;  %v4875_v53 = vpop.f32.mrb[59].mxu0  ;;  %v10736_v47 = vpop.f32.mrb[59].mxu1 }
 0xa08   :  { %8322 = vpow2.f32 %v5881_v11  ;;  %v7710_v63 = vadd.f32 %v4875_v53, %v11650_v49 }
 0xa09   :  { %8324 = vpow2.f32 %v5880_v5  ;;  %v5883_v39 = vmul.f32 -1.442695, %v7709_v28  ;;  %v5885_v51 = vmul.f32 -1.442695, %v7713_v12 }
 0xa0a   :  { %v5884_v40 = vmul.f32 -1.442695, %v7710_v63 }
 0xa0b   :  { %8326 = vpow2.f32 %v5883_v39 }
 0xa0c   :  { %8328 = vpow2.f32 %v5885_v51 }
 0xa0d   :  { %8330 = vpow2.f32 %v5884_v40 }
 0xa11   :  { %v8321_v27 = vpop.eup %8320 }
 0xa12   :  { %v8323_v18 = vpop.eup %8322  ;;  %v4987_v24 = vadd.f32 1.0, %v8321_v27 }
 0xa13   :  { %v8325_v59 = vpop.eup %8324  ;;  %v4989_v14 = vadd.f32 1.0, %v8323_v18 }
 0xa14   :  { %v4988_v25 = vadd.f32 1.0, %v8325_v59 }
 0xa15   :  { %v8327_v41 = vpop.eup %8326  ;;  %8332 = vrcp.f32 %v4989_v14 }
 0xa16   :  { %v8329_v43 = vpop.eup %8328  ;;  %8334 = vrcp.f32 %v4988_v25  ;;  %v4991_v37 = vadd.f32 1.0, %v8327_v41 }
 0xa17   :  { %v8331_v22 = vpop.eup %8330  ;;  %v4993_v11 = vadd.f32 1.0, %v8329_v43  ;;  %8336 = vrcp.f32 %v4987_v24 }
 0xa18   :  { %v4992_v5 = vadd.f32 1.0, %v8331_v22 }
 0xa19   :  { %8338 = vrcp.f32 %v4993_v11 }
 0xa1a   :  { %8340 = vrcp.f32 %v4992_v5 }
 0xa1b   :  { %8342 = vrcp.f32 %v4991_v37 }
 0xa1f   :  { %v8333_v28 = vpop.eup %8332 }
 0xa20   :  { %v5011_v12 = vmul.f32 2.0, %v8333_v28  ;;  %v8335_v53 = vpop.eup %8334 }
 0xa21   :  { %v8337_v63 = vpop.eup %8336  ;;  %v5015_v41 = vmul.f32 %v8335_v53, %v10585_v55 }
 0xa22   :  { %v5887_v39 = vadd.f32 -1.0, %v5011_v12  ;;  %v5102_v51 = vpop.f32.mrb[28].mxu0  ;;  %v5179_v40 = vpop.f32.mrb[28].mxu1 }
 0xa23   :  { %v8339_v27 = vpop.eup %8338  ;;  %v7623_v18 = vadd.f32 %v5102_v51, %v11221_v21  ;;  %v7655_v59 = vadd.f32 %v5179_v40, %v11222_v44  ;;  %v5104_v14 = vpop.f32.mrb[29].mxu0 }
 0xa24   :  { %v5181_v25 = vpop.f32.mrb[29].mxu1  ;;  %v8341_v24 = vpop.eup %8340  ;;  %v5017_v43 = vmul.f32 %v8337_v63, %v5887_v39  ;;  %v5012_v22 = vmul.f32 2.0, %v8339_v27  ;;  %v7624_v11 = vadd.f32 %v5104_v14, %v11223_v54 }
 0xa25   :  { %v5889_v5 = vmul.f32 -1.442695, %v7623_v18  ;;  %v5891_v37 = vmul.f32 -1.442695, %v7655_v59  ;;  %v8343_v62 = vpop.eup %8342  ;;  %v5016_v51 = vmul.f32 %v8341_v24, %v10591_v4 }
 0xa26   :  { %v10743_v28 = vadd.f32 %v5017_v43, %v5015_v41  ;;  %v5888_v12 = vadd.f32 -1.0, %v5012_v22  ;;  %v5890_v49 = vmul.f32 -1.442695, %v7624_v11  ;;  %v5108_v31 = vpop.f32.mrb[30].mxu0  ;;  %v5185_v36 = vpop.f32.mrb[30].mxu1 }
 0xa27   :  { %v7625_v40 = vadd.f32 %v5108_v31, %v11221_v21  ;;  %v5110_v50 = vpop.f32.mrb[31].mxu0  ;;  %8344 = vpow2.f32 %v5889_v5  ;;  %v7657_v55 = vadd.f32 %v5185_v36, %v11222_v44  ;;  %v5187_v39 = vpop.f32.mrb[31].mxu1  ;;  %v7656_v21 = vadd.f32 %v5181_v25, %v11224_v8 }
 0xa28   :  { %v5018_v63 = vmul.f32 %v8343_v62, %v5888_v12  ;;  %v7626_v53 = vadd.f32 %v5110_v50, %v11223_v54  ;;  %8346 = vpow2.f32 %v5891_v37  ;;  %v7658_v44 = vadd.f32 %v5187_v39, %v11224_v8 }
 0xa29   :  { %v5893_v27 = vmul.f32 -1.442695, %v7625_v40  ;;  %8348 = vpow2.f32 %v5890_v49  ;;  %v5895_v18 = vmul.f32 -1.442695, %v7657_v55  ;;  %v5892_v31 = vmul.f32 -1.442695, %v7656_v21 }
 0xa2a   :  { %v5894_v59 = vmul.f32 -1.442695, %v7626_v53  ;;  %v10749_v14 = vadd.f32 %v5018_v63, %v5016_v51  ;;  %v5896_v41 = vmul.f32 -1.442695, %v7658_v44 }
 0xa2b   :  { %8350 = vpow2.f32 %v5893_v27 }
 0xa2c   :  { %8352 = vpow2.f32 %v5895_v18 }
 0xa2d   :  { %8354 = vpow2.f32 %v5894_v59 }
 0xa31   :  { %v8345_v4 = vpop.eup %8344 }
 0xa32   :  { %v8347_v62 = vpop.eup %8346  ;;  %v5222_v50 = vadd.f32 1.0, %v8345_v4 }
 0xa33   :  { %v8349_v36 = vpop.eup %8348  ;;  %v5224_v54 = vadd.f32 1.0, %v8347_v62 }
 0xa34   :  { %v5223_v24 = vadd.f32 1.0, %v8349_v36 }
 0xa35   :  { %v8351_v43 = vpop.eup %8350  ;;  %8356 = vrcp.f32 %v5224_v54 }
 0xa36   :  { %v8353_v49 = vpop.eup %8352  ;;  %8358 = vpow2.f32 %v5892_v31  ;;  %v5226_v25 = vadd.f32 1.0, %v8351_v43 }
 0xa37   :  { %v8355_v22 = vpop.eup %8354  ;;  %8360 = vrcp.f32 %v5223_v24  ;;  %v5228_v11 = vadd.f32 1.0, %v8353_v49  ;;  %v7712_v24 = vadd.f32 %v10731_v0, %v9810_v52 }
 0xa38   :  { %8362 = vrcp.f32 %v5222_v50  ;;  %v5227_v5 = vadd.f32 1.0, %v8355_v22 }
 0xa39   :  { %8364 = vrcp.f32 %v5228_v11 }
 0xa3a   :  { %8366 = vpow2.f32 %v5896_v41  ;;  %v7714_v41 = vadd.f32 %v10736_v47, %v9810_v52 }
 0xa3b   :  { %8368 = vrcp.f32 %v5227_v5 }
 0xa3c   :  { %8370 = vrcp.f32 %v5226_v25  ;;  %v5650_v25 = vld [vmem:[%s10871_s7 + $0x60] sm:$0xff] }
 0xa3f   :  { %v8357_v8 = vpop.eup %8356 }
 0xa40   :  { %v8359_v37 = vpop.eup %8358  ;;  %v5246_v12 = vmul.f32 2.0, %v8357_v8  ;;  %v5651_v8 = vld [vmem:[%s10871_s7 + $0x68] sm:$0xff] }
 0xa41   :  { %v8361_v51 = vpop.eup %8360  ;;  %v5225_v53 = vadd.f32 1.0, %v8359_v37  ;;  %v7587_v37 = vpack.c.bf16 %v5651_v8, %v5650_v25 }
 0xa42   :  { %v8363_v40 = vpop.eup %8362  ;;  %v5897_v63 = vadd.f32 -1.0, %v5246_v12  ;;  %v5250_v18 = vmul.f32 %v8361_v51, %v10596_v38  ;;  %v5882_v38 = vmul.f32 -1.442695, %v7712_v24  ;;  %v5652_v12 = vld [vmem:[%s10871_s7 + $0x70] sm:$0xff]  ;;  %v5653_v51 = vld [vmem:[%s10871_s7 + $0x78] sm:$0xff] }
 0xa43   :  { %v8365_v55 = vpop.eup %8364  ;;  %8372 = vrcp.f32 %v5225_v53  ;;  %v11653_v53 = vld [vmem:[#allocation69_spill] sm:$0xff] }
 0xa44   :  { %v8367_v39 = vpop.eup %8366  ;;  %v5252_v27 = vmul.f32 %v8363_v40, %v5897_v63  ;;  %v5247_v59 = vmul.f32 2.0, %v8365_v55  ;;  %v7591_v40 = vpack.c.bf16 %v5653_v51, %v5652_v12 }
 0xa45   :  { %v8369_v21 = vpop.eup %8368  ;;  %v5229_v44 = vadd.f32 1.0, %v8367_v39 }
 0xa46   :  { %v5254_v4 = vadd.f32 %v5252_v27, %v5250_v18  ;;  %v5898_v62 = vadd.f32 -1.0, %v5247_v59  ;;  %v8371_v31 = vpop.eup %8370  ;;  %v5251_v54 = vmul.f32 %v8369_v21, %v10600_v26  ;;  %v5886_v26 = vmul.f32 -1.442695, %v7714_v41  ;;  %v11654_v27 = vld [vmem:[#allocation99_spill] sm:$0xff] }
 0xa48   :  { %8374 = vtanh.f32 %v5254_v4  ;;  %v5253_v36 = vmul.f32 %v8371_v31, %v5898_v62  ;;  %v11655_v4 = vld [vmem:[#allocation100_spill] sm:$0xff] }
 0xa49   :  { %8376 = vrcp.f32 %v5229_v44 }
 0xa4a   :  { %v5255_v50 = vadd.f32 %v5253_v36, %v5251_v54 }
 0xa4c   :  { %8378 = vtanh.f32 %v5255_v50 }
 0xa4d   :  { %v8373_v43 = vpop.eup %8372  ;;  %8380 = vpow2.f32 %v5882_v38 }
 0xa4e   :  { %8382 = vpow2.f32 %v5886_v26 }
 0xa4f   :  { %8384 = vtanh.f32 %v10743_v28 }
 0xa52   :  { %v8375_v49 = vpop.eup %8374 }
 0xa53   :  { %v5258_v22 = vmul.f32 %v8375_v49, %v8373_v43  ;;  %v8377_v11 = vpop.eup %8376 }
 0xa55   :  { %5325 = vmatmul.mubr.f32.vlgmr.msra.gmra.mrb[60].mxu0 %v5258_v22  ;;  %5402 = vmatmul.mubr.f32.vlgmr.msra.gmra.mrb[60].mxu1 %v5258_v22 }
 0xa56   :  { %v8379_v5 = vpop.eup %8378  ;;  %7502 = vmatpush1.bf16.msra.mxu0 %v11228_v10  ;;  %7534 = vmatpush1.bf16.msra.mxu1 %v9420_v23 }
 0xa57   :  { %5330 = vmatprep.mubr.f32.mxu0 %v11172_v30  ;;  %5407 = vmatprep.mubr.f32.mxu1 %v11172_v30  ;;  %v5259_v0 = vmul.f32 %v8379_v5, %v8377_v11  ;;  %v8381_v23 = vpop.eup %8380 }
 0xa58   :  { %7504 = vmatprep.subr.bf16.mxu0 %v11229_v20  ;;  %7536 = vmatprep.subr.bf16.mxu1 %v11230_v1  ;;  %v4990_v10 = vadd.f32 1.0, %v8381_v23  ;;  %v8383_v20 = vpop.eup %8382 }
 0xa59   :  { %5331 = vmatmul.mubr.f32.gmra.mrb[62].mxu0 %v5259_v0  ;;  %5408 = vmatmul.mubr.f32.gmra.mrb[62].mxu1 %v5259_v0  ;;  %v4994_v1 = vadd.f32 1.0, %v8383_v20 }
 0xa5a   :  { %7506 = vmatpush1.bf16.msra.mxu0 %v11231_v19  ;;  %7538 = vmatpush1.bf16.msra.mxu1 %v11232_v58  ;;  %8386 = vrcp.f32 %v4990_v10  ;;  %v8385_v19 = vpop.eup %8384 }
 0xa5b   :  { %7508 = vmatprep.subr.bf16.mxu0 %v11233_v17  ;;  %7540 = vmatprep.subr.bf16.mxu1 %v11234_v42  ;;  %8388 = vtanh.f32 %v10749_v14  ;;  %v11652_v17 = vld [vmem:[#allocation98_spill] sm:$0xff] }
 0xa5c   :  { %5478 = vmatprep.mubr.f32.mxu0 %v11172_v30  ;;  %5555 = vmatprep.mubr.f32.mxu1 %v11172_v30  ;;  %8390 = vrcp.f32 %v4994_v1 }
 0xa5e   :  { %7510 = vmatpush1.bf16.msra.mxu0 %v11235_v57  ;;  %7542 = vmatpush1.bf16.msra.mxu1 %v11236_v15  ;;  %v5640_v15 = vld [vmem:[%s10871_s7 + $0x10] sm:$0xff] }
 0xa5f   :  { %7512 = vmatprep.subr.bf16.mxu0 %v11237_v56  ;;  %7544 = vmatprep.subr.bf16.mxu1 %v11296_v13  ;;  %v5647_v13 = vld [vmem:[%s10871_s7 + $0x48] sm:$0xff] }
 0xa62   :  { %7514 = vmatpush1.bf16.msra.mxu0 %v11297_v46  ;;  %7546 = vmatpush1.bf16.msra.mxu1 %v11240_v3  ;;  %v5643_v3 = vld [vmem:[%s10871_s7 + $0x28] sm:$0xff] }
 0xa63   :  { %7516 = vmatprep.subr.bf16.mxu0 %v11298_v33  ;;  %7548 = vmatprep.subr.bf16.mxu1 %v11242_v35  ;;  %v5644_v35 = vld [vmem:[%s10871_s7 + $0x30] sm:$0xff] }
 0xa64   :  { %v8387_v58 = vpop.eup %8386  ;;  %v5648_v33 = vld [vmem:[%s10871_s7 + $0x50] sm:$0xff] }
 0xa65   :  { %v5023_v42 = vmul.f32 %v8387_v58, %v8385_v19  ;;  %v8389_v57 = vpop.eup %8388 }
 0xa66   :  { %7518 = vmatpush1.bf16.msra.mxu0 %v11243_v9  ;;  %7550 = vmatpush1.bf16.msra.mxu1 %v11244_v2  ;;  %v5645_v9 = vld [vmem:[%s10871_s7 + $0x38] sm:$0xff] }
 0xa67   :  { %7520 = vmatprep.subr.bf16.mxu0 %v11245_v29  ;;  %7552 = vmatprep.subr.bf16.mxu1 %v11246_v34  ;;  %v5642_v34 = vld [vmem:[%s10871_s7 + $0x20] sm:$0xff]  ;;  %v7575_v2 = vpack.c.bf16 %v5645_v9, %v5644_v35 }
 0xa68   :  { %v5646_v29 = vld [vmem:[%s10871_s7 + $0x40] sm:$0xff] }
 0xa69   :  { %v7579_v46 = vpack.c.bf16 %v5647_v13, %v5646_v29 }
 0xa6a   :  { %7522 = vmatpush1.bf16.msra.mxu0 %v9608_v48  ;;  %7554 = vmatpush1.bf16.msra.mxu1 %v11247_v16  ;;  %v11651_v48 = vld [vmem:[#allocation97_spill] sm:$0xff]  ;;  %v7571_v16 = vpack.c.bf16 %v5643_v3, %v5642_v34 }
 0xa6b   :  { %7524 = vmatprep.subr.bf16.mxu0 %v9620_v7  ;;  %7556 = vmatprep.subr.bf16.mxu1 %v9622_v6  ;;  %v8391_v7 = vpop.eup %8390 }
 0xa6c   :  { %v5024_v6 = vmul.f32 %v8391_v7, %v8389_v57 }
 0xa6e   :  { %7526 = vmatpush1.bf16.msra.mxu0 %v11299_v45  ;;  %7558 = vmatpush1.bf16.msra.mxu1 %v9646_v32  ;;  %v5649_v45 = vld [vmem:[%s10871_s7 + $0x58] sm:$0xff] }
 0xa6f   :  { %7528 = vmatprep.subr.bf16.mxu0 %v9653_v61  ;;  %7560 = vmatprep.subr.bf16.mxu1 %v9655_v60  ;;  %v5638_v61 = vld [vmem:[%s10871_s7] sm:$0xff]  ;;  %v5639_v60 = vld [vmem:[%s10871_s7 + $0x8] sm:$0xff]  ;;  %v7583_v47 = vpack.c.bf16 %v5649_v45, %v5648_v33 }
 0xa70   :  { %v7563_v32 = vpack.c.bf16 %v5639_v60, %v5638_v61 }
 0xa72   :  { %7530 = vmatpush1.bf16.msra.mxu0 %v11651_v48  ;;  %7562 = vmatpush1.bf16.msra.mxu1 %v11652_v17 }
 0xa73   :  { %7564 = vmatprep.subr.bf16.mxu0 %v7563_v32 }
 0xa75   :  { %5479 = vmatmul.mubr.f32.vlgmr.msra.gmra.mrb[60].mxu0 %v5023_v42  ;;  %5556 = vmatmul.mubr.f32.vlgmr.msra.gmra.mrb[60].mxu1 %v5023_v42 }
 0xa76   :  { %5484 = vmatprep.mubr.f32.mxu0 %v11172_v30  ;;  %5561 = vmatprep.mubr.f32.mxu1 %v11172_v30  ;;  %v5641_v30 = vld [vmem:[%s10871_s7 + $0x18] sm:$0xff] }
 0xa77   :  { %7566 = vmatpush3.bf16.msra.mxu0 %v7563_v32  ;;  %v7567_v56 = vpack.c.bf16 %v5641_v30, %v5640_v15 }
 0xa79   :  { %5485 = vmatmul.mubr.f32.gmra.mrb[62].mxu0 %v5024_v6  ;;  %5562 = vmatmul.mubr.f32.gmra.mrb[62].mxu1 %v5024_v6 }
 0xa7a   :  { %7568 = vmatprep.subr.bf16.mxu0 %v7567_v56 }
 0xa7b   :  { %7570 = vmatpush3.bf16.msra.mxu0 %v7567_v56 }
 0xa7c   :  { %7572 = vmatprep.subr.bf16.mxu0 %v7571_v16 }
 0xa7f   :  { %7574 = vmatpush3.bf16.msra.mxu0 %v7571_v16 }
 0xa80   :  { %7576 = vmatprep.subr.bf16.mxu0 %v7575_v2 }
 0xa83   :  { %7578 = vmatpush3.bf16.msra.mxu0 %v7575_v2 }
 0xa84   :  { %7580 = vmatprep.subr.bf16.mxu0 %v7579_v46 }
 0xa87   :  { %7582 = vmatpush3.bf16.msra.mxu0 %v7579_v46 }
 0xa88   :  { %7584 = vmatprep.subr.bf16.mxu0 %v7583_v47 }
 0xa8b   :  { %7586 = vmatpush3.bf16.msra.mxu0 %v7583_v47 }
 0xa8c   :  { %7588 = vmatprep.subr.bf16.mxu0 %v7587_v37 }
 0xa8f   :  { %7590 = vmatpush3.bf16.msra.mxu0 %v7587_v37 }
 0xa90   :  { %7592 = vmatprep.subr.bf16.mxu0 %v7591_v40 }
 0xa93   :  { %7594 = vmatpush3.bf16.msra.mxu0 %v7591_v40 }
 0xb48   :  { %v5480_v63 = vpop.f32.mrb[60].mxu0  ;;  %v5557_v55 = vpop.f32.mrb[60].mxu1 }
 0xb49   :  { %v7715_v39 = vadd.f32 %v5480_v63, %v11653_v53  ;;  %v7719_v18 = vadd.f32 %v5557_v55, %v11654_v27  ;;  %v5482_v59 = vpop.f32.mrb[61].mxu0  ;;  %v5559_v21 = vpop.f32.mrb[61].mxu1 }
 0xb4a   :  { %v7716_v62 = vadd.f32 %v5482_v59, %v11655_v4  ;;  %v7720_v26 = vadd.f32 %v5559_v21, %v9810_v52 }
 0xb4b   :  { %v5899_v31 = vmul.f32 -1.442695, %v7715_v39  ;;  %v5901_v44 = vmul.f32 -1.442695, %v7719_v18 }
 0xb4c   :  { %v5900_v36 = vmul.f32 -1.442695, %v7716_v62  ;;  %v5486_v54 = vpop.f32.mrb[62].mxu0  ;;  %v5563_v50 = vpop.f32.mrb[62].mxu1  ;;  %v5902_v10 = vmul.f32 -1.442695, %v7720_v26 }
 0xb4d   :  { %8392 = vpow2.f32 %v5899_v31  ;;  %v7717_v24 = vadd.f32 %v5486_v54, %v11653_v53  ;;  %v7721_v43 = vadd.f32 %v5563_v50, %v11654_v27  ;;  %v5488_v49 = vpop.f32.mrb[63].mxu0  ;;  %v5565_v38 = vpop.f32.mrb[63].mxu1  ;;  %v5909_v53 = vld [vmem:[%s10872_s8] ss:$0 sm:$0xff] }
 0xb4e   :  { %8394 = vpow2.f32 %v5901_v44  ;;  %v7718_v41 = vadd.f32 %v5488_v49, %v11655_v4  ;;  %v7722_v20 = vadd.f32 %v5565_v38, %v9810_v52 }
 0xb4f   :  { %8396 = vpow2.f32 %v5900_v36  ;;  %v5903_v22 = vmul.f32 -1.442695, %v7717_v24  ;;  %v5905_v11 = vmul.f32 -1.442695, %v7721_v43 }
 0xb50   :  { %v5904_v5 = vmul.f32 -1.442695, %v7718_v41  ;;  %v5906_v57 = vmul.f32 -1.442695, %v7722_v20 }
 0xb51   :  { %8398 = vpow2.f32 %v5903_v22 }
 0xb52   :  { %8400 = vpow2.f32 %v5905_v11 }
 0xb53   :  { %8402 = vpow2.f32 %v5904_v5 }
 0xb57   :  { %v8393_v0 = vpop.eup %8392 }
 0xb58   :  { %v8395_v23 = vpop.eup %8394  ;;  %v5600_v58 = vadd.f32 1.0, %v8393_v0 }
 0xb59   :  { %v8397_v1 = vpop.eup %8396  ;;  %v5602_v19 = vadd.f32 1.0, %v8395_v23 }
 0xb5a   :  { %v5601_v48 = vadd.f32 1.0, %v8397_v1 }
 0xb5b   :  { %v8399_v17 = vpop.eup %8398  ;;  %8404 = vrcp.f32 %v5602_v19 }
 0xb5c   :  { %v8401_v42 = vpop.eup %8400  ;;  %8406 = vpow2.f32 %v5902_v10  ;;  %v5604_v60 = vadd.f32 1.0, %v8399_v17 }
 0xb5d   :  { %v8403_v7 = vpop.eup %8402  ;;  %8408 = vrcp.f32 %v5601_v48  ;;  %v5606_v6 = vadd.f32 1.0, %v8401_v42 }
 0xb5e   :  { %8410 = vrcp.f32 %v5600_v58  ;;  %v5605_v61 = vadd.f32 1.0, %v8403_v7 }
 0xb5f   :  { %8412 = vrcp.f32 %v5606_v6 }
 0xb60   :  { %8414 = vpow2.f32 %v5906_v57 }
 0xb61   :  { %8416 = vrcp.f32 %v5605_v61 }
 0xb62   :  { %8418 = vrcp.f32 %v5604_v60 }
 0xb65   :  { %v8405_v52 = vpop.eup %8404 }
 0xb66   :  { %v8407_v32 = vpop.eup %8406  ;;  %v5624_v15 = vmul.f32 2.0, %v8405_v52 }
 0xb67   :  { %v8409_v30 = vpop.eup %8408  ;;  %v5603_v16 = vadd.f32 1.0, %v8407_v32 }
 0xb68   :  { %v8411_v56 = vpop.eup %8410  ;;  %v5907_v34 = vadd.f32 -1.0, %v5624_v15  ;;  %v5628_v2 = vmul.f32 %v8409_v30, %v10743_v28 }
 0xb69   :  { %v8413_v3 = vpop.eup %8412  ;;  %8420 = vrcp.f32 %v5603_v16 }
 0xb6a   :  { %v8415_v35 = vpop.eup %8414  ;;  %v5630_v9 = vmul.f32 %v8411_v56, %v5907_v34  ;;  %v5625_v29 = vmul.f32 2.0, %v8413_v3 }
 0xb6b   :  { %v8417_v13 = vpop.eup %8416  ;;  %v5607_v47 = vadd.f32 1.0, %v8415_v35 }
 0xb6c   :  { %v5908_v46 = vadd.f32 -1.0, %v5625_v29  ;;  %v5632_v33 = vadd.f32 %v5630_v9, %v5628_v2  ;;  %v8419_v45 = vpop.eup %8418  ;;  %v5629_v8 = vmul.f32 %v8417_v13, %v10749_v14 }
 0xb6e   :  { %v5631_v25 = vmul.f32 %v8419_v45, %v5908_v46  ;;  %8422 = vtanh.f32 %v5632_v33 }
 0xb6f   :  { %8424 = vrcp.f32 %v5607_v47 }
 0xb70   :  { %v5633_v37 = vadd.f32 %v5631_v25, %v5629_v8 }
 0xb72   :  { %8426 = vtanh.f32 %v5633_v37 }
 0xb73   :  { %v8421_v12 = vpop.eup %8420 }
 0xb78   :  { %v8423_v51 = vpop.eup %8422 }
 0xb79   :  { %v5636_v40 = vmul.f32 %v8423_v51, %v8421_v12  ;;  %v8425_v63 = vpop.eup %8424 }
 0xb7b   :  { %5960 = vmatprep.mubr.f32.mxu0 %v5636_v40 }
 0xb7c   :  { %v8427_v28 = vpop.eup %8426 }
 0xb7d   :  { %v5637_v55 = vmul.f32 %v8427_v28, %v8425_v63 }
 0xb7f   :  { %5961 = vmatmul.mubr.f32.vlgmr.msra.gmra.mrb[64].mxu0 %v5637_v55 }
 0xc52   :  { %v5962_v39 = vpop.f32.mrb[64].mxu0 }
 0xc53   :  { %v5733_v27 = vadd.f32 %v5962_v39, %v5909_v53  ;;  %v5727_v18 = vpop.f32.mrb[65].mxu0 }
 0xc54   :  { %v5728_v14 = vadd.f32 %v5909_v53, %v5727_v18 }
 0xc55   :  { %5737 = vst [vmem:[%s10873_s9 + $0x8] sm:$0xff] %v5733_v27 }
 0xc56   :  { %5736 = vst [vmem:[%s10873_s9] sm:$0xff] %v5728_v14 }

</bundles_post_ra>
